<compile_context>
chip_gen: v7x
topology: tpu7x:2x2x1
jax: 0.10.0
libtpu: 0.0.40
codegen_flags: <defaults>
</compile_context>

<pallas_src>
import functools

import jax
import jax.numpy as jnp
from jax import lax
from jax.experimental import pallas as pl
from jax.experimental.pallas import tpu as pltpu


# ---------------------------------------------------------------------------
# Fully fused resblock kernel (one grid step == one image)
# ---------------------------------------------------------------------------
def _resblock_cat_kernel(x_ref, w1_ref, sh1_ref, w2_ref, sh2_ref, w3_ref, sh3_ref,
                         scx_ref, shx_ref, ox_ref, ob_ref, pad_x, pad_h,
                         *, H, W, Cin, OC, slope, compute_dtype, precision):
    # x_ref   : (1, H, W*Cin) f32       unpadded image, (w, c) flattened on lanes
    # wK_ref  : (3, (W+2)*C, W*OC)      banded per-dy weights (BN scale folded)
    # shK_ref : (1, W*OC) f32           fused conv-bias / BN shift, tiled per (w, oc)
    # scx/shx : (1, W*Cin) f32          outer-BN affine for the passthrough channels
    # ox_ref  : (1, H, W*Cin) f32       passthrough half of the concat
    # ob_ref  : (1, H, W*OC)  f32       branch half of the concat
    # pad_x   : VMEM (H+2, (W+2)*Cin)   padded conv1 input (compute dtype)
    # pad_h   : VMEM (H+2, (W+2)*OC)    padded conv2/conv3 input (compute dtype)

    def conv3x3(pad_ref, w_ref, sh_ref):
        # 3 banded, lane-aligned MXU matmuls (one per dy), f32 accumulation.
        acc = jnp.dot(pad_ref[0:H, :], w_ref[0],
                      preferred_element_type=jnp.float32, precision=precision)
        acc = acc + jnp.dot(pad_ref[1:H + 1, :], w_ref[1],
                            preferred_element_type=jnp.float32, precision=precision)
        acc = acc + jnp.dot(pad_ref[2:H + 2, :], w_ref[2],
                            preferred_element_type=jnp.float32, precision=precision)
        y = acc + sh_ref[...]
        return jnp.maximum(y, slope * y)          # LeakyReLU (0 < slope < 1), f32

    # --- conv1 + BN1 + LeakyReLU (pad + cast done in VMEM, not XLA) ---
    pad_x[...] = jnp.zeros_like(pad_x)
    pad_x[1:H + 1, Cin:Cin + W * Cin] = x_ref[0].astype(compute_dtype)
    h = conv3x3(pad_x, w1_ref, sh1_ref)

    # --- conv2 + BN2 + LeakyReLU (intermediate never leaves VMEM) ---
    pad_h[...] = jnp.zeros_like(pad_h)
    pad_h[1:H + 1, OC:OC + W * OC] = h.astype(compute_dtype)
    h = conv3x3(pad_h, w2_ref, sh2_ref)

    # --- conv3 + outer-BN(branch channels) + LeakyReLU ---
    # Border of pad_h is still zero; only the interior needs rewriting.
    pad_h[1:H + 1, OC:OC + W * OC] = h.astype(compute_dtype)
    h = conv3x3(pad_h, w3_ref, sh3_ref)
    ob_ref[0] = h.astype(ob_ref.dtype)

    # --- passthrough x channels: outer-BN affine + LeakyReLU ---
    yx = x_ref[0].astype(jnp.float32) * scx_ref[...] + shx_ref[...]
    ox_ref[0] = jnp.maximum(yx, slope * yx).astype(ox_ref.dtype)


def _banded_weights(weight, scale, W):
    """Merge the 3 dx taps of a 3x3 conv into one banded matrix per dy.

    weight: (OC, C, 3, 3), scale: (OC,) folded BN scale.
    Returns (3, (W+2)*C, W*OC) with B[dy, wp*C+c, w*OC+oc] = W[oc,c,dy,wp-w]*scale[oc]
    for 0 <= wp-w <= 2, else 0."""
    OC, C, _, _ = weight.shape
    taps = jnp.transpose(weight, (2, 3, 1, 0)) * scale.reshape(1, 1, 1, OC)  # (dy,dx,c,oc)
    wp = jnp.arange(W + 2)
    w = jnp.arange(W)
    dx = jnp.arange(3)
    band = (wp[None, None, :] == (w[None, :, None] + dx[:, None, None])
            ).astype(weight.dtype)                                           # (dx, w, wp)
    blk = jnp.einsum("xwp,yxco->ypcwo", band, taps)                          # (dy,wp,c,w,oc)
    return blk.reshape(3, (W + 2) * C, W * OC)


# ---------------------------------------------------------------------------
# Full module forward (eval-mode BN)
# ---------------------------------------------------------------------------
def resblock_cat_forward(x, params, *, eps=1e-5, slope=0.01,
                         compute_dtype=jnp.bfloat16):
    """Forward of `resblock_cat`. x: (N, in_ch, H, W) float32 -> (N, in_ch+out_ch, H, W)."""
    N, Cin, H, W = x.shape
    OC = params["w1"].shape[0]
    f32 = jnp.float32

    # NCHW -> lane-dense (N, H, W*Cin).  Tiny (single XLA pass over x).
    x_l = jnp.transpose(x, (0, 2, 3, 1)).reshape(N, H, W * Cin)

    def bn_fold(conv_bias, gamma, beta, mean, var):
        s = gamma / jnp.sqrt(var + eps)
        return s, (conv_bias - mean) * s + beta

    sc1, sh1 = bn_fold(params["b1"], params["g1"], params["beta1"],
                       params["m1"], params["v1"])
    sc2, sh2 = bn_fold(params["b2"], params["g2"], params["beta2"],
                       params["m2"], params["v2"])

    # Outer BN(in_ch+out_ch)+LeakyReLU split across the concat:
    #   branch channels -> folded into conv3 (scale into weights, shift into bias)
    #   passthrough channels -> lane-dense affine in the same kernel
    sf = params["gf"] / jnp.sqrt(params["vf"] + eps)
    sf_x, sf_c = sf[:Cin], sf[Cin:]
    shf_x = params["betaf"][:Cin] - params["mf"][:Cin] * sf_x
    shf_c = (params["b3"] - params["mf"][Cin:]) * sf_c + params["betaf"][Cin:]

    w1 = _banded_weights(params["w1"], sc1, W).astype(compute_dtype)
    w2 = _banded_weights(params["w2"], sc2, W).astype(compute_dtype)
    w3 = _banded_weights(params["w3"], sf_c, W).astype(compute_dtype)

    def tile_lane(v, width):
        return jnp.tile(v.astype(f32), width).reshape(1, width * v.shape[0])

    sh1_t = tile_lane(sh1, W)
    sh2_t = tile_lane(sh2, W)
    sh3_t = tile_lane(shf_c, W)
    scx_t = tile_lane(sf_x, W)
    shx_t = tile_lane(shf_x, W)

    # Full-f32 check path runs the MXU at HIGHEST precision (review concern);
    # bf16 fast path uses default (exact for bf16 operands, f32 accumulation).
    precision = (lax.Precision.HIGHEST
                 if jnp.dtype(compute_dtype) == jnp.dtype(jnp.float32) else None)

    kernel = functools.partial(
        _resblock_cat_kernel, H=H, W=W, Cin=Cin, OC=OC, slope=slope,
        compute_dtype=compute_dtype, precision=precision)

    out_x, out_b = pl.pallas_call(
        kernel,
        out_shape=(jax.ShapeDtypeStruct((N, H, W * Cin), f32),
                   jax.ShapeDtypeStruct((N, H, W * OC), f32)),
        grid_spec=pltpu.PrefetchScalarGridSpec(
            num_scalar_prefetch=0,
            grid=(N,),
            in_specs=[
                pl.BlockSpec((1, H, W * Cin), lambda n: (n, 0, 0)),            # x
                pl.BlockSpec((3, (W + 2) * Cin, W * OC), lambda n: (0, 0, 0)),  # w1
                pl.BlockSpec((1, W * OC), lambda n: (0, 0)),                    # sh1
                pl.BlockSpec((3, (W + 2) * OC, W * OC), lambda n: (0, 0, 0)),   # w2
                pl.BlockSpec((1, W * OC), lambda n: (0, 0)),                    # sh2
                pl.BlockSpec((3, (W + 2) * OC, W * OC), lambda n: (0, 0, 0)),   # w3
                pl.BlockSpec((1, W * OC), lambda n: (0, 0)),                    # sh3
                pl.BlockSpec((1, W * Cin), lambda n: (0, 0)),                   # scx
                pl.BlockSpec((1, W * Cin), lambda n: (0, 0)),                   # shx
            ],
            out_specs=[
                pl.BlockSpec((1, H, W * Cin), lambda n: (n, 0, 0)),             # x half
                pl.BlockSpec((1, H, W * OC), lambda n: (n, 0, 0)),              # branch
            ],
            scratch_shapes=[
                pltpu.VMEM((H + 2, (W + 2) * Cin), compute_dtype),              # pad_x
                pltpu.VMEM((H + 2, (W + 2) * OC), compute_dtype),               # pad_h
            ],
        ),
        compiler_params=pltpu.CompilerParams(
            dimension_semantics=("parallel",),        # shards images across v7x TCs
            vmem_limit_bytes=32 * 1024 * 1024,        # explicit: fine on v7x 64 MiB
        ),
    )(x_l, w1, sh1_t, w2, sh2_t, w3, sh3_t, scx_t, shx_t)

    # Re-interleave channels of the concat + back to NCHW (tiny, fuses in XLA).
    out_nhwc = jnp.concatenate(
        [out_x.reshape(N, H, W, Cin), out_b.reshape(N, H, W, OC)], axis=-1)
    return jnp.transpose(out_nhwc, (0, 3, 1, 2))


# ---------------------------------------------------------------------------
# Pure-JAX reference (f32, matches the PyTorch module in eval mode)
# ---------------------------------------------------------------------------
def _reference(x, p, *, eps=1e-5, slope=0.01):
    hi = lax.Precision.HIGHEST

    def conv(h, w, b):
        y = lax.conv_general_dilated(h, w, (1, 1), ((1, 1), (1, 1)),
                                     dimension_numbers=("NCHW", "OIHW", "NCHW"),
                                     precision=hi)
        return y + b[None, :, None, None]

    def bn(h, g, be, m, v):
        return (h - m[None, :, None, None]) / jnp.sqrt(v[None, :, None, None] + eps) \
            * g[None, :, None, None] + be[None, :, None, None]

    def lrelu(h):
        return jnp.where(h >= 0, h, slope * h)

    h = lrelu(bn(conv(x, p["w1"], p["b1"]), p["g1"], p["beta1"], p["m1"], p["v1"]))
    h = lrelu(bn(conv(h, p["w2"], p["b2"]), p["g2"], p["beta2"], p["m2"], p["v2"]))
    h = conv(h, p["w3"], p["b3"])
    cat = jnp.concatenate([x, h], axis=1)
    return lrelu(bn(cat, p["gf"], p["betaf"], p["mf"], p["vf"]))


if __name__ == "__main__":
    in_ch, out_ch = 4, 8
    N, H, W = 2, 16, 16

    keys = jax.random.split(jax.random.PRNGKey(0), 13)
    x = jax.random.normal(keys[0], (N, in_ch, H, W), dtype=jnp.float32)

    def cw(k, oc, ic):
        return 0.1 * jax.random.normal(k, (oc, ic, 3, 3), dtype=jnp.float32)

    def cb(k, oc):
        return 0.05 * jax.random.normal(k, (oc,), dtype=jnp.float32)

    params = dict(
        w1=cw(keys[1], out_ch, in_ch), b1=cb(keys[2], out_ch),
        g1=jnp.linspace(0.8, 1.2, out_ch, dtype=jnp.float32),
        beta1=jnp.linspace(-0.2, 0.2, out_ch, dtype=jnp.float32),
        m1=0.1 * jax.random.normal(keys[3], (out_ch,), dtype=jnp.float32),
        v1=jnp.abs(jax.random.normal(keys[4], (out_ch,), dtype=jnp.float32)) + 1.0,
        w2=cw(keys[5], out_ch, out_ch), b2=cb(keys[6], out_ch),
        g2=jnp.linspace(0.9, 1.1, out_ch, dtype=jnp.float32),
        beta2=jnp.linspace(-0.1, 0.1, out_ch, dtype=jnp.float32),
        m2=0.1 * jax.random.normal(keys[7], (out_ch,), dtype=jnp.float32),
        v2=jnp.abs(jax.random.normal(keys[8], (out_ch,), dtype=jnp.float32)) + 1.0,
        w3=cw(keys[9], out_ch, out_ch), b3=cb(keys[10], out_ch),
        gf=jnp.linspace(0.8, 1.2, in_ch + out_ch, dtype=jnp.float32),
        betaf=jnp.linspace(-0.2, 0.2, in_ch + out_ch, dtype=jnp.float32),
        mf=0.1 * jax.random.normal(keys[11], (in_ch + out_ch,), dtype=jnp.float32),
        vf=jnp.abs(jax.random.normal(keys[12], (in_ch + out_ch,), dtype=jnp.float32)) + 1.0,
    )

    ref = _reference(x, params)

    # Semantic check: full f32 with precision=HIGHEST MXU matmuls.
    fwd_f32 = jax.jit(functools.partial(resblock_cat_forward,
                                        compute_dtype=jnp.float32))
    out_f32 = jax.block_until_ready(fwd_f32(x, params))
    assert out_f32.shape == (N, in_ch + out_ch, H, W)
    assert jnp.allclose(out_f32, ref, atol=1e-3, rtol=1e-3), \
        "f32 kernel mismatch vs reference"

    # Fast path: bf16 MXU inputs, f32 accumulation.  bf16 rounding (inputs + folded
    # BN-scaled weights) compounds over three convs, so the tolerance is loose;
    # semantics are validated by the f32 run above.
    fwd_bf16 = jax.jit(functools.partial(resblock_cat_forward,
                                         compute_dtype=jnp.bfloat16))
    out_bf16 = jax.block_until_ready(fwd_bf16(x, params))
    assert out_bf16.shape == (N, in_ch + out_ch, H, W)
    assert jnp.allclose(out_bf16, ref, atol=1e-1, rtol=1e-1), \
        "bf16 kernel mismatch vs reference"

    print("KERNEL_OK")
</pallas_src>

<mosaic_0001>
module attributes {stable_mosaic.version = 11 : i64} {
  func.func @_resblock_cat_kernel(%arg0: i32, %arg1: memref<1x16x64xf32, #tpu.memory_space<vmem>>, %arg2: memref<3x72x128xf32, #tpu.memory_space<vmem>>, %arg3: memref<1x128xf32, #tpu.memory_space<vmem>>, %arg4: memref<3x144x128xf32, #tpu.memory_space<vmem>>, %arg5: memref<1x128xf32, #tpu.memory_space<vmem>>, %arg6: memref<3x144x128xf32, #tpu.memory_space<vmem>>, %arg7: memref<1x128xf32, #tpu.memory_space<vmem>>, %arg8: memref<1x64xf32, #tpu.memory_space<vmem>>, %arg9: memref<1x64xf32, #tpu.memory_space<vmem>>, %arg10: memref<1x16x64xf32, #tpu.memory_space<vmem>>, %arg11: memref<1x16x128xf32, #tpu.memory_space<vmem>>, %arg12: memref<18x72xf32, #tpu.memory_space<vmem>>, %arg13: memref<18x144xf32, #tpu.memory_space<vmem>>) attributes {dimension_semantics = [#tpu.dimension_semantics<parallel>], iteration_bounds = array<i64: 2>, scalar_prefetch = 0 : i64, scratch_operands = 2 : i64, tpu.core_type = #tpu.core_type<tc>, window_params = [{transform_indices = @transform_0, window_bounds = array<i64: 1, 16, 64>}, {pipeline_mode = #tpu.pipeline_mode<synchronous>, transform_indices = @transform_1, window_bounds = array<i64: 3, 72, 128>}, {pipeline_mode = #tpu.pipeline_mode<synchronous>, transform_indices = @transform_2, window_bounds = array<i64: 1, 128>}, {pipeline_mode = #tpu.pipeline_mode<synchronous>, transform_indices = @transform_3, window_bounds = array<i64: 3, 144, 128>}, {pipeline_mode = #tpu.pipeline_mode<synchronous>, transform_indices = @transform_4, window_bounds = array<i64: 1, 128>}, {pipeline_mode = #tpu.pipeline_mode<synchronous>, transform_indices = @transform_5, window_bounds = array<i64: 3, 144, 128>}, {pipeline_mode = #tpu.pipeline_mode<synchronous>, transform_indices = @transform_6, window_bounds = array<i64: 1, 128>}, {pipeline_mode = #tpu.pipeline_mode<synchronous>, transform_indices = @transform_7, window_bounds = array<i64: 1, 64>}, {pipeline_mode = #tpu.pipeline_mode<synchronous>, transform_indices = @transform_8, window_bounds = array<i64: 1, 64>}, {transform_indices = @transform_9, window_bounds = array<i64: 1, 16, 64>}, {transform_indices = @transform_10, window_bounds = array<i64: 1, 16, 128>}]} {
    %cst = arith.constant 0.000000e+00 : f32
    %0 = vector.broadcast %cst : f32 to vector<18x72xf32>
    %c0 = arith.constant 0 : index
    %c0_0 = arith.constant 0 : index
    %1 = vector.load %arg12[%c0, %c0_0] : memref<18x72xf32, #tpu.memory_space<vmem>>, vector<18x72xf32>
    tpu.vector_store %arg12[%c0, %c0_0], %0 {strides = array<i32>} : memref<18x72xf32, #tpu.memory_space<vmem>>, vector<18x72xf32>,
    %c0_1 = arith.constant 0 : index
    %c0_2 = arith.constant 0 : index
    %c0_3 = arith.constant 0 : index
    %2 = vector.load %arg1[%c0_1, %c0_2, %c0_3] : memref<1x16x64xf32, #tpu.memory_space<vmem>>, vector<1x16x64xf32>
    %3 = vector.shape_cast %2 : vector<1x16x64xf32> to vector<16x64xf32>
    %c1 = arith.constant 1 : index
    %c4 = arith.constant 4 : index
    %4 = vector.load %arg12[%c1, %c4] : memref<18x72xf32, #tpu.memory_space<vmem>>, vector<16x64xf32>
    tpu.vector_store %arg12[%c1, %c4], %3 {strides = array<i32>} : memref<18x72xf32, #tpu.memory_space<vmem>>, vector<16x64xf32>,
    %c0_4 = arith.constant 0 : index
    %c0_5 = arith.constant 0 : index
    %5 = vector.load %arg12[%c0_4, %c0_5] : memref<18x72xf32, #tpu.memory_space<vmem>>, vector<16x72xf32>
    %c0_6 = arith.constant 0 : index
    %c0_7 = arith.constant 0 : index
    %c0_8 = arith.constant 0 : index
    %6 = vector.load %arg2[%c0_6, %c0_7, %c0_8] : memref<3x72x128xf32, #tpu.memory_space<vmem>>, vector<1x72x128xf32>
    %7 = vector.shape_cast %6 : vector<1x72x128xf32> to vector<72x128xf32>
    %cst_9 = arith.constant dense<0.000000e+00> : vector<16x128xf32>
    %8 = tpu.matmul %5, %7, %cst_9 {dimension_numbers = #tpu.dot_dimension_numbers<[1], [0], [0], [1], [0, 0, 1, 1], [], []>, precision = #tpu.contract_precision<fp32>} : vector<16x72xf32>, vector<72x128xf32>, vector<16x128xf32> -> vector<16x128xf32>
    %c1_10 = arith.constant 1 : index
    %c0_11 = arith.constant 0 : index
    %9 = vector.load %arg12[%c1_10, %c0_11] : memref<18x72xf32, #tpu.memory_space<vmem>>, vector<16x72xf32>
    %c1_12 = arith.constant 1 : index
    %c0_13 = arith.constant 0 : index
    %c0_14 = arith.constant 0 : index
    %10 = vector.load %arg2[%c1_12, %c0_13, %c0_14] : memref<3x72x128xf32, #tpu.memory_space<vmem>>, vector<1x72x128xf32>
    %11 = vector.shape_cast %10 : vector<1x72x128xf32> to vector<72x128xf32>
    %cst_15 = arith.constant dense<0.000000e+00> : vector<16x128xf32>
    %12 = tpu.matmul %9, %11, %cst_15 {dimension_numbers = #tpu.dot_dimension_numbers<[1], [0], [0], [1], [0, 0, 1, 1], [], []>, precision = #tpu.contract_precision<fp32>} : vector<16x72xf32>, vector<72x128xf32>, vector<16x128xf32> -> vector<16x128xf32>
    %13 = arith.addf %8, %12 : vector<16x128xf32>
    %c2 = arith.constant 2 : index
    %c0_16 = arith.constant 0 : index
    %14 = vector.load %arg12[%c2, %c0_16] : memref<18x72xf32, #tpu.memory_space<vmem>>, vector<16x72xf32>
    %c2_17 = arith.constant 2 : index
    %c0_18 = arith.constant 0 : index
    %c0_19 = arith.constant 0 : index
    %15 = vector.load %arg2[%c2_17, %c0_18, %c0_19] : memref<3x72x128xf32, #tpu.memory_space<vmem>>, vector<1x72x128xf32>
    %16 = vector.shape_cast %15 : vector<1x72x128xf32> to vector<72x128xf32>
    %cst_20 = arith.constant dense<0.000000e+00> : vector<16x128xf32>
    %17 = tpu.matmul %14, %16, %cst_20 {dimension_numbers = #tpu.dot_dimension_numbers<[1], [0], [0], [1], [0, 0, 1, 1], [], []>, precision = #tpu.contract_precision<fp32>} : vector<16x72xf32>, vector<72x128xf32>, vector<16x128xf32> -> vector<16x128xf32>
    %18 = arith.addf %13, %17 : vector<16x128xf32>
    %c0_21 = arith.constant 0 : index
    %c0_22 = arith.constant 0 : index
    %19 = vector.load %arg3[%c0_21, %c0_22] : memref<1x128xf32, #tpu.memory_space<vmem>>, vector<1x128xf32>
    %20 = vector.broadcast %19 : vector<1x128xf32> to vector<16x128xf32>
    %21 = arith.addf %18, %20 : vector<16x128xf32>
    %cst_23 = arith.constant 0.00999999977 : f32
    %22 = vector.broadcast %cst_23 : f32 to vector<16x128xf32>
    %23 = arith.mulf %22, %21 : vector<16x128xf32>
    %24 = arith.maximumf %21, %23 : vector<16x128xf32>
    %cst_24 = arith.constant 0.000000e+00 : f32
    %25 = vector.broadcast %cst_24 : f32 to vector<18x144xf32>
    %c0_25 = arith.constant 0 : index
    %c0_26 = arith.constant 0 : index
    %26 = vector.load %arg13[%c0_25, %c0_26] : memref<18x144xf32, #tpu.memory_space<vmem>>, vector<18x144xf32>
    tpu.vector_store %arg13[%c0_25, %c0_26], %25 {strides = array<i32>} : memref<18x144xf32, #tpu.memory_space<vmem>>, vector<18x144xf32>,
    %c1_27 = arith.constant 1 : index
    %c8 = arith.constant 8 : index
    %27 = vector.load %arg13[%c1_27, %c8] : memref<18x144xf32, #tpu.memory_space<vmem>>, vector<16x128xf32>
    tpu.vector_store %arg13[%c1_27, %c8], %24 {strides = array<i32>} : memref<18x144xf32, #tpu.memory_space<vmem>>, vector<16x128xf32>,
    %c0_28 = arith.constant 0 : index
    %c0_29 = arith.constant 0 : index
    %28 = vector.load %arg13[%c0_28, %c0_29] : memref<18x144xf32, #tpu.memory_space<vmem>>, vector<16x144xf32>
    %c0_30 = arith.constant 0 : index
    %c0_31 = arith.constant 0 : index
    %c0_32 = arith.constant 0 : index
    %29 = vector.load %arg4[%c0_30, %c0_31, %c0_32] : memref<3x144x128xf32, #tpu.memory_space<vmem>>, vector<1x144x128xf32>
    %30 = vector.shape_cast %29 : vector<1x144x128xf32> to vector<144x128xf32>
    %cst_33 = arith.constant dense<0.000000e+00> : vector<16x128xf32>
    %31 = tpu.matmul %28, %30, %cst_33 {dimension_numbers = #tpu.dot_dimension_numbers<[1], [0], [0], [1], [0, 0, 1, 1], [], []>, precision = #tpu.contract_precision<fp32>} : vector<16x144xf32>, vector<144x128xf32>, vector<16x128xf32> -> vector<16x128xf32>
    %c1_34 = arith.constant 1 : index
    %c0_35 = arith.constant 0 : index
    %32 = vector.load %arg13[%c1_34, %c0_35] : memref<18x144xf32, #tpu.memory_space<vmem>>, vector<16x144xf32>
    %c1_36 = arith.constant 1 : index
    %c0_37 = arith.constant 0 : index
    %c0_38 = arith.constant 0 : index
    %33 = vector.load %arg4[%c1_36, %c0_37, %c0_38] : memref<3x144x128xf32, #tpu.memory_space<vmem>>, vector<1x144x128xf32>
    %34 = vector.shape_cast %33 : vector<1x144x128xf32> to vector<144x128xf32>
    %cst_39 = arith.constant dense<0.000000e+00> : vector<16x128xf32>
    %35 = tpu.matmul %32, %34, %cst_39 {dimension_numbers = #tpu.dot_dimension_numbers<[1], [0], [0], [1], [0, 0, 1, 1], [], []>, precision = #tpu.contract_precision<fp32>} : vector<16x144xf32>, vector<144x128xf32>, vector<16x128xf32> -> vector<16x128xf32>
    %36 = arith.addf %31, %35 : vector<16x128xf32>
    %c2_40 = arith.constant 2 : index
    %c0_41 = arith.constant 0 : index
    %37 = vector.load %arg13[%c2_40, %c0_41] : memref<18x144xf32, #tpu.memory_space<vmem>>, vector<16x144xf32>
    %c2_42 = arith.constant 2 : index
    %c0_43 = arith.constant 0 : index
    %c0_44 = arith.constant 0 : index
    %38 = vector.load %arg4[%c2_42, %c0_43, %c0_44] : memref<3x144x128xf32, #tpu.memory_space<vmem>>, vector<1x144x128xf32>
    %39 = vector.shape_cast %38 : vector<1x144x128xf32> to vector<144x128xf32>
    %cst_45 = arith.constant dense<0.000000e+00> : vector<16x128xf32>
    %40 = tpu.matmul %37, %39, %cst_45 {dimension_numbers = #tpu.dot_dimension_numbers<[1], [0], [0], [1], [0, 0, 1, 1], [], []>, precision = #tpu.contract_precision<fp32>} : vector<16x144xf32>, vector<144x128xf32>, vector<16x128xf32> -> vector<16x128xf32>
    %41 = arith.addf %36, %40 : vector<16x128xf32>
    %c0_46 = arith.constant 0 : index
    %c0_47 = arith.constant 0 : index
    %42 = vector.load %arg5[%c0_46, %c0_47] : memref<1x128xf32, #tpu.memory_space<vmem>>, vector<1x128xf32>
    %43 = vector.broadcast %42 : vector<1x128xf32> to vector<16x128xf32>
    %44 = arith.addf %41, %43 : vector<16x128xf32>
    %cst_48 = arith.constant 0.00999999977 : f32
    %45 = vector.broadcast %cst_48 : f32 to vector<16x128xf32>
    %46 = arith.mulf %45, %44 : vector<16x128xf32>
    %47 = arith.maximumf %44, %46 : vector<16x128xf32>
    %c1_49 = arith.constant 1 : index
    %c8_50 = arith.constant 8 : index
    %48 = vector.load %arg13[%c1_49, %c8_50] : memref<18x144xf32, #tpu.memory_space<vmem>>, vector<16x128xf32>
    tpu.vector_store %arg13[%c1_49, %c8_50], %47 {strides = array<i32>} : memref<18x144xf32, #tpu.memory_space<vmem>>, vector<16x128xf32>,
    %c0_51 = arith.constant 0 : index
    %c0_52 = arith.constant 0 : index
    %49 = vector.load %arg13[%c0_51, %c0_52] : memref<18x144xf32, #tpu.memory_space<vmem>>, vector<16x144xf32>
    %c0_53 = arith.constant 0 : index
    %c0_54 = arith.constant 0 : index
    %c0_55 = arith.constant 0 : index
    %50 = vector.load %arg6[%c0_53, %c0_54, %c0_55] : memref<3x144x128xf32, #tpu.memory_space<vmem>>, vector<1x144x128xf32>
    %51 = vector.shape_cast %50 : vector<1x144x128xf32> to vector<144x128xf32>
    %cst_56 = arith.constant dense<0.000000e+00> : vector<16x128xf32>
    %52 = tpu.matmul %49, %51, %cst_56 {dimension_numbers = #tpu.dot_dimension_numbers<[1], [0], [0], [1], [0, 0, 1, 1], [], []>, precision = #tpu.contract_precision<fp32>} : vector<16x144xf32>, vector<144x128xf32>, vector<16x128xf32> -> vector<16x128xf32>
    %c1_57 = arith.constant 1 : index
    %c0_58 = arith.constant 0 : index
    %53 = vector.load %arg13[%c1_57, %c0_58] : memref<18x144xf32, #tpu.memory_space<vmem>>, vector<16x144xf32>
    %c1_59 = arith.constant 1 : index
    %c0_60 = arith.constant 0 : index
    %c0_61 = arith.constant 0 : index
    %54 = vector.load %arg6[%c1_59, %c0_60, %c0_61] : memref<3x144x128xf32, #tpu.memory_space<vmem>>, vector<1x144x128xf32>
    %55 = vector.shape_cast %54 : vector<1x144x128xf32> to vector<144x128xf32>
    %cst_62 = arith.constant dense<0.000000e+00> : vector<16x128xf32>
    %56 = tpu.matmul %53, %55, %cst_62 {dimension_numbers = #tpu.dot_dimension_numbers<[1], [0], [0], [1], [0, 0, 1, 1], [], []>, precision = #tpu.contract_precision<fp32>} : vector<16x144xf32>, vector<144x128xf32>, vector<16x128xf32> -> vector<16x128xf32>
    %57 = arith.addf %52, %56 : vector<16x128xf32>
    %c2_63 = arith.constant 2 : index
    %c0_64 = arith.constant 0 : index
    %58 = vector.load %arg13[%c2_63, %c0_64] : memref<18x144xf32, #tpu.memory_space<vmem>>, vector<16x144xf32>
    %c2_65 = arith.constant 2 : index
    %c0_66 = arith.constant 0 : index
    %c0_67 = arith.constant 0 : index
    %59 = vector.load %arg6[%c2_65, %c0_66, %c0_67] : memref<3x144x128xf32, #tpu.memory_space<vmem>>, vector<1x144x128xf32>
    %60 = vector.shape_cast %59 : vector<1x144x128xf32> to vector<144x128xf32>
    %cst_68 = arith.constant dense<0.000000e+00> : vector<16x128xf32>
    %61 = tpu.matmul %58, %60, %cst_68 {dimension_numbers = #tpu.dot_dimension_numbers<[1], [0], [0], [1], [0, 0, 1, 1], [], []>, precision = #tpu.contract_precision<fp32>} : vector<16x144xf32>, vector<144x128xf32>, vector<16x128xf32> -> vector<16x128xf32>
    %62 = arith.addf %57, %61 : vector<16x128xf32>
    %c0_69 = arith.constant 0 : index
    %c0_70 = arith.constant 0 : index
    %63 = vector.load %arg7[%c0_69, %c0_70] : memref<1x128xf32, #tpu.memory_space<vmem>>, vector<1x128xf32>
    %64 = vector.broadcast %63 : vector<1x128xf32> to vector<16x128xf32>
    %65 = arith.addf %62, %64 : vector<16x128xf32>
    %cst_71 = arith.constant 0.00999999977 : f32
    %66 = vector.broadcast %cst_71 : f32 to vector<16x128xf32>
    %67 = arith.mulf %66, %65 : vector<16x128xf32>
    %68 = arith.maximumf %65, %67 : vector<16x128xf32>
    %c0_72 = arith.constant 0 : index
    %c0_73 = arith.constant 0 : index
    %c0_74 = arith.constant 0 : index
    %69 = vector.load %arg11[%c0_72, %c0_73, %c0_74] : memref<1x16x128xf32, #tpu.memory_space<vmem>>, vector<1x16x128xf32>
    %70 = vector.shape_cast %69 : vector<1x16x128xf32> to vector<16x128xf32>
    %71 = vector.shape_cast %68 : vector<16x128xf32> to vector<1x16x128xf32>
    tpu.vector_store %arg11[%c0_72, %c0_73, %c0_74], %71 {strides = array<i32>} : memref<1x16x128xf32, #tpu.memory_space<vmem>>, vector<1x16x128xf32>,
    %c0_75 = arith.constant 0 : index
    %c0_76 = arith.constant 0 : index
    %c0_77 = arith.constant 0 : index
    %72 = vector.load %arg1[%c0_75, %c0_76, %c0_77] : memref<1x16x64xf32, #tpu.memory_space<vmem>>, vector<1x16x64xf32>
    %73 = vector.shape_cast %72 : vector<1x16x64xf32> to vector<16x64xf32>
    %c0_78 = arith.constant 0 : index
    %c0_79 = arith.constant 0 : index
    %74 = vector.load %arg8[%c0_78, %c0_79] : memref<1x64xf32, #tpu.memory_space<vmem>>, vector<1x64xf32>
    %75 = vector.broadcast %74 : vector<1x64xf32> to vector<16x64xf32>
    %76 = arith.mulf %73, %75 : vector<16x64xf32>
    %c0_80 = arith.constant 0 : index
    %c0_81 = arith.constant 0 : index
    %77 = vector.load %arg9[%c0_80, %c0_81] : memref<1x64xf32, #tpu.memory_space<vmem>>, vector<1x64xf32>
    %78 = vector.broadcast %77 : vector<1x64xf32> to vector<16x64xf32>
    %79 = arith.addf %76, %78 : vector<16x64xf32>
    %cst_82 = arith.constant 0.00999999977 : f32
    %80 = vector.broadcast %cst_82 : f32 to vector<16x64xf32>
    %81 = arith.mulf %80, %79 : vector<16x64xf32>
    %82 = arith.maximumf %79, %81 : vector<16x64xf32>
    %c0_83 = arith.constant 0 : index
    %c0_84 = arith.constant 0 : index
    %c0_85 = arith.constant 0 : index
    %83 = vector.load %arg10[%c0_83, %c0_84, %c0_85] : memref<1x16x64xf32, #tpu.memory_space<vmem>>, vector<1x16x64xf32>
    %84 = vector.shape_cast %83 : vector<1x16x64xf32> to vector<16x64xf32>
    %85 = vector.shape_cast %82 : vector<16x64xf32> to vector<1x16x64xf32>
    tpu.vector_store %arg10[%c0_83, %c0_84, %c0_85], %85 {strides = array<i32>} : memref<1x16x64xf32, #tpu.memory_space<vmem>>, vector<1x16x64xf32>,
    return
  }
  func.func @transform_0(%arg0: i32) -> (i32, i32, i32) {
    %c0_i32 = arith.constant 0 : i32
    %c0_i32_0 = arith.constant 0 : i32
    %c0_i32_1 = arith.constant 0 : i32
    return %arg0, %c0_i32, %c0_i32_0 : i32, i32, i32
  }
  func.func @transform_1(%arg0: i32) -> (i32, i32, i32) {
    %c0_i32 = arith.constant 0 : i32
    %c0_i32_0 = arith.constant 0 : i32
    %c0_i32_1 = arith.constant 0 : i32
    %c0_i32_2 = arith.constant 0 : i32
    return %c0_i32, %c0_i32_0, %c0_i32_1 : i32, i32, i32
  }
  func.func @transform_2(%arg0: i32) -> (i32, i32) {
    %c0_i32 = arith.constant 0 : i32
    %c0_i32_0 = arith.constant 0 : i32
    %c0_i32_1 = arith.constant 0 : i32
    return %c0_i32, %c0_i32_0 : i32, i32
  }
  func.func @transform_3(%arg0: i32) -> (i32, i32, i32) {
    %c0_i32 = arith.constant 0 : i32
    %c0_i32_0 = arith.constant 0 : i32
    %c0_i32_1 = arith.constant 0 : i32
    %c0_i32_2 = arith.constant 0 : i32
    return %c0_i32, %c0_i32_0, %c0_i32_1 : i32, i32, i32
  }
  func.func @transform_4(%arg0: i32) -> (i32, i32) {
    %c0_i32 = arith.constant 0 : i32
    %c0_i32_0 = arith.constant 0 : i32
    %c0_i32_1 = arith.constant 0 : i32
    return %c0_i32, %c0_i32_0 : i32, i32
  }
  func.func @transform_5(%arg0: i32) -> (i32, i32, i32) {
    %c0_i32 = arith.constant 0 : i32
    %c0_i32_0 = arith.constant 0 : i32
    %c0_i32_1 = arith.constant 0 : i32
    %c0_i32_2 = arith.constant 0 : i32
    return %c0_i32, %c0_i32_0, %c0_i32_1 : i32, i32, i32
  }
  func.func @transform_6(%arg0: i32) -> (i32, i32) {
    %c0_i32 = arith.constant 0 : i32
    %c0_i32_0 = arith.constant 0 : i32
    %c0_i32_1 = arith.constant 0 : i32
    return %c0_i32, %c0_i32_0 : i32, i32
  }
  func.func @transform_7(%arg0: i32) -> (i32, i32) {
    %c0_i32 = arith.constant 0 : i32
    %c0_i32_0 = arith.constant 0 : i32
    %c0_i32_1 = arith.constant 0 : i32
    return %c0_i32, %c0_i32_0 : i32, i32
  }
  func.func @transform_8(%arg0: i32) -> (i32, i32) {
    %c0_i32 = arith.constant 0 : i32
    %c0_i32_0 = arith.constant 0 : i32
    %c0_i32_1 = arith.constant 0 : i32
    return %c0_i32, %c0_i32_0 : i32, i32
  }
  func.func @transform_9(%arg0: i32) -> (i32, i32, i32) {
    %c0_i32 = arith.constant 0 : i32
    %c0_i32_0 = arith.constant 0 : i32
    %c0_i32_1 = arith.constant 0 : i32
    return %arg0, %c0_i32, %c0_i32_0 : i32, i32, i32
  }
  func.func @transform_10(%arg0: i32) -> (i32, i32, i32) {
    %c0_i32 = arith.constant 0 : i32
    %c0_i32_0 = arith.constant 0 : i32
    %c0_i32_1 = arith.constant 0 : i32
    return %arg0, %c0_i32, %c0_i32_0 : i32, i32, i32
  }
}

</mosaic_0001>

<bundles_post_ra>
// kernel: tile.38
= control target key start
LH: loop header
LB: loop body
LE: loop exit
PB: predicated region body
PF: predicated region fallthrough
CT: control target
= control target key end

     0   :  { %s28_s0 = inlined_call_operand.vmem [shape: f32[8], index: 0, kind: input, shape index: {}]   ;;  %s29_s1 = inlined_call_operand.vmem [shape: f32[16,8], index: 1, kind: output, shape index: {}]  }
   0x1   :  { %v4_v0 = vld [vmem:[%s28_s0] ss:$0 sm:$0xff] }
   0x2   :  { %5 = vst [vmem:[%s29_s1] sm:$0xff] %v4_v0  ;;  %8 = vst [vmem:[%s29_s1 + $0x8] sm:$0xff] %v4_v0 }

// kernel: tile.39
= control target key start
LH: loop header
LB: loop body
LE: loop exit
PB: predicated region body
PF: predicated region fallthrough
CT: control target
= control target key end

     0   :  { %s131_s10 = smov 120   ;;  %s132_s11 = smov 104   ;;  %vm3_vm0 = vcmask 64512   ;;  %vm9_vm1 = vcmask 1048512   ;;  %vm15_vm2 = vcmask 982912   ;;  %vm21_vm3 = vcmask 917312   ;;  %s207_s0 = inlined_call_operand.vmem [shape: f32[16,8], index: 0, kind: input, shape index: {}]   ;;  %s208_s1 = inlined_call_operand.vmem [shape: f32[1,128], index: 1, kind: output, shape index: {}]  }
   0x1   :  { %v101_v0 = vld [vmem:[%s207_s0 + $0xf] sm:$0x1]   ;;  %v103_v1 = vld [vmem:[%s207_s0 + $0xd] sm:$0x1]   ;;  %v102_v2 = vld [vmem:[%s207_s0 + $0xe] sm:$0x1]  }
   0x2   :  { %7 = vrot.lane.b32.xlu0 %v101_v0, %s131_s10  ;;  %19 = vrot.lane.b32.xlu1 %v103_v1, %s132_s11  ;;  %v104_v3 = vld [vmem:[%s207_s0 + $0xc] sm:$0x1]   ;;  %s133_s16 = smov 112   ;;  %s134_s17 = smov 96   ;;  %v105_v4 = vld [vmem:[%s207_s0 + $0xb] sm:$0x1]  }
   0x3   :  { %v106_v5 = vld [vmem:[%s207_s0 + $0xa] sm:$0x1]   ;;  %v2_v6 = vld [vmem:[%s207_s0] sm:$0x1]   ;;  %s135_s24 = smov 88   ;;  %s136_s25 = smov 80  }
   0x4   :  { %4 = vst.msk [vmem:[#allocation0] sm:$0x1] %vm3_vm0, %v2_v6   ;;  %v107_v7 = vld [vmem:[%s207_s0 + $0x9] sm:$0x1]   ;;  %v108_v8 = vld [vmem:[%s207_s0 + $0x8] sm:$0x1]  }
   0x5   :  { %s137_s30 = smov 72   ;;  %s138_s2 = smov 64   ;;  %v109_v9 = vld [vmem:[%s207_s0 + $0x7] sm:$0x1]   ;;  %v110_v10 = vld [vmem:[%s207_s0 + $0x6] sm:$0x1]  }
   0x6   :  { %13 = vrot.lane.b32.xlu0 %v102_v2, %s133_s16  ;;  %25 = vrot.lane.b32.xlu1 %v104_v3, %s134_s17  ;;  %s139_s7 = smov 56   ;;  %s140_s8 = smov 48   ;;  %v111_v11 = vld [vmem:[%s207_s0 + $0x5] sm:$0x1]   ;;  %v112_v12 = vld [vmem:[%s207_s0 + $0x4] sm:$0x1]  }
   0x7   :  { %s141_s13 = smov 40   ;;  %s142_s14 = smov 32   ;;  %v113_v13 = vld [vmem:[%s207_s0 + $0x3] sm:$0x1]   ;;  %v114_v14 = vld [vmem:[%s207_s0 + $0x2] sm:$0x1]  }
   0x8   :  { %s143_s19 = smov 24   ;;  %s144_s20 = smov 16   ;;  %v115_v15 = vld [vmem:[%s207_s0 + $0x1] sm:$0x1]   ;;  %vm27_vm4 = vcmask 851712   ;;  %vm33_vm5 = vcmask 786112  }
   0x9   :  { %s145_s0 = smov 8   ;;  %vm39_vm6 = vcmask 720512   ;;  %vm45_vm7 = vcmask 654912   ;;  %vm51_vm8 = vcmask 589312   ;;  %vm57_vm9 = vcmask 523712  }
   0xa   :  { %31 = vrot.lane.b32.xlu0 %v105_v4, %s135_s24  ;;  %37 = vrot.lane.b32.xlu1 %v106_v5, %s136_s25  ;;  %vm63_vm10 = vcmask 458112   ;;  %vm69_vm11 = vcmask 392512   ;;  %vm75_vm12 = vcmask 326912   ;;  %vm81_vm13 = vcmask 261312  }
   0xb   :  { %vm87_vm14 = vcmask 195712   ;;  %vm93_vm15 = vcmask 130112  }
   0xe   :  { %43 = vrot.lane.b32.xlu0 %v107_v7, %s137_s30  ;;  %49 = vrot.lane.b32.xlu1 %v108_v8, %s138_s2 }
  0x12   :  { %55 = vrot.lane.b32.xlu0 %v109_v9, %s139_s7  ;;  %61 = vrot.lane.b32.xlu1 %v110_v10, %s140_s8 }
  0x16   :  { %67 = vrot.lane.b32.xlu0 %v111_v11, %s141_s13  ;;  %73 = vrot.lane.b32.xlu1 %v112_v12, %s142_s14 }
  0x1a   :  { %79 = vrot.lane.b32.xlu0 %v113_v13, %s143_s19  ;;  %85 = vrot.lane.b32.xlu1 %v114_v14, %s144_s20 }
  0x1e   :  { %91 = vrot.lane.b32.xlu0 %v115_v15, %s145_s0 }
  0x74   :  { %v8_v16 = vpop.permute.xlu0 %7   ;;  %v20_v17 = vpop.permute.xlu1 %19  }
  0x75   :  { %10 = vst.msk [vmem:[#allocation0] sm:$0x1] %vm9_vm1, %v8_v16  }
  0x78   :  { %v14_v18 = vpop.permute.xlu0 %13   ;;  %v26_v19 = vpop.permute.xlu1 %25  }
  0x79   :  { %16 = vst.msk [vmem:[#allocation0] sm:$0x1] %vm15_vm2, %v14_v18  }
  0x7a   :  { %22 = vst.msk [vmem:[#allocation0] sm:$0x1] %vm21_vm3, %v20_v17  }
  0x7b   :  { %28 = vst.msk [vmem:[#allocation0] sm:$0x1] %vm27_vm4, %v26_v19  }
  0x7c   :  { %v32_v20 = vpop.permute.xlu0 %31   ;;  %v38_v21 = vpop.permute.xlu1 %37  }
  0x7d   :  { %34 = vst.msk [vmem:[#allocation0] sm:$0x1] %vm33_vm5, %v32_v20  }
  0x7e   :  { %40 = vst.msk [vmem:[#allocation0] sm:$0x1] %vm39_vm6, %v38_v21  }
  0x80   :  { %v44_v22 = vpop.permute.xlu0 %43   ;;  %v50_v23 = vpop.permute.xlu1 %49  }
  0x81   :  { %46 = vst.msk [vmem:[#allocation0] sm:$0x1] %vm45_vm7, %v44_v22  }
  0x82   :  { %52 = vst.msk [vmem:[#allocation0] sm:$0x1] %vm51_vm8, %v50_v23  }
  0x84   :  { %v56_v24 = vpop.permute.xlu0 %55   ;;  %v62_v25 = vpop.permute.xlu1 %61  }
  0x85   :  { %58 = vst.msk [vmem:[#allocation0] sm:$0x1] %vm57_vm9, %v56_v24  }
  0x86   :  { %64 = vst.msk [vmem:[#allocation0] sm:$0x1] %vm63_vm10, %v62_v25  }
  0x88   :  { %v68_v26 = vpop.permute.xlu0 %67   ;;  %v74_v27 = vpop.permute.xlu1 %73  }
  0x89   :  { %70 = vst.msk [vmem:[#allocation0] sm:$0x1] %vm69_vm11, %v68_v26  }
  0x8a   :  { %76 = vst.msk [vmem:[#allocation0] sm:$0x1] %vm75_vm12, %v74_v27  }
  0x8c   :  { %v80_v28 = vpop.permute.xlu0 %79   ;;  %v86_v29 = vpop.permute.xlu1 %85  }
  0x8d   :  { %82 = vst.msk [vmem:[#allocation0] sm:$0x1] %vm81_vm13, %v80_v28  }
  0x8e   :  { %88 = vst.msk [vmem:[#allocation0] sm:$0x1] %vm87_vm14, %v86_v29  }
  0x90   :  { %v92_v30 = vpop.permute.xlu0 %91  }
  0x91   :  { %94 = vst.msk [vmem:[#allocation0] sm:$0x1] %vm93_vm15, %v92_v30  }
  0x98   :  { %v98_v31 = vld [vmem:[#allocation0] sm:$0x1] }
  0x99   :  { %100 = vst [vmem:[%s208_s1] sm:$0x1] %v98_v31 }

// kernel: tile.43
= control target key start
LH: loop header
LB: loop body
LE: loop exit
PB: predicated region body
PF: predicated region fallthrough
CT: control target
= control target key end

     0   :  { %s28_s0 = inlined_call_operand.vmem [shape: f32[4], index: 0, kind: input, shape index: {}]   ;;  %s29_s1 = inlined_call_operand.vmem [shape: f32[16,4], index: 1, kind: output, shape index: {}]  }
   0x1   :  { %v4_v0 = vld [vmem:[%s28_s0] ss:$0 sm:$0xff] }
   0x2   :  { %5 = vst [vmem:[%s29_s1] sm:$0xff] %v4_v0  ;;  %8 = vst [vmem:[%s29_s1 + $0x8] sm:$0xff] %v4_v0 }

// kernel: tile.44
= control target key start
LH: loop header
LB: loop body
LE: loop exit
PB: predicated region body
PF: predicated region fallthrough
CT: control target
= control target key end

     0   :  { %s131_s10 = smov 60   ;;  %s132_s11 = smov 52   ;;  %vm3_vm0 = vcmask 31744   ;;  %vm9_vm1 = vcmask 523744   ;;  %vm15_vm2 = vcmask 490944   ;;  %vm21_vm3 = vcmask 458144   ;;  %s207_s0 = inlined_call_operand.vmem [shape: f32[16,4], index: 0, kind: input, shape index: {}]   ;;  %s208_s1 = inlined_call_operand.vmem [shape: f32[1,64], index: 1, kind: output, shape index: {}]  }
   0x1   :  { %v101_v0 = vld [vmem:[%s207_s0 + $0xf] sm:$0x1]   ;;  %v103_v1 = vld [vmem:[%s207_s0 + $0xd] sm:$0x1]   ;;  %v102_v2 = vld [vmem:[%s207_s0 + $0xe] sm:$0x1]  }
   0x2   :  { %7 = vrot.lane.b32.xlu0 %v101_v0, %s131_s10  ;;  %19 = vrot.lane.b32.xlu1 %v103_v1, %s132_s11  ;;  %v104_v3 = vld [vmem:[%s207_s0 + $0xc] sm:$0x1]   ;;  %s133_s16 = smov 56   ;;  %s134_s17 = smov 48   ;;  %v105_v4 = vld [vmem:[%s207_s0 + $0xb] sm:$0x1]  }
   0x3   :  { %v106_v5 = vld [vmem:[%s207_s0 + $0xa] sm:$0x1]   ;;  %v2_v6 = vld [vmem:[%s207_s0] sm:$0x1]   ;;  %s135_s24 = smov 44   ;;  %s136_s25 = smov 40  }
   0x4   :  { %4 = vst.msk [vmem:[#allocation0] sm:$0x1] %vm3_vm0, %v2_v6   ;;  %v107_v7 = vld [vmem:[%s207_s0 + $0x9] sm:$0x1]   ;;  %v108_v8 = vld [vmem:[%s207_s0 + $0x8] sm:$0x1]  }
   0x5   :  { %s137_s30 = smov 36   ;;  %s138_s2 = smov 32   ;;  %v109_v9 = vld [vmem:[%s207_s0 + $0x7] sm:$0x1]   ;;  %v110_v10 = vld [vmem:[%s207_s0 + $0x6] sm:$0x1]  }
   0x6   :  { %13 = vrot.lane.b32.xlu0 %v102_v2, %s133_s16  ;;  %25 = vrot.lane.b32.xlu1 %v104_v3, %s134_s17  ;;  %s139_s7 = smov 28   ;;  %s140_s8 = smov 24   ;;  %v111_v11 = vld [vmem:[%s207_s0 + $0x5] sm:$0x1]   ;;  %v112_v12 = vld [vmem:[%s207_s0 + $0x4] sm:$0x1]  }
   0x7   :  { %s141_s13 = smov 20   ;;  %s142_s14 = smov 16   ;;  %v113_v13 = vld [vmem:[%s207_s0 + $0x3] sm:$0x1]   ;;  %v114_v14 = vld [vmem:[%s207_s0 + $0x2] sm:$0x1]  }
   0x8   :  { %s143_s19 = smov 12   ;;  %s144_s20 = smov 8   ;;  %v115_v15 = vld [vmem:[%s207_s0 + $0x1] sm:$0x1]   ;;  %vm27_vm4 = vcmask 425344   ;;  %vm33_vm5 = vcmask 392544  }
   0x9   :  { %s145_s0 = smov 4   ;;  %vm39_vm6 = vcmask 359744   ;;  %vm45_vm7 = vcmask 326944   ;;  %vm51_vm8 = vcmask 294144   ;;  %vm57_vm9 = vcmask 261344  }
   0xa   :  { %31 = vrot.lane.b32.xlu0 %v105_v4, %s135_s24  ;;  %37 = vrot.lane.b32.xlu1 %v106_v5, %s136_s25  ;;  %vm63_vm10 = vcmask 228544   ;;  %vm69_vm11 = vcmask 195744   ;;  %vm75_vm12 = vcmask 162944   ;;  %vm81_vm13 = vcmask 130144  }
   0xb   :  { %vm87_vm14 = vcmask 97344   ;;  %vm93_vm15 = vcmask 64544  }
   0xe   :  { %43 = vrot.lane.b32.xlu0 %v107_v7, %s137_s30  ;;  %49 = vrot.lane.b32.xlu1 %v108_v8, %s138_s2 }
  0x12   :  { %55 = vrot.lane.b32.xlu0 %v109_v9, %s139_s7  ;;  %61 = vrot.lane.b32.xlu1 %v110_v10, %s140_s8 }
  0x16   :  { %67 = vrot.lane.b32.xlu0 %v111_v11, %s141_s13  ;;  %73 = vrot.lane.b32.xlu1 %v112_v12, %s142_s14 }
  0x1a   :  { %79 = vrot.lane.b32.xlu0 %v113_v13, %s143_s19  ;;  %85 = vrot.lane.b32.xlu1 %v114_v14, %s144_s20 }
  0x1e   :  { %91 = vrot.lane.b32.xlu0 %v115_v15, %s145_s0 }
  0x74   :  { %v8_v16 = vpop.permute.xlu0 %7   ;;  %v20_v17 = vpop.permute.xlu1 %19  }
  0x75   :  { %10 = vst.msk [vmem:[#allocation0] sm:$0x1] %vm9_vm1, %v8_v16  }
  0x78   :  { %v14_v18 = vpop.permute.xlu0 %13   ;;  %v26_v19 = vpop.permute.xlu1 %25  }
  0x79   :  { %16 = vst.msk [vmem:[#allocation0] sm:$0x1] %vm15_vm2, %v14_v18  }
  0x7a   :  { %22 = vst.msk [vmem:[#allocation0] sm:$0x1] %vm21_vm3, %v20_v17  }
  0x7b   :  { %28 = vst.msk [vmem:[#allocation0] sm:$0x1] %vm27_vm4, %v26_v19  }
  0x7c   :  { %v32_v20 = vpop.permute.xlu0 %31   ;;  %v38_v21 = vpop.permute.xlu1 %37  }
  0x7d   :  { %34 = vst.msk [vmem:[#allocation0] sm:$0x1] %vm33_vm5, %v32_v20  }
  0x7e   :  { %40 = vst.msk [vmem:[#allocation0] sm:$0x1] %vm39_vm6, %v38_v21  }
  0x80   :  { %v44_v22 = vpop.permute.xlu0 %43   ;;  %v50_v23 = vpop.permute.xlu1 %49  }
  0x81   :  { %46 = vst.msk [vmem:[#allocation0] sm:$0x1] %vm45_vm7, %v44_v22  }
  0x82   :  { %52 = vst.msk [vmem:[#allocation0] sm:$0x1] %vm51_vm8, %v50_v23  }
  0x84   :  { %v56_v24 = vpop.permute.xlu0 %55   ;;  %v62_v25 = vpop.permute.xlu1 %61  }
  0x85   :  { %58 = vst.msk [vmem:[#allocation0] sm:$0x1] %vm57_vm9, %v56_v24  }
  0x86   :  { %64 = vst.msk [vmem:[#allocation0] sm:$0x1] %vm63_vm10, %v62_v25  }
  0x88   :  { %v68_v26 = vpop.permute.xlu0 %67   ;;  %v74_v27 = vpop.permute.xlu1 %73  }
  0x89   :  { %70 = vst.msk [vmem:[#allocation0] sm:$0x1] %vm69_vm11, %v68_v26  }
  0x8a   :  { %76 = vst.msk [vmem:[#allocation0] sm:$0x1] %vm75_vm12, %v74_v27  }
  0x8c   :  { %v80_v28 = vpop.permute.xlu0 %79   ;;  %v86_v29 = vpop.permute.xlu1 %85  }
  0x8d   :  { %82 = vst.msk [vmem:[#allocation0] sm:$0x1] %vm81_vm13, %v80_v28  }
  0x8e   :  { %88 = vst.msk [vmem:[#allocation0] sm:$0x1] %vm87_vm14, %v86_v29  }
  0x90   :  { %v92_v30 = vpop.permute.xlu0 %91  }
  0x91   :  { %94 = vst.msk [vmem:[#allocation0] sm:$0x1] %vm93_vm15, %v92_v30  }
  0x98   :  { %v98_v31 = vld [vmem:[#allocation0] sm:$0x1] }
  0x99   :  { %100 = vst [vmem:[%s208_s1] sm:$0x1] %v98_v31 }

// kernel: resblock_cat_forward.1
= control target key start
LH: loop header
LB: loop body
LE: loop exit
PB: predicated region body
PF: predicated region fallthrough
CT: control target
= control target key end

     0   :  { %s9150_s13 = smov 0   ;;  %s12626_s0 = inlined_call_operand.vmem [shape: f32[2,16,64], index: 0, kind: input, shape index: {}]   ;;  %s12627_s1 = inlined_call_operand.vmem [shape: f32[3,72,128], index: 1, kind: input, shape index: {}]   ;;  %s12628_s2 = inlined_call_operand.vmem [shape: f32[1,128], index: 2, kind: input, shape index: {}]   ;;  %s12629_s3 = inlined_call_operand.vmem [shape: f32[3,144,128], index: 3, kind: input, shape index: {}]   ;;  %s12630_s4 = inlined_call_operand.vmem [shape: f32[1,128], index: 4, kind: input, shape index: {}]   ;;  %s12631_s5 = inlined_call_operand.vmem [shape: f32[3,144,128], index: 5, kind: input, shape index: {}]   ;;  %s12632_s6 = inlined_call_operand.vmem [shape: f32[1,128], index: 6, kind: input, shape index: {}]   ;;  %s12633_s7 = inlined_call_operand.vmem [shape: f32[1,64], index: 7, kind: input, shape index: {}]   ;;  %s12634_s8 = inlined_call_operand.vmem [shape: f32[1,64], index: 8, kind: input, shape index: {}]   ;;  %s12635_s9 = inlined_call_operand.vmem [shape: f32[2,16,64], index: 9, kind: output, shape index: {0}]   ;;  %s12636_s10 = inlined_call_operand.vmem [shape: f32[2,16,128], index: 10, kind: output, shape index: {1}]  }
   0x1 LB: > { %s7088_s14 = sadd.s32 4294967295, %s9089_s13   ;;  %p7092_p0 = scmp.ge.s32.totalorder %s9089_s13, 1  ;;  %s9089_s13 = sphi %s9150_s13, %s21_s13  }
   0x2   : > { %p315_p1 = scmp.lt.s32.totalorder %s9089_s13, 3 }
   0x4   : > { %p316_p2 = pnand %p7092_p0, %p315_p1 }
   0x6   : > { %319 = sbr.rel (%p316_p2) target bundleno = 2124 (0x84c), region = 56 }
   0xd   : > { %p358_p3 = scmp.lt.s32.totalorder %s7088_s14, 1  ;;  %v7099_v0 = vld [vmem:[%s12627_s1 + $0x48] sm:$0xff]  ;;  %v7100_v1 = vld [vmem:[%s12627_s1 + $0x50] sm:$0xff]  ;;  %vm373_vm0 = vcmask 588800   ;;  %v9091_v4 = vmov 0.0   ;;  %v7101_v5 = vld [vmem:[%s12627_s1 + $0x58] sm:$0xff] }
   0xe   : > { %v421_v2 = vand.u32 4294901760, %v7099_v0  ;;  %v424_v3 = vand.u32 4294901760, %v7100_v1  ;;  %374 = vst.msk [vmem:[#allocation2] sm:$0xff] %vm373_vm0, %v9091_v4  ;;  %375 = vst.msk [vmem:[#allocation2 + $0x8] sm:$0xff] %vm373_vm0, %v9091_v4  ;;  %v7102_v6 = vld [vmem:[%s12627_s1 + $0x60] sm:$0xff]  ;;  %vm376_vm1 = vcmask 582656  }
   0xf   : > { %s13182_s14 = smov (!%p358_p3, %s7088_s14), 1  ;;  %2238 = vst [vmem:[#allocation3] sm:$0xff] %v9091_v4  ;;  %2241 = vst [vmem:[#allocation3 + $0x10] sm:$0xff] %v9091_v4  ;;  %v427_v7 = vand.u32 4294901760, %v7101_v5  ;;  %v430_v8 = vand.u32 4294901760, %v7102_v6  ;;  %v7103_v9 = vld [vmem:[%s12627_s1 + $0x68] sm:$0xff] }
  0x10   : > { %2243 = vst [vmem:[#allocation3 + $0x20] sm:$0x3] %v9091_v4  ;;  %377 = vst.msk [vmem:[#allocation2 + $0x10] sm:$0x3] %vm376_vm1, %v9091_v4  ;;  %v7104_v10 = vld [vmem:[%s12627_s1 + $0x70] sm:$0xff]  ;;  %v7105_v11 = vld [vmem:[%s12627_s1 + $0x78] sm:$0xff]  ;;  %v9192_v13 = vpack.c.bf16 %v424_v3, %v421_v2  ;;  %v9194_v14 = vsub.f32 %v7099_v0, %v421_v2  ;;  %v9196_v15 = vsub.f32 %v7100_v1, %v424_v3 }
  0x11   : > { %s9187_s29 = sshll.u32 %s13182_s14, 4  ;;  %v7192_v12 = vld [vmem:[%s12633_s7] ss:$0 sm:$0xff]  ;;  %vm6997_vm2 = vcmask 523264   ;;  %v433_v16 = vand.u32 4294901760, %v7103_v9  ;;  %v9205_v18 = vpack.c.bf16 %v430_v8, %v427_v7  ;;  %v9207_v19 = vsub.f32 %v7101_v5, %v427_v7  ;;  %s9092_s18 = smov 4  }
  0x12   : > { %s362_s16 = scalar_lea.vmem %s12626_s0, %s9187_s29  ;;  %v7193_v17 = vld [vmem:[%s12634_s8] ss:$0 sm:$0xff]  ;;  %v9209_v20 = vsub.f32 %v7102_v6, %v430_v8  ;;  %v436_v21 = vand.u32 4294901760, %v7104_v10  ;;  %v517_v24 = vand.u32 4294901760, %v9194_v14  ;;  %v524_v25 = vand.u32 4294901760, %v9196_v15  ;;  %7776 = vmatprep.subr.bf16.mxu1 %v9192_v13  ;;  %v7107_v45 = vld [vmem:[%s12627_s1 + $0x88] sm:$0xff]  ;;  %s367_s25 = scalar_lea.vmem %s12635_s9, %s9187_s29 }
  0x13   : > { %v378_v22 = vld [vmem:[%s362_s16] sm:$0xff]  ;;  %v6974_v23 = vld [vmem:[%s362_s16 + $0x8] sm:$0xff]  ;;  %v9213_v26 = vsub.f32 %v7103_v9, %v433_v16  ;;  %v439_v27 = vand.u32 4294901760, %v7105_v11  ;;  %v531_v30 = vand.u32 4294901760, %v9207_v19  ;;  %7778 = vmatpush3.bf16.msra.mxu1 %v9192_v13  ;;  %v9252_v61 = vand.u32 4294901760, %v7107_v45  ;;  %s9094_s20 = smov 8   ;;  %s372_s21 = scalar_lea.vmem %s12636_s10, %s9187_s29 }
  0x14   : > { %v6982_v28 = vmul.f32 %v7192_v12, %v378_v22  ;;  %v6983_v29 = vmul.f32 %v7192_v12, %v6974_v23  ;;  %382 = vrot.lane.b32.xlu0 %v378_v22, %s9092_s18  ;;  %v538_v31 = vand.u32 4294901760, %v9209_v20  ;;  %v518_v32 = vsub.f32 %v9194_v14, %v517_v24  ;;  %7780 = vmatprep.subr.bf16.mxu1 %v9205_v18  ;;  %v7106_v40 = vld [vmem:[%s12627_s1 + $0x80] sm:$0xff] }
  0x15   : > { %v525_v33 = vsub.f32 %v9196_v15, %v524_v25  ;;  %v9225_v34 = vpack.c.bf16 %v436_v21, %v433_v16  ;;  %v545_v35 = vand.u32 4294901760, %v9213_v26  ;;  %v532_v38 = vsub.f32 %v9207_v19, %v531_v30 }
  0x16   : > { %v6991_v36 = vadd.f32 %v7193_v17, %v6982_v28  ;;  %v6992_v37 = vadd.f32 %v7193_v17, %v6983_v29  ;;  %v539_v39 = vsub.f32 %v9209_v20, %v538_v31  ;;  %v519_v41 = vand.u32 4294901760, %v518_v32 }
  0x17   : > { %v526_v42 = vand.u32 4294901760, %v525_v33  ;;  %v546_v43 = vsub.f32 %v9213_v26, %v545_v35  ;;  %v551_v44 = vsub.f32 %v7104_v10, %v436_v21  ;;  %v533_v48 = vand.u32 4294901760, %v532_v38  ;;  %7782 = vmatpush3.bf16.msra.mxu1 %v9205_v18 }
  0x18   : > { %v6993_v46 = vmul.f32 0.01, %v6991_v36  ;;  %v6994_v47 = vmul.f32 0.01, %v6992_v37  ;;  %384 = vrot.lane.b32.xlu0 %v6974_v23, %s9092_s18  ;;  %v540_v49 = vand.u32 4294901760, %v539_v39  ;;  %v442_v53 = vand.u32 4294901760, %v7106_v40  ;;  %7784 = vmatprep.subr.bf16.mxu1 %v9225_v34 }
  0x19   : > { %v7791_v50 = vpack.c.bf16 %v526_v42, %v519_v41  ;;  %v547_v51 = vand.u32 4294901760, %v546_v43  ;;  %v552_v52 = vand.u32 4294901760, %v551_v44  ;;  %v558_v57 = vsub.f32 %v7105_v11, %v439_v27  ;;  %v393_v43 = vld [vmem:[%s12627_s1] sm:$0xff] }
  0x1a   : > { %v6995_v54 = vmax.f32 %v6991_v36, %v6993_v46  ;;  %v6996_v55 = vmax.f32 %v6992_v37, %v6994_v47  ;;  %v7795_v56 = vpack.c.bf16 %v540_v49, %v533_v48  ;;  %v9250_v59 = vpack.c.bf16 %v442_v53, %v439_v27 }
  0x1b   : > { %7792 = vmatprep.subr.bf16.mxu0 %v7791_v50  ;;  %v553_v58 = vsub.f32 %v551_v44, %v552_v52  ;;  %v565_v60 = vsub.f32 %v7106_v40, %v442_v53  ;;  %v559_v62 = vand.u32 4294901760, %v558_v57  ;;  %7786 = vmatpush3.bf16.msra.mxu1 %v9225_v34  ;;  %v7811_v63 = vpack.c.bf16 %v9209_v20, %v9207_v19 }
  0x1c   : > { %6998 = vst.msk [vmem:[%s367_s25] sm:$0xff] %vm6997_vm2, %v6995_v54  ;;  %6999 = vst.msk [vmem:[%s367_s25 + $0x8] sm:$0xff] %vm6997_vm2, %v6996_v55  ;;  %7794 = vmatpush3.bf16.msra.mxu0 %v7791_v50  ;;  %v7815_v0 = vpack.c.bf16 %v551_v44, %v9213_v26  ;;  %v572_v3 = vsub.f32 %v7107_v45, %v9252_v61  ;;  %7788 = vmatprep.subr.bf16.mxu1 %v9250_v59  ;;  %vm388_vm3 = vcmask 556064   ;;  %v396_v45 = vld [vmem:[%s12627_s1 + $0x18] sm:$0xff]  ;;  %v1020_v46 = vand.u32 4294901760, %v393_v43  ;;  %v398_v50 = vld [vmem:[%s12627_s1 + $0x28] sm:$0xff] }
  0x1d   : > { %7796 = vmatprep.subr.bf16.mxu0 %v7795_v56  ;;  %v554_v1 = vand.u32 4294901760, %v553_v58  ;;  %v566_v2 = vand.u32 4294901760, %v565_v60  ;;  %v560_v5 = vsub.f32 %v558_v57, %v559_v62  ;;  %v7819_v9 = vpack.c.bf16 %v565_v60, %v558_v57 }
  0x1e   : > { %v9262_v8 = vand.u32 4294901760, %v572_v3  ;;  %v7807_v21 = vpack.c.bf16 %v9196_v15, %v9194_v14  ;;  %v7839_v22 = vpack.c.bf16 %v524_v25, %v517_v24  ;;  %v7843_v23 = vpack.c.bf16 %v538_v31, %v531_v30 }
  0x1f   : > { %v7799_v6 = vpack.c.bf16 %v554_v1, %v547_v51  ;;  %v567_v7 = vsub.f32 %v565_v60, %v566_v2  ;;  %v561_v10 = vand.u32 4294901760, %v560_v5  ;;  %7790 = vmatpush3.bf16.msra.mxu1 %v9250_v59  ;;  %v7847_v27 = vpack.c.bf16 %v552_v52, %v545_v35 }
  0x20   : > { %7798 = vmatpush3.bf16.msra.mxu0 %v7795_v56  ;;  %v574_v12 = vsub.f32 %v572_v3, %v9262_v8  ;;  %7413 = vmatprep.subr.mxu1 %v9252_v61  ;;  %v7851_v28 = vpack.c.bf16 %v566_v2, %v559_v62  ;;  %v1029_v49 = vand.u32 4294901760, %v396_v45  ;;  %v1035_v55 = vand.u32 4294901760, %v398_v50  ;;  %v399_v62 = vld [vmem:[%s12627_s1 + $0x30] sm:$0xff] }
  0x21   : > { %7800 = vmatprep.subr.bf16.mxu0 %v7799_v6  ;;  %v568_v11 = vand.u32 4294901760, %v567_v7  ;;  %v9341_v58 = vsub.f32 %v393_v43, %v1020_v46  ;;  %vm2244_vm4 = vcmask 123904   ;;  %vm2239_vm5 = vcmask 130048  }
  0x22   : > { %v575_v17 = vand.u32 4294901760, %v574_v12  ;;  %v9354_v1 = vsub.f32 %v396_v45, %v1029_v49  ;;  %2245 = vst.msk [vmem:[#allocation3 + $0x28] sm:$0x3] %vm2244_vm4, %v9091_v4  ;;  %vm2248_vm6 = vcmask 1040384   ;;  %vm2269_vm7 = vcmask 1040448  }
  0x23   : > { %v7803_v16 = vpack.c.bf16 %v568_v11, %v561_v10  ;;  %7414 = vmatpush3.msra.mxu1 %v9252_v61  ;;  %v9370_v11 = vsub.f32 %v398_v50, %v1035_v55  ;;  %vm2271_vm8 = vcmask 57344   ;;  %vm2261_vm9 = vcmask 1047617  }
  0x24   : > { %7802 = vmatpush3.bf16.msra.mxu0 %v7799_v6  ;;  %v1116_v6 = vand.u32 4294901760, %v9341_v58  ;;  %vm2263_vm10 = vcmask 64513   ;;  %vm2265_vm11 = vcmask 1047616   ;;  %vm2267_vm12 = vcmask 64512  }
  0x25   : > { %7804 = vmatprep.subr.bf16.mxu0 %v7803_v16  ;;  %vm2324_vm13 = vcmask 1046528   ;;  %vm3845_vm14 = vcmask 1045504  }
  0x28   : > { %7806 = vmatpush3.bf16.msra.mxu0 %v7803_v16 }
  0x29   : > { %7434 = vmatprep.subr.mxu0 %v575_v17 }
  0x2c   : > { %7435 = vmatpush3.msra.mxu0 %v575_v17  ;;  %v1117_v17 = vsub.f32 %v9341_v58, %v1116_v6 }
  0x2d   : > { %7808 = vmatprep.subr.bf16.mxu0 %v7807_v21 }
  0x86   : > { %v383_v29 = vpop.permute.xlu0 %382 }
  0x87   : > { %389 = vst.msk [vmem:[#allocation2 + $0x1] sm:$0xff] %vm388_vm3, %v383_v29  ;;  %v1151_v29 = vand.u32 4294901760, %v9370_v11 }
  0x8a   : > { %v385_v32 = vpop.permute.xlu0 %384 }
  0x8b   : > { %390 = vst.msk [vmem:[#allocation2 + $0x9] sm:$0xff] %vm388_vm3, %v385_v32 }
  0x8e   : > { %v402_v33 = vld [vmem:[#allocation2 + $0x1] sm:$0xff] }
  0x8f   : > { %v415_v14 = vsel %vm373_vm0, %v402_v33, 0  ;;  %v391_v39 = vld [vmem:[#allocation2] sm:$0xff] }
  0x90   : > { %v494_v36 = vand.u32 4294901760, %v415_v14  ;;  %v1014_v40 = vsel %vm373_vm0, %v391_v39, 0 }
  0x91   : > { %v9302_v41 = vand.u32 4294901760, %v1014_v40 }
  0x92   : > { %7436 = vmatprep.mubr.f32.mxu0 %v494_v36  ;;  %v403_v15 = vld [vmem:[#allocation2 + $0x9] sm:$0xff]  ;;  %v495_v24 = vsub.f32 %v415_v14, %v494_v36 }
  0x93   : > { %v418_v19 = vsel %vm373_vm0, %v403_v15, 0  ;;  %v9307_v42 = vsub.f32 %v1014_v40, %v9302_v41  ;;  %v392_v51 = vld [vmem:[#allocation2 + $0x8] sm:$0xff]  ;;  %v1118_v15 = vand.u32 4294901760, %v1117_v17 }
  0x94   : > { %v9282_v20 = vand.u32 4294901760, %v418_v19  ;;  %v496_v25 = vand.u32 4294901760, %v495_v24  ;;  %v1017_v56 = vsel %vm373_vm0, %v392_v51, 0 }
  0x95   : > { %v1095_v44 = vand.u32 4294901760, %v9307_v42  ;;  %v9358_v2 = vand.u32 4294901760, %v1017_v56 }
  0x96   : > { %7437 = vmatmul.mubr.f32.vlgmr.msra.gmra.mrb[0].mxu0 %v9282_v20  ;;  %v497_v26 = vsub.f32 %v495_v24, %v496_v25  ;;  %v505_v30 = vsub.f32 %v418_v19, %v9282_v20 }
  0x97   : > { %7810 = vmatpush3.bf16.msra.mxu0 %v7807_v21  ;;  %7457 = vmatprep.mubr.f32.mxu0 %v495_v24  ;;  %v1096_v52 = vsub.f32 %v9307_v42, %v1095_v44  ;;  %v9373_v12 = vsub.f32 %v1017_v56, %v9358_v2 }
  0x98   : > { %7812 = vmatprep.subr.bf16.mxu0 %v7811_v63  ;;  %v498_v31 = vand.u32 4294901760, %v497_v26  ;;  %v506_v35 = vand.u32 4294901760, %v505_v30  ;;  %v1152_v26 = vsub.f32 %v9370_v11, %v1151_v29 }
  0x99   : > { %v1105_v32 = vand.u32 4294901760, %v9373_v12 }
  0x9a   : > { %7415 = vmatprep.mubr.f32.mxu1 %v498_v31  ;;  %v507_v37 = vsub.f32 %v505_v30, %v506_v35  ;;  %v1153_v40 = vand.u32 4294901760, %v1152_v26 }
  0x9b   : > { %7814 = vmatpush3.bf16.msra.mxu0 %v7811_v63  ;;  %v400_v63 = vld [vmem:[%s12627_s1 + $0x38] sm:$0xff] }
  0x9c   : > { %7816 = vmatprep.subr.bf16.mxu0 %v7815_v0  ;;  %v508_v38 = vand.u32 4294901760, %v507_v37  ;;  %v1041_v5 = vand.u32 4294901760, %v400_v63 }
  0x9e   : > { %7416 = vmatmul.mubr.f32.vlgmr.msra.gmra.mrb[0].mxu1 %v508_v38  ;;  %v9399_v14 = vsub.f32 %v400_v63, %v1041_v5 }
  0x9f   : > { %7818 = vmatpush3.bf16.msra.mxu0 %v7815_v0 }
  0xa0   : > { %7820 = vmatprep.subr.bf16.mxu0 %v7819_v9 }
  0xa3   : > { %7822 = vmatpush3.bf16.msra.mxu0 %v7819_v9  ;;  %v1137_v9 = vand.u32 4294901760, %v9354_v1 }
  0xa4   : > { %7455 = vmatprep.subr.mxu0 %v572_v3 }
  0xa7   : > { %7456 = vmatpush3.msra.mxu0 %v572_v3  ;;  %v1038_v3 = vand.u32 4294901760, %v399_v62 }
  0xa8   : > { %7458 = vmatmul.mubr.f32.vlgmr.msra.gmra.mrb[0].mxu0 %v505_v30  ;;  %7824 = vmatprep.subr.bf16.mxu0 %v9192_v13  ;;  %v1106_v30 = vsub.f32 %v9373_v12, %v1105_v32 }
  0xa9   : > { %7826 = vmatpush3.bf16.msra.mxu0 %v9192_v13  ;;  %7478 = vmatprep.mubr.f32.mxu0 %v496_v25  ;;  %v9377_v16 = vpack.c.bf16 %v1041_v5, %v1038_v3  ;;  %v9397_v33 = vsub.f32 %v399_v62, %v1038_v3  ;;  %v7111_v3 = vld [vmem:[%s12627_s1 + $0xa8] sm:$0xff] }
  0xaa   : > { %7828 = vmatprep.subr.bf16.mxu0 %v9205_v18  ;;  %v1107_v43 = vand.u32 4294901760, %v1106_v30 }
  0xab   : > { %v1158_v31 = vand.u32 4294901760, %v9397_v33  ;;  %v7915_v56 = vpack.c.bf16 %v9399_v14, %v9397_v33 }
  0xad   : > { %7830 = vmatpush3.bf16.msra.mxu0 %v9205_v18 }
  0xae   : > { %7832 = vmatprep.subr.bf16.mxu0 %v9225_v34 }
  0xb1   : > { %7834 = vmatpush3.bf16.msra.mxu0 %v9225_v34 }
  0xb2   : > { %7836 = vmatprep.subr.bf16.mxu0 %v9250_v59 }
  0xb5   : > { %7838 = vmatpush3.bf16.msra.mxu0 %v9250_v59 }
  0xb6   : > { %7476 = vmatprep.subr.mxu0 %v9252_v61 }
  0xb9   : > { %7477 = vmatpush3.msra.mxu0 %v9252_v61 }
  0xba   : > { %7479 = vmatmul.mubr.f32.vlgmr.msra.gmra.mrb[0].mxu0 %v506_v35  ;;  %7840 = vmatprep.subr.bf16.mxu0 %v7839_v22  ;;  %v1165_v35 = vand.u32 4294901760, %v9399_v14 }
  0xbb   : > { %7842 = vmatpush3.bf16.msra.mxu0 %v7839_v22  ;;  %7499 = vmatprep.mubr.f32.mxu0 %v494_v36  ;;  %v401_v22 = vld [vmem:[%s12627_s1 + $0x40] sm:$0xff] }
  0xbc   : > { %7844 = vmatprep.subr.bf16.mxu0 %v7843_v23 }
  0xbf   : > { %7846 = vmatpush3.bf16.msra.mxu0 %v7843_v23 }
  0xc0   : > { %7848 = vmatprep.subr.bf16.mxu0 %v7847_v27 }
  0xc3   : > { %7850 = vmatpush3.bf16.msra.mxu0 %v7847_v27  ;;  %v1138_v27 = vsub.f32 %v9354_v1, %v1137_v9 }
  0xc4   : > { %7852 = vmatprep.subr.bf16.mxu0 %v7851_v28 }
  0xc7   : > { %7854 = vmatpush3.bf16.msra.mxu0 %v7851_v28 }
  0xc8   : > { %7497 = vmatprep.subr.mxu0 %v9262_v8 }
  0xcb   : > { %7498 = vmatpush3.msra.mxu0 %v9262_v8 }
  0xcc   : > { %7500 = vmatmul.mubr.f32.vlgmr.msra.gmra.mrb[0].mxu0 %v9282_v20  ;;  %7856 = vmatprep.subr.bf16.mxu0 %v9192_v13 }
  0xcd   : > { %7858 = vmatpush3.bf16.msra.mxu0 %v9192_v13  ;;  %7520 = vmatprep.mubr.f32.mxu0 %v494_v36  ;;  %v394_v13 = vld [vmem:[%s12627_s1 + $0x8] sm:$0xff]  ;;  %v9403_v36 = vand.u32 4294901760, %v401_v22 }
  0xce   : > { %7860 = vmatprep.subr.bf16.mxu0 %v9205_v18  ;;  %v1023_v47 = vand.u32 4294901760, %v394_v13 }
  0xcf   : > { %v1171_v45 = vsub.f32 %v401_v22, %v9403_v36 }
  0xd0   : > { %v9336_v53 = vpack.c.bf16 %v1023_v47, %v1020_v46  ;;  %v9343_v60 = vsub.f32 %v394_v13, %v1023_v47  ;;  %v1159_v13 = vsub.f32 %v9397_v33, %v1158_v31 }
  0xd1   : > { %7862 = vmatpush3.bf16.msra.mxu0 %v9205_v18  ;;  %v395_v18 = vld [vmem:[%s12627_s1 + $0x10] sm:$0xff] }
  0xd2   : > { %7864 = vmatprep.subr.bf16.mxu0 %v9225_v34  ;;  %v1026_v48 = vand.u32 4294901760, %v395_v18  ;;  %v1123_v7 = vand.u32 4294901760, %v9343_v60  ;;  %v1160_v47 = vand.u32 4294901760, %v1159_v13 }
  0xd4   : > { %v9339_v57 = vpack.c.bf16 %v1029_v49, %v1026_v48  ;;  %v9352_v0 = vsub.f32 %v395_v18, %v1026_v48  ;;  %v1124_v21 = vsub.f32 %v9343_v60, %v1123_v7  ;;  %v1166_v18 = vsub.f32 %v9399_v14, %v1165_v35 }
  0xd5   : > { %7866 = vmatpush3.bf16.msra.mxu0 %v9225_v34  ;;  %v397_v34 = vld [vmem:[%s12627_s1 + $0x20] sm:$0xff]  ;;  %v1172_v49 = vand.u32 4294901760, %v1171_v45 }
  0xd6   : > { %7868 = vmatprep.subr.bf16.mxu0 %v9250_v59  ;;  %v1032_v54 = vand.u32 4294901760, %v397_v34  ;;  %v1130_v8 = vand.u32 4294901760, %v9352_v0  ;;  %v1125_v24 = vand.u32 4294901760, %v1124_v21  ;;  %v1167_v48 = vand.u32 4294901760, %v1166_v18 }
  0xd7   : > { %v1173_v50 = vsub.f32 %v1171_v45, %v1172_v49 }
  0xd8   : > { %v9368_v10 = vsub.f32 %v397_v34, %v1032_v54  ;;  %v1131_v23 = vsub.f32 %v9352_v0, %v1130_v8  ;;  %v7887_v37 = vpack.c.bf16 %v1125_v24, %v1118_v15  ;;  %v7899_v34 = vpack.c.bf16 %v1167_v48, %v1160_v47 }
  0xd9   : > { %7870 = vmatpush3.bf16.msra.mxu0 %v9250_v59  ;;  %v1097_v59 = vand.u32 4294901760, %v1096_v52  ;;  %v1174_v51 = vand.u32 4294901760, %v1173_v50  ;;  %v7903_v52 = vpack.c.bf16 %v9343_v60, %v9341_v58  ;;  %v7947_v60 = vpack.c.bf16 %v1165_v35, %v1158_v31 }
  0xda   : > { %7518 = vmatprep.subr.mxu0 %v9252_v61  ;;  %v1144_v28 = vand.u32 4294901760, %v9368_v10  ;;  %v1132_v19 = vand.u32 4294901760, %v1131_v23 }
  0xdc   : > { %v1145_v25 = vsub.f32 %v9368_v10, %v1144_v28  ;;  %v7943_v58 = vpack.c.bf16 %v1151_v29, %v1144_v28  ;;  %v7114_v29 = vld [vmem:[%s12627_s1 + $0xc0] sm:$0xff] }
  0xdd   : > { %7519 = vmatpush3.msra.mxu0 %v9252_v61  ;;  %v9361_v61 = vpack.c.bf16 %v1035_v55, %v1032_v54  ;;  %v7907_v54 = vpack.c.bf16 %v9354_v1, %v9352_v0  ;;  %v7911_v55 = vpack.c.bf16 %v9370_v11, %v9368_v10  ;;  %v7108_v1 = vld [vmem:[%s12627_s1 + $0x90] sm:$0xff]  ;;  %v7113_v10 = vld [vmem:[%s12627_s1 + $0xb8] sm:$0xff]  ;;  %v1649_v24 = vand.u32 4294901760, %v7114_v29 }
  0xde   : > { %7521 = vmatmul.mubr.f32.vlgmr.msra.gmra.mrb[0].mxu0 %v9282_v20  ;;  %7872 = vmatprep.subr.bf16.mxu0 %v9336_v53  ;;  %v1139_v20 = vand.u32 4294901760, %v1138_v27  ;;  %v1146_v39 = vand.u32 4294901760, %v1145_v25  ;;  %v1631_v5 = vand.u32 4294901760, %v7108_v1  ;;  %v1646_v22 = vand.u32 4294901760, %v7113_v10 }
  0xdf   : > { %7874 = vmatpush3.bf16.msra.mxu0 %v9336_v53  ;;  %7541 = vmatprep.mubr.f32.mxu0 %v1097_v59  ;;  %v1612_v59 = vld [vmem:[#allocation2 + $0x2] sm:$0xff]  ;;  %v9569_v47 = vsub.f32 %v7114_v29, %v1649_v24 }
  0xe0   : > { %7876 = vmatprep.subr.bf16.mxu0 %v9339_v57  ;;  %v7891_v38 = vpack.c.bf16 %v1139_v20, %v1132_v19  ;;  %v7895_v46 = vpack.c.bf16 %v1153_v40, %v1146_v39  ;;  %v1625_v62 = vsel %vm373_vm0, %v1612_v59, 0  ;;  %v9513_v27 = vsub.f32 %v7108_v1, %v1631_v5  ;;  %v7116_v40 = vld [vmem:[%s12627_s1 + $0xd0] sm:$0xff] }
  0xe1   : > { %v9474_v63 = vand.u32 4294901760, %v1625_v62  ;;  %v9545_v35 = vsub.f32 %v7113_v10, %v1646_v22 }
  0xe2   : > { %v1727_v20 = vand.u32 4294901760, %v9513_v27 }
  0xe3   : > { %7878 = vmatpush3.bf16.msra.mxu0 %v9339_v57  ;;  %v9479_v0 = vsub.f32 %v1625_v62, %v9474_v63 }
  0xe4   : > { %7880 = vmatprep.subr.bf16.mxu0 %v9361_v61 }
  0xe7   : > { %7882 = vmatpush3.bf16.msra.mxu0 %v9361_v61 }
  0xe8   : > { %7884 = vmatprep.subr.bf16.mxu0 %v9377_v16 }
  0xeb   : > { %7886 = vmatpush3.bf16.msra.mxu0 %v9377_v16 }
  0xec   : > { %7539 = vmatprep.subr.mxu0 %v9403_v36 }
  0xef   : > { %7540 = vmatpush3.msra.mxu0 %v9403_v36 }
  0xf0   : > { %7542 = vmatmul.mubr.f32.vlgmr.msra.gmra.mrb[0].mxu0 %v1107_v43  ;;  %7888 = vmatprep.subr.bf16.mxu0 %v7887_v37 }
  0xf1   : > { %7890 = vmatpush3.bf16.msra.mxu0 %v7887_v37  ;;  %7562 = vmatprep.mubr.f32.mxu0 %v9302_v41 }
  0xf2   : > { %7892 = vmatprep.subr.bf16.mxu0 %v7891_v38 }
  0xf5   : > { %7894 = vmatpush3.bf16.msra.mxu0 %v7891_v38  ;;  %v1728_v38 = vsub.f32 %v9513_v27, %v1727_v20 }
  0xf6   : > { %7896 = vmatprep.subr.bf16.mxu0 %v7895_v46 }
  0xf9   : > { %7898 = vmatpush3.bf16.msra.mxu0 %v7895_v46  ;;  %v1762_v46 = vand.u32 4294901760, %v9545_v35 }
  0xfa   : > { %7900 = vmatprep.subr.bf16.mxu0 %v7899_v34 }
  0xfd   : > { %7902 = vmatpush3.bf16.msra.mxu0 %v7899_v34  ;;  %v1729_v34 = vand.u32 4294901760, %v1728_v38 }
  0xfe   : > { %7560 = vmatprep.subr.mxu0 %v1174_v51 }
 0x101   : > { %7561 = vmatpush3.msra.mxu0 %v1174_v51 }
 0x102   : > { %7563 = vmatmul.mubr.f32.vlgmr.msra.gmra.mrb[0].mxu0 %v9358_v2  ;;  %7904 = vmatprep.subr.bf16.mxu0 %v7903_v52 }
 0x103   : > { %7906 = vmatpush3.bf16.msra.mxu0 %v7903_v52  ;;  %7583 = vmatprep.mubr.f32.mxu0 %v9307_v42  ;;  %v7935_v42 = vpack.c.bf16 %v1123_v7, %v1116_v6  ;;  %v1613_v7 = vld [vmem:[#allocation2 + $0xa] sm:$0xff] }
 0x104   : > { %7908 = vmatprep.subr.bf16.mxu0 %v7907_v54  ;;  %v1628_v17 = vsel %vm373_vm0, %v1613_v7, 0 }
 0x105   : > { %v9524_v33 = vand.u32 4294901760, %v1628_v17 }
 0x107   : > { %7910 = vmatpush3.bf16.msra.mxu0 %v7907_v54  ;;  %v9539_v26 = vsub.f32 %v1628_v17, %v9524_v33 }
 0x108   : > { %7912 = vmatprep.subr.bf16.mxu0 %v7911_v55 }
 0x109   : > { %v1716_v43 = vand.u32 4294901760, %v9539_v26 }
 0x10b   : > { %7914 = vmatpush3.bf16.msra.mxu0 %v7911_v55  ;;  %v1717_v51 = vsub.f32 %v9539_v26, %v1716_v43 }
 0x10c   : > { %7916 = vmatprep.subr.bf16.mxu0 %v7915_v56 }
 0x10f   : > { %7918 = vmatpush3.bf16.msra.mxu0 %v7915_v56  ;;  %v1763_v56 = vsub.f32 %v9545_v35, %v1762_v46 }
 0x110   : > { %7581 = vmatprep.subr.mxu0 %v1171_v45 }
 0x111   : > { %v1764_v1 = vand.u32 4294901760, %v1763_v56 }
 0x113   : > { %7582 = vmatpush3.msra.mxu0 %v1171_v45 }
 0x114   : > { %7584 = vmatmul.mubr.f32.vlgmr.msra.gmra.mrb[0].mxu0 %v9373_v12  ;;  %7920 = vmatprep.subr.bf16.mxu0 %v9336_v53 }
 0x115   : > { %7922 = vmatpush3.bf16.msra.mxu0 %v9336_v53  ;;  %7604 = vmatprep.mubr.f32.mxu0 %v1095_v44  ;;  %v7939_v44 = vpack.c.bf16 %v1137_v9, %v1130_v8  ;;  %v1640_v9 = vand.u32 4294901760, %v7111_v3 }
 0x116   : > { %7924 = vmatprep.subr.bf16.mxu0 %v9339_v57 }
 0x117   : > { %v9528_v15 = vsub.f32 %v7111_v3, %v1640_v9 }
 0x119   : > { %7926 = vmatpush3.bf16.msra.mxu0 %v9339_v57  ;;  %v1748_v30 = vand.u32 4294901760, %v9528_v15 }
 0x11a   : > { %7928 = vmatprep.subr.bf16.mxu0 %v9361_v61 }
 0x11b   : > { %v1749_v18 = vsub.f32 %v9528_v15, %v1748_v30 }
 0x11d   : > { %7930 = vmatpush3.bf16.msra.mxu0 %v9361_v61  ;;  %v1750_v54 = vand.u32 4294901760, %v1749_v18 }
 0x11e   : > { %7932 = vmatprep.subr.bf16.mxu0 %v9377_v16 }
 0x121   : > { %7934 = vmatpush3.bf16.msra.mxu0 %v9377_v16 }
 0x122   : > { %7602 = vmatprep.subr.mxu0 %v9403_v36 }
 0x125   : > { %7603 = vmatpush3.msra.mxu0 %v9403_v36 }
 0x126   : > { %7605 = vmatmul.mubr.f32.vlgmr.msra.gmra.mrb[0].mxu0 %v1105_v32  ;;  %7936 = vmatprep.subr.bf16.mxu0 %v7935_v42  ;;  %v7115_v32 = vld [vmem:[%s12627_s1 + $0xc8] sm:$0xff] }
 0x127   : > { %7938 = vmatpush3.bf16.msra.mxu0 %v7935_v42  ;;  %7625 = vmatprep.mubr.f32.mxu0 %v9302_v41  ;;  %v1652_v19 = vand.u32 4294901760, %v7115_v32  ;;  %v1769_v42 = vand.u32 4294901760, %v9569_v47 }
 0x128   : > { %7940 = vmatprep.subr.bf16.mxu0 %v7939_v44 }
 0x129   : > { %v9549_v37 = vpack.c.bf16 %v1652_v19, %v1649_v24  ;;  %v9571_v48 = vsub.f32 %v7115_v32, %v1652_v19  ;;  %v12641_v32 = vmov 0.0|0.0   ;;  %v2281_v24 = vld [vmem:[%s12629_s3 + $0x20] sm:$0xff]  ;;  %v2282_v19 = vld [vmem:[%s12629_s3 + $0x28] sm:$0xff] }
 0x12a   : > { %8063 = vmatprep.subr.bf16.mxu1 %v12641_v32 }
 0x12b   : > { %7942 = vmatpush3.bf16.msra.mxu0 %v7939_v44  ;;  %v1776_v44 = vand.u32 4294901760, %v9571_v48  ;;  %v8011_v29 = vpack.c.bf16 %v9571_v48, %v9569_v47 }
 0x12c   : > { %7944 = vmatprep.subr.bf16.mxu0 %v7943_v58 }
 0x12f   : > { %7946 = vmatpush3.bf16.msra.mxu0 %v7943_v58 }
 0x130   : > { %7948 = vmatprep.subr.bf16.mxu0 %v7947_v60 }
 0x133   : > { %7950 = vmatpush3.bf16.msra.mxu0 %v7947_v60  ;;  %v1718_v60 = vand.u32 4294901760, %v1717_v51 }
 0x134   : > { %7623 = vmatprep.subr.mxu0 %v1172_v49 }
 0x137   : > { %7624 = vmatpush3.msra.mxu0 %v1172_v49  ;;  %v9575_v49 = vand.u32 4294901760, %v7116_v40 }
 0x138   : > { %7626 = vmatmul.mubr.f32.vlgmr.msra.gmra.mrb[0].mxu0 %v9358_v2  ;;  %7952 = vmatprep.subr.bf16.mxu0 %v9336_v53 }
 0x139   : > { %7954 = vmatpush3.bf16.msra.mxu0 %v9336_v53  ;;  %7646 = vmatprep.mubr.f32.mxu0 %v9302_v41  ;;  %v7109_v53 = vld [vmem:[%s12627_s1 + $0x98] sm:$0xff]  ;;  %v1706_v41 = vand.u32 4294901760, %v9479_v0  ;;  %v1782_v3 = vsub.f32 %v7116_v40, %v9575_v49  ;;  %v7120_v40 = vld [vmem:[%s12629_s3 + $0xa0] sm:$0xff] }
 0x13a   : > { %7956 = vmatprep.subr.bf16.mxu0 %v9339_v57  ;;  %v1634_v6 = vand.u32 4294901760, %v7109_v53  ;;  %v2348_v51 = vand.u32 4294901760, %v7120_v40 }
 0x13b   : > { %v1707_v11 = vsub.f32 %v9479_v0, %v1706_v41 }
 0x13c   : > { %v9508_v12 = vpack.c.bf16 %v1634_v6, %v1631_v5  ;;  %v9515_v28 = vsub.f32 %v7109_v53, %v1634_v6  ;;  %v1770_v53 = vsub.f32 %v9569_v47, %v1769_v42 }
 0x13d   : > { %7958 = vmatpush3.bf16.msra.mxu0 %v9339_v57  ;;  %v7110_v57 = vld [vmem:[%s12627_s1 + $0xa0] sm:$0xff] }
 0x13e   : > { %7960 = vmatprep.subr.bf16.mxu0 %v9361_v61  ;;  %v1637_v8 = vand.u32 4294901760, %v7110_v57  ;;  %v1734_v25 = vand.u32 4294901760, %v9515_v28  ;;  %v1771_v6 = vand.u32 4294901760, %v1770_v53 }
 0x140   : > { %v9511_v23 = vpack.c.bf16 %v1640_v9, %v1637_v8  ;;  %v9526_v14 = vsub.f32 %v7110_v57, %v1637_v8  ;;  %v1735_v39 = vsub.f32 %v9515_v28, %v1734_v25  ;;  %v1777_v57 = vsub.f32 %v9571_v48, %v1776_v44 }
 0x141   : > { %7962 = vmatpush3.bf16.msra.mxu0 %v9361_v61  ;;  %v7112_v61 = vld [vmem:[%s12627_s1 + $0xb0] sm:$0xff]  ;;  %v1783_v8 = vand.u32 4294901760, %v1782_v3 }
 0x142   : > { %7964 = vmatprep.subr.bf16.mxu0 %v9377_v16  ;;  %v1643_v21 = vand.u32 4294901760, %v7112_v61  ;;  %v1736_v50 = vand.u32 4294901760, %v1735_v39  ;;  %v1778_v7 = vand.u32 4294901760, %v1777_v57  ;;  %v8003_v17 = vpack.c.bf16 %v9528_v15, %v9526_v14  ;;  %v2284_v39 = vld [vmem:[%s12629_s3 + $0x38] sm:$0xff] }
 0x144   : > { %v9543_v31 = vsub.f32 %v7112_v61, %v1643_v21  ;;  %v7983_v58 = vpack.c.bf16 %v1736_v50, %v1729_v34  ;;  %v7995_v9 = vpack.c.bf16 %v1778_v7, %v1771_v6  ;;  %v1784_v61 = vsub.f32 %v1782_v3, %v1783_v8 }
 0x145   : > { %7966 = vmatpush3.bf16.msra.mxu0 %v9377_v16  ;;  %v1708_v16 = vand.u32 4294901760, %v1707_v11  ;;  %v7999_v11 = vpack.c.bf16 %v9515_v28, %v9513_v27  ;;  %v8043_v28 = vpack.c.bf16 %v1776_v44, %v1769_v42  ;;  %v3104_v50 = vand.u32 4294901760, %v2284_v39 }
 0x146   : > { %7644 = vmatprep.subr.mxu0 %v9403_v36  ;;  %v1755_v45 = vand.u32 4294901760, %v9543_v31  ;;  %v1785_v10 = vand.u32 4294901760, %v1784_v61 }
 0x148   : > { %v1756_v55 = vsub.f32 %v9543_v31, %v1755_v45  ;;  %v8039_v27 = vpack.c.bf16 %v1762_v46, %v1755_v45  ;;  %v2285_v46 = vld [vmem:[%s12629_s3 + $0x40] sm:$0xff] }
 0x149   : > { %7645 = vmatpush3.msra.mxu0 %v9403_v36  ;;  %v9533_v36 = vpack.c.bf16 %v1646_v22, %v1643_v21  ;;  %v8007_v21 = vpack.c.bf16 %v9545_v35, %v9543_v31  ;;  %v2283_v31 = vld [vmem:[%s12629_s3 + $0x30] sm:$0xff] }
 0x14a   : > { %7647 = vmatmul.mubr.f32.vlgmr.msra.gmra.mrb[0].mxu0 %v9358_v2  ;;  %7968 = vmatprep.subr.bf16.mxu0 %v9508_v12  ;;  %v1741_v2 = vand.u32 4294901760, %v9526_v14  ;;  %v1757_v62 = vand.u32 4294901760, %v1756_v55  ;;  %v3101_v34 = vand.u32 4294901760, %v2283_v31  ;;  %v3107_v55 = vand.u32 4294901760, %v2285_v46 }
 0x14b   : > { %7970 = vmatpush3.bf16.msra.mxu0 %v9508_v12  ;;  %7667 = vmatprep.mubr.f32.mxu0 %v1708_v16 }
 0x14c   : > { %7972 = vmatprep.subr.bf16.mxu0 %v9511_v23  ;;  %v1742_v13 = vsub.f32 %v9526_v14, %v1741_v2  ;;  %v7991_v5 = vpack.c.bf16 %v1764_v1, %v1757_v62  ;;  %v9733_v62 = vsub.f32 %v7120_v40, %v2348_v51  ;;  %v9748_v6 = vpack.c.bf16 %v3104_v50, %v3101_v34 }
 0x14e   : > { %v1743_v52 = vand.u32 4294901760, %v1742_v13  ;;  %12866 = vst [vmem:[#allocation19_spill] sm:$0xff] %v9748_v6 }
 0x14f   : > { %7974 = vmatpush3.bf16.msra.mxu0 %v9511_v23 }
 0x150   : > { %7976 = vmatprep.subr.bf16.mxu0 %v9533_v36  ;;  %v7987_v59 = vpack.c.bf16 %v1750_v54, %v1743_v52  ;;  %v2286_v54 = vld [vmem:[%s12629_s3 + $0x48] sm:$0xff] }
 0x151   : > { %v3110_v57 = vand.u32 4294901760, %v2286_v54 }
 0x153   : > { %7978 = vmatpush3.bf16.msra.mxu0 %v9533_v36  ;;  %v9754_v7 = vpack.c.bf16 %v3110_v57, %v3107_v55 }
 0x154   : > { %7980 = vmatprep.subr.bf16.mxu0 %v9549_v37 }
 0x155   : > { %12867 = vst [vmem:[#allocation20_spill] sm:$0xff] %v9754_v7 }
 0x157   : > { %7982 = vmatpush3.bf16.msra.mxu0 %v9549_v37 }
 0x158   : > { %7665 = vmatprep.subr.mxu0 %v9575_v49 }
 0x15b   : > { %7666 = vmatpush3.msra.mxu0 %v9575_v49 }
 0x15c   : > { %7668 = vmatmul.mubr.f32.vlgmr.msra.gmra.mrb[0].mxu0 %v1718_v60  ;;  %7984 = vmatprep.subr.bf16.mxu0 %v7983_v58 }
 0x15d   : > { %7986 = vmatpush3.bf16.msra.mxu0 %v7983_v58  ;;  %7688 = vmatprep.mubr.f32.mxu0 %v9474_v63  ;;  %v9727_v58 = vsub.f32 %v2283_v31, %v3101_v34 }
 0x15e   : > { %7988 = vmatprep.subr.bf16.mxu0 %v7987_v59 }
 0x15f   : > { %12860 = vst [vmem:[#allocation13_spill] sm:$0xff] %v9727_v58 }
 0x161   : > { %7990 = vmatpush3.bf16.msra.mxu0 %v7987_v59  ;;  %v9731_v59 = vsub.f32 %v2284_v39, %v3104_v50  ;;  %v7126_v50 = vld [vmem:[%s12629_s3 + $0xd0] sm:$0xff] }
 0x162   : > { %7992 = vmatprep.subr.bf16.mxu0 %v7991_v5 }
 0x163   : > { %12862 = vst [vmem:[#allocation15_spill] sm:$0xff] %v9731_v59 }
 0x165   : > { %7994 = vmatpush3.bf16.msra.mxu0 %v7991_v5  ;;  %v9745_v5 = vsub.f32 %v2286_v54, %v3110_v57  ;;  %v2366_v54 = vand.u32 4294901760, %v7126_v50  ;;  %v2292_v57 = vld [vmem:[%s12629_s3 + $0x78] sm:$0xff] }
 0x166   : > { %7996 = vmatprep.subr.bf16.mxu0 %v7995_v9 }
 0x167   : > { %12865 = vst [vmem:[#allocation18_spill] sm:$0xff] %v9745_v5 }
 0x169   : > { %7998 = vmatpush3.bf16.msra.mxu0 %v7995_v9  ;;  %v7123_v9 = vld [vmem:[%s12629_s3 + $0xb8] sm:$0xff] }
 0x16a   : > { %7686 = vmatprep.subr.mxu0 %v1785_v10 }
 0x16d   : > { %7687 = vmatpush3.msra.mxu0 %v1785_v10  ;;  %v2357_v10 = vand.u32 4294901760, %v7123_v9 }
 0x16e   : > { %7689 = vmatmul.mubr.f32.vlgmr.msra.gmra.mrb[0].mxu0 %v9524_v33  ;;  %8000 = vmatprep.subr.bf16.mxu0 %v7999_v11 }
 0x16f   : > { %8002 = vmatpush3.bf16.msra.mxu0 %v7999_v11  ;;  %7709 = vmatprep.mubr.f32.mxu0 %v9479_v0  ;;  %v8031_v0 = vpack.c.bf16 %v1734_v25, %v1727_v20  ;;  %v3095_v25 = vand.u32 4294901760, %v2281_v24  ;;  %v2287_v11 = vld [vmem:[%s12629_s3 + $0x50] sm:$0xff] }
 0x170   : > { %8004 = vmatprep.subr.bf16.mxu0 %v8003_v17 }
 0x171   : > { %v9607_v22 = vpop.f32.mrb[0].mxu1  ;;  %v9709_v45 = vsub.f32 %v2281_v24, %v3095_v25 }
 0x172   : > { %v9609_v16 = vpop.f32.mrb[1].mxu1 }
 0x173   : > { %8006 = vmatpush3.bf16.msra.mxu0 %v8003_v17  ;;  %12857 = vst [vmem:[#allocation10_spill] sm:$0xff] %v9709_v45  ;;  %v2288_v17 = vld [vmem:[%s12629_s3 + $0x58] sm:$0xff] }
 0x174   : > { %8008 = vmatprep.subr.bf16.mxu0 %v8007_v21 }
 0x177   : > { %8010 = vmatpush3.bf16.msra.mxu0 %v8007_v21  ;;  %v3113_v21 = vand.u32 4294901760, %v2287_v11 }
 0x178   : > { %8012 = vmatprep.subr.bf16.mxu0 %v8011_v29 }
 0x17b   : > { %8014 = vmatpush3.bf16.msra.mxu0 %v8011_v29  ;;  %v3116_v29 = vand.u32 4294901760, %v2288_v17 }
 0x17c   : > { %7707 = vmatprep.subr.mxu0 %v1782_v3 }
 0x17f   : > { %7708 = vmatpush3.msra.mxu0 %v1782_v3  ;;  %v9741_v3 = vsub.f32 %v2285_v46, %v3107_v55 }
 0x180   : > { %7710 = vmatmul.mubr.f32.vlgmr.msra.gmra.mrb[0].mxu0 %v9539_v26  ;;  %8016 = vmatprep.subr.bf16.mxu0 %v9508_v12  ;;  %v3098_v26 = vand.u32 4294901760, %v2282_v19 }
 0x181   : > { %8018 = vmatpush3.bf16.msra.mxu0 %v9508_v12  ;;  %7730 = vmatprep.mubr.f32.mxu0 %v1706_v41  ;;  %v8035_v41 = vpack.c.bf16 %v1748_v30, %v1741_v2  ;;  %v7118_v2 = vld [vmem:[%s12629_s3 + $0x90] sm:$0xff]  ;;  %v7119_v30 = vld [vmem:[%s12629_s3 + $0x98] sm:$0xff]  ;;  %12864 = vst [vmem:[#allocation17_spill] sm:$0xff] %v9741_v3 }
 0x182   : > { %8020 = vmatprep.subr.bf16.mxu0 %v9511_v23  ;;  %v9715_v47 = vsub.f32 %v2282_v19, %v3098_v26  ;;  %v2342_v48 = vand.u32 4294901760, %v7118_v2  ;;  %v9729_v60 = vpack.c.bf16 %v3098_v26, %v3095_v25  ;;  %v2290_v25 = vld [vmem:[%s12629_s3 + $0x68] sm:$0xff] }
 0x183   : > { %v3122_v31 = vand.u32 4294901760, %v2290_v25 }
 0x184   : > { %12858 = vst [vmem:[#allocation11_spill] sm:$0xff] %v9715_v47  ;;  %v9723_v42 = vsub.f32 %v7118_v2, %v2342_v48  ;;  %12861 = vst [vmem:[#allocation14_spill] sm:$0xff] %v9729_v60 }
 0x185   : > { %8022 = vmatpush3.bf16.msra.mxu0 %v9511_v23  ;;  %v9816_v34 = vsub.f32 %v2290_v25, %v3122_v31 }
 0x186   : > { %8024 = vmatprep.subr.bf16.mxu0 %v9533_v36 }
 0x187   : > { %12875 = vst [vmem:[#allocation28_spill] sm:$0xff] %v9816_v34 }
 0x189   : > { %8026 = vmatpush3.bf16.msra.mxu0 %v9533_v36 }
 0x18a   : > { %8028 = vmatprep.subr.bf16.mxu0 %v9549_v37 }
 0x18d   : > { %8030 = vmatpush3.bf16.msra.mxu0 %v9549_v37 }
 0x18e   : > { %7728 = vmatprep.subr.mxu0 %v9575_v49 }
 0x191   : > { %7729 = vmatpush3.msra.mxu0 %v9575_v49 }
 0x192   : > { %7731 = vmatmul.mubr.f32.vlgmr.msra.gmra.mrb[0].mxu0 %v1716_v43  ;;  %8032 = vmatprep.subr.bf16.mxu0 %v8031_v0  ;;  %v7121_v43 = vld [vmem:[%s12629_s3 + $0xa8] sm:$0xff] }
 0x193   : > { %8034 = vmatpush3.bf16.msra.mxu0 %v8031_v0  ;;  %7751 = vmatprep.mubr.f32.mxu0 %v9474_v63  ;;  %v2351_v52 = vand.u32 4294901760, %v7121_v43 }
 0x194   : > { %8036 = vmatprep.subr.bf16.mxu0 %v8035_v41 }
 0x195   : > { %v9737_v1 = vpack.c.bf16 %v2351_v52, %v2348_v51  ;;  %v9739_v53 = vsub.f32 %v7121_v43, %v2351_v52  ;;  %v2291_v51 = vld [vmem:[%s12629_s3 + $0x70] sm:$0xff] }
 0x197   : > { %8038 = vmatpush3.bf16.msra.mxu0 %v8035_v41  ;;  %12863 = vst [vmem:[#allocation16_spill] sm:$0xff] %v9737_v1 }
 0x198   : > { %8040 = vmatprep.subr.bf16.mxu0 %v8039_v27 }
 0x19b   : > { %8042 = vmatpush3.bf16.msra.mxu0 %v8039_v27  ;;  %v9775_v27 = vsub.f32 %v7123_v9, %v2357_v10  ;;  %v7128_v9 = vld [vmem:[%s12629_s3 + $0xe0] sm:$0xff] }
 0x19c   : > { %8044 = vmatprep.subr.bf16.mxu0 %v8043_v28 }
 0x19f   : > { %8046 = vmatpush3.bf16.msra.mxu0 %v8043_v28  ;;  %v7117_v28 = vld [vmem:[%s12628_s2] ss:$0 sm:$0xff] }
 0x1a0   : > { %7749 = vmatprep.subr.mxu0 %v1783_v8 }
 0x1a3   : > { %7750 = vmatpush3.msra.mxu0 %v1783_v8  ;;  %v7122_v8 = vld [vmem:[%s12629_s3 + $0xb0] sm:$0xff] }
 0x1a4   : > { %7752 = vmatmul.mubr.f32.vlgmr.msra.gmra.mrb[0].mxu0 %v9524_v33  ;;  %8048 = vmatprep.subr.bf16.mxu0 %v9508_v12  ;;  %v2354_v61 = vand.u32 4294901760, %v7122_v8 }
 0x1a5   : > { %8050 = vmatpush3.bf16.msra.mxu0 %v9508_v12  ;;  %7772 = vmatprep.mubr.f32.mxu0 %v9474_v63  ;;  %v2277_v63 = vld [vmem:[%s12629_s3] sm:$0xff]  ;;  %v2278_v12 = vld [vmem:[%s12629_s3 + $0x8] sm:$0xff] }
 0x1a6   : > { %8052 = vmatprep.subr.bf16.mxu0 %v9511_v23  ;;  %v3083_v14 = vand.u32 4294901760, %v2277_v63  ;;  %v3086_v15 = vand.u32 4294901760, %v2278_v12  ;;  %v9771_v0 = vpack.c.bf16 %v2357_v10, %v2354_v61  ;;  %v9773_v41 = vsub.f32 %v7122_v8, %v2354_v61  ;;  %v7129_v61 = vld [vmem:[%s12629_s3 + $0xe8] sm:$0xff] }
 0x1a7   : > { %v3125_v8 = vand.u32 4294901760, %v2291_v51 }
 0x1a8   : > { %v9688_v35 = vpack.c.bf16 %v3086_v15, %v3083_v14  ;;  %v9692_v4 = vsub.f32 %v2278_v12, %v3086_v15  ;;  %12868 = vst [vmem:[#allocation21_spill] sm:$0xff] %v9771_v0  ;;  %v9782_v12 = vpack.c.bf16 %v3116_v29, %v3113_v21  ;;  %v7125_v15 = vld [vmem:[%s12629_s3 + $0xc8] sm:$0xff] }
 0x1a9   : > { %8054 = vmatpush3.bf16.msra.mxu0 %v9511_v23  ;;  %v2279_v23 = vld [vmem:[%s12629_s3 + $0x10] sm:$0xff]  ;;  %v2363_v19 = vand.u32 4294901760, %v7125_v15  ;;  %v9857_v25 = vsub.f32 %v2291_v51, %v3125_v8 }
 0x1aa   : > { %8056 = vmatprep.subr.bf16.mxu0 %v9533_v36  ;;  %12851 = vst [vmem:[#allocation4_spill] sm:$0xff] %v9688_v35  ;;  %12853 = vst [vmem:[#allocation6_spill] sm:$0xff] %v9692_v4 }
 0x1ab   : > { %12869 = vst [vmem:[#allocation22_spill] sm:$0xff] %v9782_v12  ;;  %v9809_v46 = vsub.f32 %v7125_v15, %v2363_v19  ;;  %v2293_v15 = vld [vmem:[%s12629_s3 + $0x80] sm:$0xff]  ;;  %12878 = vst [vmem:[#allocation31_spill] sm:$0xff] %v9857_v25 }
 0x1ad   : > { %8058 = vmatpush3.bf16.msra.mxu0 %v9533_v36  ;;  %v3089_v36 = vand.u32 4294901760, %v2279_v23 }
 0x1ae   : > { %8060 = vmatprep.subr.bf16.mxu0 %v9549_v37 }
 0x1af   : > { %v9694_v38 = vsub.f32 %v2279_v23, %v3089_v36  ;;  %v9784_v23 = vsub.f32 %v2287_v11, %v3113_v21  ;;  %v3128_v11 = vand.u32 4294901760, %v2292_v57  ;;  %v2375_v21 = vand.u32 4294901760, %v7129_v61 }
 0x1b1   : > { %8062 = vmatpush3.bf16.msra.mxu0 %v9549_v37  ;;  %v9690_v37 = vsub.f32 %v2277_v63, %v3083_v14  ;;  %12854 = vst [vmem:[#allocation7_spill] sm:$0xff] %v9694_v38  ;;  %v9081_v63 = vld [vmem:[#allocation3] sm:$0xff]  ;;  %12870 = vst [vmem:[#allocation23_spill] sm:$0xff] %v9784_v23  ;;  %v7124_v14 = vld [vmem:[%s12629_s3 + $0xc0] sm:$0xff] }
 0x1b2   : > { %7770 = vmatprep.subr.mxu0 %v9575_v49  ;;  %2240 = vst.msk [vmem:[#allocation3 + $0x8] sm:$0xff] %vm2239_vm5, %v9081_v63  ;;  %2242 = vst.msk [vmem:[#allocation3 + $0x18] sm:$0xff] %vm2239_vm5, %v9081_v63  ;;  %v2360_v24 = vand.u32 4294901760, %v7124_v14  ;;  %v9841_v63 = vsub.f32 %v7126_v50, %v2366_v54  ;;  %v9869_v50 = vsub.f32 %v7129_v61, %v2375_v21 }
 0x1b3   : > { %12852 = vst [vmem:[#allocation5_spill] sm:$0xff] %v9690_v37 }
 0x1b4   : > { %v9805_v40 = vpack.c.bf16 %v2363_v19, %v2360_v24  ;;  %v9807_v43 = vsub.f32 %v7124_v14, %v2360_v24  ;;  %v7130_v24 = vld [vmem:[%s12629_s3 + $0xf0] sm:$0xff] }
 0x1b5   : > { %7771 = vmatpush3.msra.mxu0 %v9575_v49  ;;  %v2345_v49 = vand.u32 4294901760, %v7119_v30 }
 0x1b6   : > { %7773 = vmatmul.mubr.f32.vlgmr.msra.gmra.mrb[0].mxu0 %v9524_v33  ;;  %8306 = vmatprep.subr.bf16.mxu0 %v12641_v32  ;;  %v2280_v33 = vld [vmem:[%s12629_s3 + $0x18] sm:$0xff]  ;;  %12872 = vst [vmem:[#allocation25_spill] sm:$0xff] %v9805_v40 }
 0x1b7   : > { %v3092_v20 = vand.u32 4294901760, %v2280_v33  ;;  %8308 = vmatpush1.bf16.msra.mxu0 %v9688_v35  ;;  %v9721_v56 = vpack.c.bf16 %v2345_v49, %v2342_v48  ;;  %v9725_v44 = vsub.f32 %v7119_v30, %v2345_v49 }
 0x1b8   : > { %8309 = vmatprep.subr.bf16.mxu0 %v12641_v32 }
 0x1b9   : > { %v9705_v13 = vpack.c.bf16 %v3092_v20, %v3089_v36  ;;  %v9707_v18 = vsub.f32 %v2280_v33, %v3092_v20  ;;  %12859 = vst [vmem:[#allocation12_spill] sm:$0xff] %v9721_v56  ;;  %8065 = vmatpush1.bf16.msra.mxu1 %v9721_v56  ;;  %v9793_v36 = vsub.f32 %v2288_v17, %v3116_v29  ;;  %v2289_v20 = vld [vmem:[%s12629_s3 + $0x60] sm:$0xff]  ;;  %v2372_v17 = vand.u32 4294901760, %v7128_v9 }
 0x1ba   : > { %8066 = vmatprep.subr.bf16.mxu1 %v12641_v32  ;;  %v3119_v30 = vand.u32 4294901760, %v2289_v20 }
 0x1bb   : > { %12855 = vst [vmem:[#allocation8_spill] sm:$0xff] %v9705_v13  ;;  %12856 = vst [vmem:[#allocation9_spill] sm:$0xff] %v9707_v18  ;;  %8311 = vmatpush1.bf16.msra.mxu0 %v9705_v13 }
 0x1bc   : > { %8312 = vmatprep.subr.bf16.mxu0 %v12641_v32  ;;  %12871 = vst [vmem:[#allocation24_spill] sm:$0xff] %v9793_v36  ;;  %v9814_v49 = vsub.f32 %v2289_v20, %v3119_v30  ;;  %v9855_v20 = vpack.c.bf16 %v3128_v11, %v3125_v8 }
 0x1bd   : > { %8068 = vmatpush1.bf16.msra.mxu1 %v9737_v1 }
 0x1be   : > { %8069 = vmatprep.subr.bf16.mxu1 %v12641_v32  ;;  %12874 = vst [vmem:[#allocation27_spill] sm:$0xff] %v9814_v49  ;;  %12877 = vst [vmem:[#allocation30_spill] sm:$0xff] %v9855_v20 }
 0x1bf   : > { %8314 = vmatpush1.bf16.msra.mxu0 %v9729_v60 }
 0x1c0   : > { %8315 = vmatprep.subr.bf16.mxu0 %v12641_v32 }
 0x1c1   : > { %8071 = vmatpush1.bf16.msra.mxu1 %v9771_v0 }
 0x1c2   : > { %8072 = vmatprep.subr.bf16.mxu1 %v12641_v32 }
 0x1c3   : > { %8317 = vmatpush1.bf16.msra.mxu0 %v9748_v6 }
 0x1c4   : > { %8318 = vmatprep.subr.bf16.mxu0 %v12641_v32 }
 0x1c5   : > { %8074 = vmatpush1.bf16.msra.mxu1 %v9805_v40 }
 0x1c6   : > { %8075 = vmatprep.subr.bf16.mxu1 %v12641_v32 }
 0x1c7   : > { %8320 = vmatpush1.bf16.msra.mxu0 %v9754_v7 }
 0x1c8   : > { %8321 = vmatprep.subr.bf16.mxu0 %v12641_v32 }
 0x1cb   : > { %8323 = vmatpush1.bf16.msra.mxu0 %v9782_v12 }
 0x1cc   : > { %8324 = vmatprep.subr.bf16.mxu0 %v12641_v32 }
 0x289   : > { %v7774_v33 = vpop.f32.mrb[0].mxu0 }
 0x28a   : > { %v9035_v26 = vadd.f32 %v7774_v33, %v9607_v22  ;;  %v2213_v2 = vpop.f32.mrb[1].mxu0  ;;  %v9812_v22 = vpack.c.bf16 %v3122_v31, %v3119_v30  ;;  %v2294_v33 = vld [vmem:[%s12629_s3 + $0x88] sm:$0xff]  ;;  %v9865_v31 = vpack.c.bf16 %v2375_v21, %v2372_v17  ;;  %v7132_v21 = vld [vmem:[%s12629_s3 + $0x100] sm:$0xff] }
 0x28b   : > { %v9036_v39 = vadd.f32 %v2213_v2, %v9609_v16  ;;  %v7127_v16 = vld [vmem:[%s12629_s3 + $0xd8] sm:$0xff]  ;;  %v3134_v51 = vand.u32 4294901760, %v2294_v33 }
 0x28c   : > { %v2233_v48 = vadd.f32 %v9035_v26, %v7117_v28  ;;  %12873 = vst [vmem:[#allocation26_spill] sm:$0xff] %v9812_v22  ;;  %v2369_v55 = vand.u32 4294901760, %v7127_v16  ;;  %8326 = vmatpush1.bf16.msra.mxu0 %v9812_v22  ;;  %v9859_v26 = vsub.f32 %v2292_v57, %v3128_v11  ;;  %v7131_v2 = vld [vmem:[%s12629_s3 + $0xf8] sm:$0xff]  ;;  %12880 = vst [vmem:[#allocation33_spill] sm:$0xff] %v9865_v31 }
 0x28d   : > { %v2232_v52 = vadd.f32 %v9036_v39, %v7117_v28  ;;  %8327 = vmatprep.subr.bf16.mxu0 %v12641_v32  ;;  %v9867_v39 = vsub.f32 %v7128_v9, %v2372_v17  ;;  %v9879_v9 = vsub.f32 %v2294_v33, %v3134_v51 }
 0x28e   : > { %v2235_v10 = vmul.f32 0.01, %v2233_v48  ;;  %v9839_v28 = vpack.c.bf16 %v2369_v55, %v2366_v54  ;;  %v9843_v14 = vsub.f32 %v7127_v16, %v2369_v55  ;;  %12879 = vst [vmem:[#allocation32_spill] sm:$0xff] %v9859_v26  ;;  %v3131_v16 = vand.u32 4294901760, %v2293_v15 }
 0x28f   : > { %v2234_v29 = vmul.f32 0.01, %v2232_v52  ;;  %v2378_v54 = vand.u32 4294901760, %v7130_v24  ;;  %12883 = vst [vmem:[#allocation36_spill] sm:$0xff] %v9879_v9 }
 0x290   : > { %12876 = vst [vmem:[#allocation29_spill] sm:$0xff] %v9839_v28  ;;  %v2237_v19 = vmax.f32 %v2233_v48, %v2235_v10  ;;  %8077 = vmatpush1.bf16.msra.mxu1 %v9839_v28  ;;  %8329 = vmatpush1.bf16.msra.mxu0 %v9855_v20  ;;  %v9875_v57 = vpack.c.bf16 %v3134_v51, %v3131_v16 }
 0x291   : > { %v2236_v30 = vmax.f32 %v2232_v52, %v2234_v29  ;;  %8078 = vmatprep.subr.bf16.mxu1 %v12641_v32  ;;  %8330 = vmatprep.subr.bf16.mxu0 %v12641_v32  ;;  %v2381_v52 = vand.u32 4294901760, %v7131_v2  ;;  %v9877_v8 = vsub.f32 %v2293_v15, %v3131_v16  ;;  %v9881_v61 = vsub.f32 %v7130_v24, %v2378_v54  ;;  %v7133_v29 = vld [vmem:[%s12629_s3 + $0x108] sm:$0xff] }
 0x292   : > { %v2250_v48 = vrot.slane %v2237_v19, 7  ;;  %12881 = vst [vmem:[#allocation34_spill] sm:$0xff] %v9875_v57  ;;  %v2384_v15 = vand.u32 4294901760, %v7132_v21  ;;  %v2387_v33 = vand.u32 4294901760, %v7133_v29 }
 0x293   : > { %v2249_v55 = vrot.slane %v2236_v30, 7  ;;  %12882 = vst [vmem:[#allocation35_spill] sm:$0xff] %v9877_v8  ;;  %v9886_v11 = vpack.c.bf16 %v2381_v52, %v2378_v54  ;;  %v9888_v17 = vsub.f32 %v7131_v2, %v2381_v52  ;;  %v7134_v30 = vld [vmem:[%s12629_s3 + $0x110] sm:$0xff]  ;;  %v12640_v54 = vand.u32 4294901760, %v9723_v42 }
 0x294   : > { %2256 = vrot.lane.b32.xlu0 %v2250_v48, %s9094_s20  ;;  %8080 = vmatpush1.bf16.msra.mxu1 %v9865_v31  ;;  %v9902_v24 = vpack.c.bf16 %v2387_v33, %v2384_v15  ;;  %v9904_v19 = vsub.f32 %v7132_v21, %v2384_v15  ;;  %v9906_v2 = vsub.f32 %v7133_v29, %v2387_v33  ;;  %v2390_v16 = vand.u32 4294901760, %v7134_v30 }
 0x295   : > { %2252 = vrot.lane.b32.xlu1 %v2249_v55, %s9094_s20  ;;  %v2251_v10 = vsel %vm2248_vm6, %v2249_v55, %v2250_v48  ;;  %12884 = vst [vmem:[#allocation37_spill] sm:$0xff] %v9886_v11  ;;  %8332 = vmatpush1.bf16.msra.mxu0 %v9875_v57  ;;  %v7135_v48 = vld [vmem:[%s12629_s3 + $0x118] sm:$0xff]  ;;  %v12639_v55 = vand.u32 4294901760, %v9725_v44  ;;  %v2458_v29 = vsub.f32 %v9723_v42, %v12640_v54  ;;  %v12643_v8 = vand.u32 4294901760, %v9733_v62 }
 0x296   : > { %8081 = vmatprep.subr.bf16.mxu1 %v12641_v32  ;;  %8360 = vmatprep.subr.bf16.mxu0 %v12641_v32  ;;  %12885 = vst [vmem:[#allocation38_spill] sm:$0xff] %v9902_v24  ;;  %v2393_v51 = vand.u32 4294901760, %v7135_v48 }
 0x297   : > { %v2465_v15 = vsub.f32 %v9725_v44, %v12639_v55  ;;  %v2459_v33 = vand.u32 4294901760, %v2458_v29  ;;  %v12646_v29 = vand.u32 4294901760, %v9773_v41 }
 0x298   : > { %8083 = vmatpush1.bf16.msra.mxu1 %v9886_v11  ;;  %v9918_v52 = vpack.c.bf16 %v2393_v51, %v2390_v16  ;;  %v9922_v21 = vsub.f32 %v7135_v48, %v2393_v51 }
 0x299   : > { %2254 = vrot.lane.b32.xlu1 %v2251_v10, %s9094_s20  ;;  %8084 = vmatprep.subr.bf16.mxu1 %v12641_v32  ;;  %v9920_v10 = vsub.f32 %v7134_v30, %v2390_v16  ;;  %v2466_v9 = vand.u32 4294901760, %v2465_v15  ;;  %v12645_v30 = vand.u32 4294901760, %v9739_v53  ;;  %v2472_v16 = vsub.f32 %v9733_v62, %v12643_v8 }
 0x29a   : > { %12886 = vst [vmem:[#allocation39_spill] sm:$0xff] %v9918_v52  ;;  %v12648_v15 = vand.u32 4294901760, %v9775_v27 }
 0x29b   : > { %v9934_v48 = vpack.c.bf16 %v2466_v9, %v2459_v33  ;;  %v2479_v51 = vsub.f32 %v9739_v53, %v12645_v30  ;;  %v2473_v55 = vand.u32 4294901760, %v2472_v16  ;;  %v2486_v9 = vsub.f32 %v9773_v41, %v12646_v29 }
 0x29c   : > { %8086 = vmatpush1.bf16.msra.mxu1 %v9902_v24  ;;  %v2493_v33 = vsub.f32 %v9775_v27, %v12648_v15  ;;  %v12649_v30 = vand.u32 4294901760, %v9807_v43  ;;  %v12651_v16 = vand.u32 4294901760, %v9809_v46  ;;  %v12652_v15 = vand.u32 4294901760, %v9841_v63 }
 0x29d   : > { %8087 = vmatprep.subr.bf16.mxu1 %v12641_v32  ;;  %v2480_v54 = vand.u32 4294901760, %v2479_v51  ;;  %v2487_v8 = vand.u32 4294901760, %v2486_v9  ;;  %v12654_v9 = vand.u32 4294901760, %v9843_v14 }
 0x29e   : > { %v2494_v26 = vand.u32 4294901760, %v2493_v33 }
 0x2a0   : > { %8089 = vmatpush1.bf16.msra.mxu1 %v9918_v52  ;;  %v9954_v51 = vpack.c.bf16 %v2494_v26, %v2487_v8  ;;  %v2514_v26 = vsub.f32 %v9841_v63, %v12652_v15  ;;  %v2521_v8 = vsub.f32 %v9843_v14, %v12654_v9  ;;  %v12658_v9 = vand.u32 4294901760, %v9881_v61 }
 0x2a1   : > { %8090 = vmatprep.subr.bf16.mxu1 %v12641_v32  ;;  %v9944_v32 = vpack.c.bf16 %v2480_v54, %v2473_v55  ;;  %v2500_v54 = vsub.f32 %v9807_v43, %v12649_v30  ;;  %v2507_v55 = vsub.f32 %v9809_v46, %v12651_v16  ;;  %v12655_v16 = vand.u32 4294901760, %v9867_v39 }
 0x2a2   : > { %v2515_v30 = vand.u32 4294901760, %v2514_v26  ;;  %v2522_v34 = vand.u32 4294901760, %v2521_v8  ;;  %v12660_v26 = vand.u32 4294901760, %v9888_v17 }
 0x2a3   : > { %v2501_v29 = vand.u32 4294901760, %v2500_v54  ;;  %v2508_v25 = vand.u32 4294901760, %v2507_v55  ;;  %v12657_v54 = vand.u32 4294901760, %v9869_v50 }
 0x2a4   : > { %v9974_v55 = vpack.c.bf16 %v2522_v34, %v2515_v30  ;;  %v2542_v34 = vsub.f32 %v9881_v61, %v12658_v9  ;;  %v2549_v30 = vsub.f32 %v9888_v17, %v12660_v26  ;;  %v12665_v26 = vand.u32 4294901760, %v9920_v10 }
 0x2a5   : > { %v9964_v33 = vpack.c.bf16 %v2508_v25, %v2501_v29  ;;  %v2528_v25 = vsub.f32 %v9867_v39, %v12655_v16  ;;  %v2535_v29 = vsub.f32 %v9869_v50, %v12657_v54  ;;  %v12661_v54 = vand.u32 4294901760, %v9904_v19 }
 0x2a6   : > { %v2543_v16 = vand.u32 4294901760, %v2542_v34  ;;  %v2550_v36 = vand.u32 4294901760, %v2549_v30  ;;  %v12666_v34 = vand.u32 4294901760, %v9922_v21 }
 0x2a7   : > { %v2529_v15 = vand.u32 4294901760, %v2528_v25  ;;  %v2536_v49 = vand.u32 4294901760, %v2535_v29  ;;  %v12667_v25 = vand.u32 4294901760, %v9906_v2 }
 0x2a8   : > { %v9994_v29 = vpack.c.bf16 %v2550_v36, %v2543_v16  ;;  %v2570_v36 = vsub.f32 %v9920_v10, %v12665_v26  ;;  %v2577_v16 = vsub.f32 %v9922_v21, %v12666_v34 }
 0x2a9   : > { %v9984_v8 = vpack.c.bf16 %v2536_v49, %v2529_v15  ;;  %v2556_v49 = vsub.f32 %v9904_v19, %v12661_v54  ;;  %v2563_v15 = vsub.f32 %v9906_v2, %v12667_v25 }
 0x2aa   : > { %v2571_v54 = vand.u32 4294901760, %v2570_v36  ;;  %v2578_v52 = vand.u32 4294901760, %v2577_v16 }
 0x2ab   : > { %v2557_v9 = vand.u32 4294901760, %v2556_v49  ;;  %v2564_v23 = vand.u32 4294901760, %v2563_v15 }
 0x2ac   : > { %v10012_v5 = vpack.c.bf16 %v2578_v52, %v2571_v54 }
 0x2ad   : > { %v10004_v30 = vpack.c.bf16 %v2564_v23, %v2557_v9 }
 0x306   : > { %v2257_v34 = vpop.permute.xlu0 %2256 }
 0x307   : > { %2270 = vst.msk [vmem:[#allocation3 + $0x20] sm:$0x1] %vm2269_vm7, %v2257_v34  ;;  %v2253_v25 = vpop.permute.xlu1 %2252 }
 0x308   : > { %2272 = vst.msk [vmem:[#allocation3 + $0x28] sm:$0x1] %vm2271_vm8, %v2257_v34 }
 0x309   : > { %2262 = vst.msk [vmem:[#allocation3] sm:$0xfe] %vm2261_vm9, %v2253_v25 }
 0x30a   : > { %2264 = vst.msk [vmem:[#allocation3 + $0x8] sm:$0xfe] %vm2263_vm10, %v2253_v25 }
 0x30b   : > { %v2255_v54 = vpop.permute.xlu1 %2254 }
 0x30c   : > { %2266 = vst.msk [vmem:[#allocation3 + $0x10] sm:$0xff] %vm2265_vm11, %v2255_v54 }
 0x30d   : > { %2268 = vst.msk [vmem:[#allocation3 + $0x18] sm:$0xff] %vm2267_vm12, %v2255_v54 }
 0x30e   : > { %v2297_v34 = vld [vmem:[#allocation3 + $0x20] sm:$0x1] }
 0x30f   : > { %v2298_v9 = vld [vmem:[#allocation3 + $0x28] sm:$0x1]  ;;  %v2331_v59 = vrot.slane %v2297_v34, 1 }
 0x310   : > { %v2273_v52 = vld [vmem:[#allocation3] sm:$0xff] }
 0x311   : > { %v2274_v16 = vld [vmem:[#allocation3 + $0x8] sm:$0xff]  ;;  %v10039_v26 = vand.u32 4294901760, %v2273_v52  ;;  %v2295_v49 = vld [vmem:[#allocation3] sm:$0xfe] }
 0x312   : > { %v3078_v36 = vsel %vm2239_vm5, %v2274_v16, 0  ;;  %v2296_v15 = vld [vmem:[#allocation3 + $0x8] sm:$0xfe]  ;;  %v2333_v16 = vrot.slane %v2298_v9, 1  ;;  %v2325_v31 = vrot.slane %v2295_v49, 1 }
 0x313   : > { %12887 = vst [vmem:[#allocation40_spill] sm:$0xff] %v10039_v26  ;;  %v10041_v23 = vand.u32 4294901760, %v3078_v36  ;;  %v10044_v25 = vsub.f32 %v2273_v52, %v10039_v26  ;;  %v10051_v54 = vld [vmem:[#allocation3 + $0x10] sm:$0xff]  ;;  %v2328_v47 = vrot.slane %v2296_v15, 1  ;;  %v3819_v56 = vld [vmem:[#allocation3 + $0x8] sm:$0xfc] }
 0x314   : > { %v10049_v24 = vld [vmem:[#allocation3 + $0x18] sm:$0xff]  ;;  %v10056_v11 = vand.u32 4294901760, %v10051_v54  ;;  %v2326_v18 = vrot.slane %v10051_v54, 1 }
 0x315   : > { %12888 = vst [vmem:[#allocation41_spill] sm:$0xff] %v10041_v23  ;;  %12889 = vst [vmem:[#allocation42_spill] sm:$0xff] %v10044_v25  ;;  %v10047_v3 = vsub.f32 %v3078_v36, %v10041_v23  ;;  %v3080_v58 = vsel %vm2239_vm5, %v10049_v24, 0  ;;  %v2329_v52 = vrot.slane %v10049_v24, 1  ;;  %v12895_v28 = vand.u32 4294901760, %v10044_v25 }
 0x316   : > { %12891 = vst [vmem:[#allocation44_spill] sm:$0xff] %v10056_v11  ;;  %v10060_v36 = vand.u32 4294901760, %v3080_v58  ;;  %v10066_v9 = vsub.f32 %v10051_v54, %v10056_v11  ;;  %v2327_v37 = vsel %vm2324_vm13, %v2325_v31, %v2326_v18 }
 0x317   : > { %12890 = vst [vmem:[#allocation43_spill] sm:$0xff] %v10047_v3  ;;  %v12687_v45 = vand.u32 4294901760, %v10047_v3  ;;  %v2330_v34 = vsel %vm2324_vm13, %v2328_v47, %v2329_v52  ;;  %v2334_v4 = vsel %vm2324_vm13, %v2329_v52, %v2333_v16  ;;  %v10082_v47 = vand.u32 4294901760, %v2327_v37 }
 0x318   : > { %12892 = vst [vmem:[#allocation45_spill] sm:$0xff] %v10060_v36  ;;  %12893 = vst [vmem:[#allocation46_spill] sm:$0xff] %v10066_v9  ;;  %v10073_v15 = vsub.f32 %v3080_v58, %v10060_v36  ;;  %v2337_v49 = vsel %vm2239_vm5, %v2330_v34, 0  ;;  %v2339_v38 = vsel %vm2239_vm5, %v2334_v4, 0  ;;  %v2332_v58 = vsel %vm2324_vm13, %v2326_v18, %v2331_v59 }
 0x319   : > { %3568 = vmatprep.mubr.f32.mxu0 %v12687_v45  ;;  %v10080_v40 = vand.u32 4294901760, %v2337_v49  ;;  %v10086_v52 = vand.u32 4294901760, %v2339_v38  ;;  %v12897_v34 = vmov 0.0|0.0   ;;  %v12690_v31 = vand.u32 4294901760, %v10066_v9 }
 0x31a   : > { %12894 = vst [vmem:[#allocation47_spill] sm:$0xff] %v10073_v15  ;;  %3572 = vmatmul.mubr.f32.vlgmr.msra.gmra.mrb[2].mxu0 %v12895_v28  ;;  %v12691_v16 = vand.u32 4294901760, %v10073_v15  ;;  %v10095_v28 = vsub.f32 %v2327_v37, %v10082_v47  ;;  %v10097_v45 = vand.u32 4294901760, %v2332_v58 }
 0x31b   : > { %12896 = vst [vmem:[#allocation48_spill] sm:$0xff] %v10080_v40  ;;  %8362 = vmatpush1.bf16.msra.mxu0 %v9688_v35  ;;  %v10092_v4 = vsub.f32 %v2337_v49, %v10080_v40  ;;  %v10102_v25 = vsub.f32 %v2339_v38, %v10086_v52 }
 0x31c   : > { %8363 = vmatprep.subr.bf16.mxu0 %v12897_v34  ;;  %12898 = vst [vmem:[#allocation49_spill] sm:$0xff] %v10095_v28  ;;  %3579 = vmatprep.mubr.f32.mxu0 %v12691_v16  ;;  %v12699_v59 = vand.u32 4294901760, %v10095_v28  ;;  %v10109_v49 = vsub.f32 %v2332_v58, %v10097_v45 }
 0x31d   : > { %12899 = vst [vmem:[#allocation50_spill] sm:$0xff] %v10102_v25  ;;  %v12698_v18 = vand.u32 4294901760, %v10092_v4  ;;  %v12701_v37 = vand.u32 4294901760, %v10102_v25 }
 0x31e   : > { %3583 = vmatmul.mubr.f32.gmra.mrb[4].mxu0 %v12690_v31  ;;  %12900 = vst [vmem:[#allocation51_spill] sm:$0xff] %v10109_v49  ;;  %v2432_v31 = vsub.f32 %v10095_v28, %v12699_v59  ;;  %v12700_v16 = vand.u32 4294901760, %v10109_v49  ;;  %v10137_v59 = vld [vmem:[%s12629_s3 + $0x128] sm:$0xff] }
 0x31f   : > { %8365 = vmatpush1.bf16.msra.mxu0 %v9705_v13  ;;  %3804 = vmatprep.mubr.f32.mxu0 %v10041_v23  ;;  %v2426_v38 = vsub.f32 %v10092_v4, %v12698_v18  ;;  %v2441_v58 = vsub.f32 %v10102_v25, %v12701_v37  ;;  %v10132_v18 = vld [vmem:[%s12629_s3 + $0x120] sm:$0xff] }
 0x320   : > { %8366 = vmatprep.subr.bf16.mxu0 %v12897_v34  ;;  %v2433_v23 = vand.u32 4294901760, %v2432_v31  ;;  %v2447_v15 = vsub.f32 %v10109_v49, %v12700_v16  ;;  %v12703_v31 = vand.u32 4294901760, %v10132_v18  ;;  %v12702_v16 = vand.u32 4294901760, %v10137_v59 }
 0x321   : > { %v2427_v9 = vand.u32 4294901760, %v2426_v38  ;;  %v2442_v38 = vand.u32 4294901760, %v2441_v58 }
 0x322   : > { %v2448_v37 = vand.u32 4294901760, %v2447_v15  ;;  %v10166_v15 = vsub.f32 %v10137_v59, %v12702_v16  ;;  %v10186_v16 = vld [vmem:[%s12629_s3 + $0x150] sm:$0xff] }
 0x323   : > { %8368 = vmatpush1.bf16.msra.mxu0 %v9729_v60  ;;  %2428 = vmatprep.mubr.f32.mxu1 %v2427_v9  ;;  %v10148_v9 = vld [vmem:[%s12629_s3 + $0x130] sm:$0xff] }
 0x324   : > { %8369 = vmatprep.subr.bf16.mxu0 %v12897_v34  ;;  %2434 = vmatmul.mubr.f32.vlgmr.msra.gmra.mrb[2].mxu1 %v2433_v23  ;;  %v10161_v23 = vsub.f32 %v10132_v18, %v12703_v31  ;;  %12902 = vst [vmem:[#allocation53_spill] sm:$0xff] %v10166_v15  ;;  %v10191_v31 = vld [vmem:[%s12629_s3 + $0x158] sm:$0xff]  ;;  %v12908_v3 = vand.u32 4294901760, %v10166_v15 }
 0x325   : > { %8092 = vmatpush1.bf16.msra.mxu1 %v9934_v48  ;;  %2443 = vmatprep.mubr.f32.mxu1 %v2442_v38  ;;  %v10154_v48 = vld [vmem:[%s12629_s3 + $0x138] sm:$0xff]  ;;  %v10181_v38 = vld [vmem:[%s12629_s3 + $0x148] sm:$0xff] }
 0x326   : > { %8093 = vmatprep.subr.bf16.mxu1 %v12897_v34  ;;  %12901 = vst [vmem:[#allocation52_spill] sm:$0xff] %v10161_v23  ;;  %v12905_v60 = vand.u32 4294901760, %v10154_v48 }
 0x327   : > { %8371 = vmatpush1.bf16.msra.mxu0 %v9748_v6 }
 0x328   : > { %8372 = vmatprep.subr.bf16.mxu0 %v12897_v34  ;;  %2449 = vmatmul.mubr.f32.gmra.mrb[4].mxu1 %v2448_v37  ;;  %v10176_v37 = vld [vmem:[%s12629_s3 + $0x140] sm:$0xff]  ;;  %v10206_v13 = vsub.f32 %v10154_v48, %v12905_v60  ;;  %v3986_v60 = vsub.f32 %v10166_v15, %v12908_v3  ;;  %v12914_v15 = vand.u32 4294901760, %v10186_v16 }
 0x329   : > { %8095 = vmatpush1.bf16.msra.mxu1 %v9944_v32  ;;  %2609 = vmatprep.mubr.f32.mxu1 %v10080_v40  ;;  %v10224_v32 = vld [vmem:[%s12629_s3 + $0x160] sm:$0xff]  ;;  %v12910_v3 = vand.u32 4294901760, %v10176_v37  ;;  %v10277_v40 = vld [vmem:[%s12629_s3 + $0x178] sm:$0xff] }
 0x32a   : > { %8096 = vmatprep.subr.bf16.mxu1 %v12897_v34  ;;  %12906 = vst [vmem:[#allocation55_spill] sm:$0xff] %v10206_v13  ;;  %v3987_v0 = vand.u32 4294901760, %v3986_v60 }
 0x32b   : > { %8374 = vmatpush1.bf16.msra.mxu0 %v9754_v7  ;;  %v12903_v7 = vand.u32 4294901760, %v10148_v9 }
 0x32c   : > { %8375 = vmatprep.subr.bf16.mxu0 %v12897_v34 }
 0x32d   : > { %8098 = vmatpush1.bf16.msra.mxu1 %v9954_v51  ;;  %v10199_v6 = vsub.f32 %v10148_v9, %v12903_v7  ;;  %v10229_v7 = vld [vmem:[%s12629_s3 + $0x168] sm:$0xff]  ;;  %v12912_v51 = vand.u32 4294901760, %v10181_v38 }
 0x32e   : > { %8099 = vmatprep.subr.bf16.mxu1 %v12897_v34  ;;  %12909 = vst [vmem:[#allocation56_spill] sm:$0xff] %v10229_v7 }
 0x32f   : > { %12904 = vst [vmem:[#allocation54_spill] sm:$0xff] %v10199_v6  ;;  %8377 = vmatpush1.bf16.msra.mxu0 %v9782_v12  ;;  %v12907_v12 = vand.u32 4294901760, %v10161_v23  ;;  %v10242_v58 = vsub.f32 %v10181_v38, %v12912_v51  ;;  %v12918_v1 = vand.u32 4294901760, %v10199_v6 }
 0x330   : > { %8378 = vmatprep.subr.bf16.mxu0 %v12897_v34 }
 0x331   : > { %8101 = vmatpush1.bf16.msra.mxu1 %v9964_v33  ;;  %v3979_v35 = vsub.f32 %v10161_v23, %v12907_v12  ;;  %v10237_v33 = vsub.f32 %v10176_v37, %v12910_v3  ;;  %12913 = vst [vmem:[#allocation58_spill] sm:$0xff] %v10242_v58  ;;  %v10248_v23 = vsub.f32 %v10186_v16, %v12914_v15  ;;  %v10264_v15 = vld [vmem:[%s12629_s3 + $0x170] sm:$0xff] }
 0x332   : > { %8102 = vmatprep.subr.bf16.mxu1 %v12897_v34  ;;  %v3993_v49 = vsub.f32 %v10199_v6, %v12918_v1  ;;  %v12922_v1 = vand.u32 4294901760, %v10229_v7  ;;  %v12929_v3 = vand.u32 4294901760, %v10264_v15 }
 0x333   : > { %8380 = vmatpush1.bf16.msra.mxu0 %v9812_v22  ;;  %12911 = vst [vmem:[#allocation57_spill] sm:$0xff] %v10237_v33  ;;  %12915 = vst [vmem:[#allocation59_spill] sm:$0xff] %v10248_v23  ;;  %v12916_v22 = vand.u32 4294901760, %v10191_v31  ;;  %v3980_v51 = vand.u32 4294901760, %v3979_v35 }
 0x334   : > { %8381 = vmatprep.subr.bf16.mxu0 %v12897_v34  ;;  %v10290_v60 = vsub.f32 %v10229_v7, %v12922_v1  ;;  %v3994_v28 = vand.u32 4294901760, %v3993_v49  ;;  %v12925_v1 = vand.u32 4294901760, %v10237_v33  ;;  %v10314_v49 = vld [vmem:[%s12629_s3 + $0x188] sm:$0xff] }
 0x335   : > { %v10253_v12 = vsub.f32 %v10191_v31, %v12916_v22  ;;  %8104 = vmatpush1.bf16.msra.mxu1 %v9974_v55  ;;  %v12919_v22 = vand.u32 4294901760, %v10206_v13  ;;  %v8415_v25 = vpack.c.bf16 %v3987_v0, %v3980_v51 }
 0x336   : > { %8105 = vmatprep.subr.bf16.mxu1 %v12897_v34  ;;  %12923 = vst [vmem:[#allocation62_spill] sm:$0xff] %v10290_v60  ;;  %v4007_v7 = vsub.f32 %v10237_v33, %v12925_v1  ;;  %v10353_v1 = vld [vmem:[%s12629_s3 + $0x198] sm:$0xff] }
 0x337   : > { %12917 = vst [vmem:[#allocation60_spill] sm:$0xff] %v10253_v12  ;;  %8383 = vmatpush1.bf16.msra.mxu0 %v9855_v20  ;;  %v4000_v55 = vsub.f32 %v10206_v13, %v12919_v22  ;;  %v3849_v20 = vrot.slane %v3819_v56, 2  ;;  %v12920_v22 = vand.u32 4294901760, %v10224_v32  ;;  %v12926_v13 = vand.u32 4294901760, %v10242_v58 }
 0x338   : > { %8384 = vmatprep.subr.bf16.mxu0 %v12897_v34 }
 0x339   : > { %v10285_v35 = vsub.f32 %v10224_v32, %v12920_v22  ;;  %8107 = vmatpush1.bf16.msra.mxu1 %v9984_v8  ;;  %v4001_v56 = vand.u32 4294901760, %v4000_v55  ;;  %v12924_v22 = vrot.slane %v10049_v24, 2  ;;  %v4014_v0 = vsub.f32 %v10242_v58, %v12926_v13  ;;  %v10309_v8 = vld [vmem:[%s12629_s3 + $0x180] sm:$0xff] }
 0x33a   : > { %8108 = vmatprep.subr.bf16.mxu1 %v12897_v34  ;;  %v12928_v55 = vand.u32 4294901760, %v10253_v12  ;;  %v10328_v58 = vsub.f32 %v10264_v15, %v12929_v3 }
 0x33b   : > { %12921 = vst [vmem:[#allocation61_spill] sm:$0xff] %v10285_v35  ;;  %8386 = vmatpush1.bf16.msra.mxu0 %v9875_v57  ;;  %v3851_v6 = vsel %vm3845_vm14, %v3849_v20, %v12924_v22  ;;  %v12927_v20 = vand.u32 4294901760, %v10248_v23  ;;  %v8418_v3 = vpack.c.bf16 %v4001_v56, %v3994_v28 }
 0x33c   : > { %8414 = vmatprep.subr.bf16.mxu0 %v12897_v34  ;;  %v4028_v13 = vsub.f32 %v10253_v12, %v12928_v55  ;;  %12930 = vst [vmem:[#allocation63_spill] sm:$0xff] %v10328_v58  ;;  %v10333_v33 = vsel %vm2239_vm5, %v3851_v6, 0  ;;  %v4008_v12 = vand.u32 4294901760, %v4007_v7  ;;  %v12934_v7 = vand.u32 4294901760, %v10285_v35 }
 0x33d   : > { %v4021_v51 = vsub.f32 %v10248_v23, %v12927_v20  ;;  %8110 = vmatpush1.bf16.msra.mxu1 %v9994_v29  ;;  %v12931_v20 = vand.u32 4294901760, %v10277_v40  ;;  %v4015_v29 = vand.u32 4294901760, %v4014_v0  ;;  %v12935_v0 = vand.u32 4294901760, %v10290_v60 }
 0x33e   : > { %3806 = vmatmul.mubr.f32.vlgmr.msra.gmra.mrb[6].mxu0 %v10039_v26  ;;  %8111 = vmatprep.subr.bf16.mxu1 %v12897_v34  ;;  %v4029_v28 = vand.u32 4294901760, %v4028_v13  ;;  %v4035_v56 = vsub.f32 %v10285_v35, %v12934_v7  ;;  %v12938_v26 = vand.u32 4294901760, %v10314_v49  ;;  %v12940_v22 = vand.u32 4294901760, %v10328_v58 }
 0x33f   : > { %v10338_v55 = vsub.f32 %v10277_v40, %v12931_v20  ;;  %3811 = vmatprep.mubr.f32.mxu0 %v10060_v36  ;;  %8416 = vmatpush1.bf16.msra.mxu0 %v8415_v25  ;;  %v4022_v6 = vand.u32 4294901760, %v4021_v51  ;;  %v10348_v20 = vld [vmem:[%s12629_s3 + $0x190] sm:$0xff]  ;;  %v10356_v25 = vand.u32 4294901760, %v10333_v33  ;;  %v4042_v51 = vsub.f32 %v10290_v60, %v12935_v0 }
 0x340   : > { %8417 = vmatprep.subr.bf16.mxu0 %v12897_v34  ;;  %v12936_v36 = vand.u32 4294901760, %v10309_v8  ;;  %v10376_v7 = vsub.f32 %v10314_v49, %v12938_v26  ;;  %v10391_v26 = vld [vmem:[%s12629_s3 + $0x1a8] sm:$0xff]  ;;  %v4049_v0 = vsub.f32 %v10328_v58, %v12940_v22  ;;  %v13001_v58 = vld [vmem:[#allocation11_spill] sm:$0xff] }
 0x341   : > { %12932 = vst [vmem:[#allocation64_spill] sm:$0xff] %v10338_v55  ;;  %12933 = vst [vmem:[#allocation65_spill] sm:$0xff] %v10356_v25  ;;  %8113 = vmatpush1.bf16.msra.mxu1 %v10004_v30  ;;  %v12755_v23 = vand.u32 4294901760, %v10338_v55  ;;  %v8421_v30 = vpack.c.bf16 %v4015_v29, %v4008_v12  ;;  %v4036_v12 = vand.u32 4294901760, %v4035_v56  ;;  %v4043_v29 = vand.u32 4294901760, %v4042_v51 }
 0x342   : > { %3813 = vmatmul.mubr.f32.gmra.mrb[8].mxu0 %v10056_v11  ;;  %v10371_v13 = vsub.f32 %v10309_v8, %v12936_v36  ;;  %12939 = vst [vmem:[#allocation67_spill] sm:$0xff] %v10376_v7  ;;  %8114 = vmatprep.subr.bf16.mxu1 %v12897_v34  ;;  %v10386_v36 = vld [vmem:[%s12629_s3 + $0x1a0] sm:$0xff]  ;;  %v12946_v56 = vand.u32 4294901760, %v10376_v7 }
 0x343   : > { %8419 = vmatpush1.bf16.msra.mxu0 %v8418_v3  ;;  %4130 = vmatprep.mubr.f32.mxu0 %v10356_v25  ;;  %v8424_v3 = vpack.c.bf16 %v4029_v28, %v4022_v6  ;;  %v4056_v60 = vsub.f32 %v10338_v55, %v12755_v23  ;;  %v12941_v6 = vand.u32 4294901760, %v10348_v20  ;;  %v4050_v23 = vand.u32 4294901760, %v4049_v0 }
 0x344   : > { %12937 = vst [vmem:[#allocation66_spill] sm:$0xff] %v10371_v13  ;;  %8420 = vmatprep.subr.bf16.mxu0 %v12897_v34  ;;  %v12758_v35 = vand.u32 4294901760, %v10371_v13  ;;  %v4070_v51 = vsub.f32 %v10376_v7, %v12946_v56  ;;  %v12947_v55 = vand.u32 4294901760, %v10386_v36 }
 0x345   : > { %8116 = vmatpush1.bf16.msra.mxu1 %v10012_v5  ;;  %v10406_v28 = vsub.f32 %v10348_v20, %v12941_v6  ;;  %v12943_v5 = vand.u32 4294901760, %v10353_v1  ;;  %v12945_v6 = vpack.c.bf16 %v9725_v44, %v9723_v42  ;;  %v4057_v11 = vand.u32 4294901760, %v4056_v60 }
 0x346   : > { %8117 = vmatprep.subr.bf16.mxu1 %v12897_v34  ;;  %v10433_v0 = vsub.f32 %v10386_v36, %v12947_v55  ;;  %v12949_v60 = vand.u32 4294901760, %v10391_v26 }
 0x347   : > { %8422 = vmatpush1.bf16.msra.mxu0 %v8421_v30  ;;  %12942 = vst [vmem:[#allocation68_spill] sm:$0xff] %v10406_v28  ;;  %v10411_v22 = vsub.f32 %v10353_v1, %v12943_v5  ;;  %v8427_v30 = vpack.c.bf16 %v4043_v29, %v4036_v12  ;;  %v4063_v5 = vsub.f32 %v10371_v13, %v12758_v35  ;;  %v12763_v12 = vand.u32 4294901760, %v10406_v28 }
 0x348   : > { %8423 = vmatprep.subr.bf16.mxu0 %v12897_v34  ;;  %2611 = vmatmul.mubr.f32.vlgmr.msra.gmra.mrb[6].mxu1 %v10082_v47  ;;  %12948 = vst [vmem:[#allocation70_spill] sm:$0xff] %v10433_v0  ;;  %v8430_v56 = vpack.c.bf16 %v4057_v11, %v4050_v23  ;;  %v4071_v29 = vand.u32 4294901760, %v4070_v51  ;;  %v12764_v13 = vand.u32 4294901760, %v10433_v0  ;;  %v12953_v11 = vpack.c.bf16 %v9775_v27, %v9773_v41 }
 0x349   : > { %12944 = vst [vmem:[#allocation69_spill] sm:$0xff] %v10411_v22  ;;  %2616 = vmatprep.mubr.f32.mxu1 %v10086_v52  ;;  %8119 = vmatpush1.bf16.msra.mxu1 %v12945_v6  ;;  %v10438_v6 = vsub.f32 %v10391_v26, %v12949_v60  ;;  %v4064_v35 = vand.u32 4294901760, %v4063_v5  ;;  %v4077_v55 = vsub.f32 %v10406_v28, %v12763_v12  ;;  %v12952_v60 = vand.u32 4294901760, %v10411_v22 }
 0x34a   : > { %8120 = vmatprep.subr.bf16.mxu1 %v12897_v34  ;;  %v4091_v5 = vsub.f32 %v10433_v0, %v12764_v13  ;;  %v12954_v12 = vpack.c.bf16 %v9809_v46, %v9807_v43 }
 0x34b   : > { %8425 = vmatpush1.bf16.msra.mxu0 %v8424_v3  ;;  %12950 = vst [vmem:[#allocation71_spill] sm:$0xff] %v10438_v6  ;;  %v12951_v3 = vpack.c.bf16 %v9739_v53, %v9733_v62  ;;  %v4084_v7 = vsub.f32 %v10411_v22, %v12952_v60  ;;  %v8433_v23 = vpack.c.bf16 %v4071_v29, %v4064_v35  ;;  %v4078_v51 = vand.u32 4294901760, %v4077_v55  ;;  %v3821_v35 = vld [vmem:[#allocation3 + $0x28] sm:$0x3]  ;;  %v3818_v55 = vld [vmem:[#allocation3] sm:$0xfc] }
 0x34c   : > { %8426 = vmatprep.subr.bf16.mxu0 %v12897_v34  ;;  %2618 = vmatmul.mubr.f32.gmra.mrb[8].mxu1 %v10097_v45  ;;  %v3854_v13 = vrot.slane %v3821_v35, 2 }
 0x34d   : > { %8122 = vmatpush1.bf16.msra.mxu1 %v12951_v3  ;;  %2725 = vmatprep.mubr.f32.mxu1 %v10092_v4  ;;  %v12765_v3 = vand.u32 4294901760, %v10438_v6 }
 0x34e   : > { %8123 = vmatprep.subr.bf16.mxu1 %v12897_v34 }
 0x34f   : > { %8428 = vmatpush1.bf16.msra.mxu0 %v8427_v30  ;;  %v4085_v30 = vand.u32 4294901760, %v4084_v7  ;;  %v4098_v60 = vsub.f32 %v10438_v6, %v12765_v3  ;;  %v4092_v7 = vand.u32 4294901760, %v4091_v5  ;;  %v12955_v3 = vpack.c.bf16 %v9843_v14, %v9841_v63 }
 0x350   : > { %8429 = vmatprep.subr.bf16.mxu0 %v12897_v34  ;;  %v12956_v6 = vrot.slane %v10049_v24, 2  ;;  %v12958_v24 = vand.u32 4294901760, %v10132_v18  ;;  %v12962_v18 = vpack.c.bf16 %v9888_v17, %v9881_v61 }
 0x351   : > { %8125 = vmatpush1.bf16.msra.mxu1 %v12953_v11  ;;  %v8436_v29 = vpack.c.bf16 %v4085_v30, %v4078_v51  ;;  %v3847_v11 = vrot.slane %v10051_v54, 2  ;;  %v3820_v30 = vld [vmem:[#allocation3 + $0x20] sm:$0x3]  ;;  %v12957_v54 = vpack.c.bf16 %v9869_v50, %v9867_v39 }
 0x352   : > { %8126 = vmatprep.subr.bf16.mxu1 %v12897_v34  ;;  %v3855_v51 = vsel %vm3845_vm14, %v12956_v6, %v3854_v13  ;;  %v12959_v13 = vand.u32 4294901760, %v10137_v59  ;;  %v12963_v59 = vand.u32 4294901760, %v10148_v9  ;;  %v12967_v9 = vand.u32 4294901760, %v10176_v37 }
 0x353   : > { %8431 = vmatpush1.bf16.msra.mxu0 %v8430_v56  ;;  %v4099_v56 = vand.u32 4294901760, %v4098_v60  ;;  %v3852_v60 = vrot.slane %v3820_v30, 2  ;;  %v12969_v30 = vpack.c.bf16 %v9922_v21, %v9920_v10  ;;  %v12971_v37 = vand.u32 4294901760, %v10191_v31  ;;  %v12979_v31 = vld [vmem:[#allocation51_spill] sm:$0xff] }
 0x354   : > { %8432 = vmatprep.subr.bf16.mxu0 %v12897_v34  ;;  %v10495_v6 = vpack.c.bf16 %v12959_v13, %v12958_v24  ;;  %v12973_v13 = vld [vmem:[#allocation50_spill] sm:$0xff] }
 0x355   : > { %8128 = vmatpush1.bf16.msra.mxu1 %v12954_v12  ;;  %v8439_v12 = vpack.c.bf16 %v4099_v56, %v4092_v7  ;;  %v10505_v7 = vsel %vm3845_vm14, %v3847_v11, %v3852_v60  ;;  %v10509_v56 = vsub.f32 %v10333_v33, %v10356_v25  ;;  %v12974_v60 = vld [vmem:[#allocation12_spill] sm:$0xff] }
 0x356   : > { %8129 = vmatprep.subr.bf16.mxu1 %v12897_v34  ;;  %12960 = vst [vmem:[#allocation72_spill] sm:$0xff] %v10495_v6  ;;  %v10525_v33 = vand.u32 4294901760, %v10505_v7 }
 0x357   : > { %8434 = vmatpush1.bf16.msra.mxu0 %v8433_v23  ;;  %v3846_v23 = vrot.slane %v3818_v55, 2  ;;  %12961 = vst [vmem:[#allocation73_spill] sm:$0xff] %v10509_v56  ;;  %v12964_v55 = vand.u32 4294901760, %v10154_v48  ;;  %v12968_v48 = vand.u32 4294901760, %v10181_v38  ;;  %v12972_v38 = vld [vmem:[#allocation49_spill] sm:$0xff] }
 0x358   : > { %8435 = vmatprep.subr.bf16.mxu0 %v12897_v34 }
 0x359   : > { %8131 = vmatpush1.bf16.msra.mxu1 %v12955_v3  ;;  %v10482_v5 = vsel %vm3845_vm14, %v3846_v23, %v3847_v11  ;;  %v10488_v3 = vsel %vm2239_vm5, %v3855_v51, 0  ;;  %v10521_v11 = vpack.c.bf16 %v12964_v55, %v12963_v59  ;;  %v12966_v23 = vpack.c.bf16 %v9906_v2, %v9904_v19  ;;  %v12976_v59 = vld [vmem:[#allocation56_spill] sm:$0xff] }
 0x35a   : > { %8132 = vmatprep.subr.bf16.mxu1 %v12897_v34  ;;  %v10498_v35 = vand.u32 4294901760, %v10482_v5  ;;  %v10540_v51 = vpack.c.bf16 %v12968_v48, %v12967_v9  ;;  %v12981_v9 = vand.u32 4294901760, %v10092_v4  ;;  %v12982_v48 = vand.u32 4294901760, %v10264_v15  ;;  %v12987_v15 = vld [vmem:[#allocation25_spill] sm:$0xff] }
 0x35b   : > { %8437 = vmatpush1.bf16.msra.mxu0 %v8436_v29  ;;  %v10502_v29 = vand.u32 4294901760, %v10488_v3  ;;  %12965 = vst [vmem:[#allocation74_spill] sm:$0xff] %v10521_v11  ;;  %v12985_v4 = vand.u32 4294901760, %v10309_v8  ;;  %v12990_v8 = vld [vmem:[#allocation29_spill] sm:$0xff] }
 0x35c   : > { %8438 = vmatprep.subr.bf16.mxu0 %v12897_v34 }
 0x35d   : > { %8134 = vmatpush1.bf16.msra.mxu1 %v12957_v54  ;;  %v12970_v54 = vand.u32 4294901760, %v10186_v16  ;;  %v12977_v16 = vand.u32 4294901760, %v12976_v59  ;;  %v12989_v59 = vand.u32 4294901760, %v10353_v1  ;;  %v10614_v1 = vsub.f32 %v10482_v5, %v10498_v35  ;;  %v12999_v5 = vld [vmem:[#allocation33_spill] sm:$0xff] }
 0x35e   : > { %8135 = vmatprep.subr.bf16.mxu1 %v12897_v34 }
 0x35f   : > { %8440 = vmatpush1.bf16.msra.mxu0 %v8439_v12  ;;  %v12768_v12 = vand.u32 4294901760, %v10509_v56  ;;  %v10553_v24 = vpack.c.bf16 %v12971_v37, %v12970_v54  ;;  %v12984_v54 = vld [vmem:[#allocation21_spill] sm:$0xff]  ;;  %v12986_v37 = vand.u32 4294901760, %v10314_v49  ;;  %12995 = vst [vmem:[#allocation50_spill] sm:$0xff] %v10614_v1  ;;  %v12785_v56 = vand.u32 4294901760, %v13001_v58 }
 0x360   : > { %8468 = vmatprep.subr.bf16.mxu0 %v12897_v34  ;;  %v12991_v49 = vld [vmem:[#allocation5_spill] sm:$0xff] }
 0x361   : > { %8137 = vmatpush1.bf16.msra.mxu1 %v12962_v18  ;;  %v12975_v18 = vand.u32 4294901760, %v10224_v32  ;;  %v12983_v32 = vand.u32 4294901760, %v10277_v40  ;;  %v12988_v40 = vand.u32 4294901760, %v10348_v20  ;;  %v12994_v20 = vand.u32 4294901760, %v10391_v26  ;;  %v12997_v26 = vld [vmem:[#allocation7_spill] sm:$0xff] }
 0x362   : > { %4132 = vmatmul.mubr.f32.vlgmr.msra.gmra.mrb[10].mxu0 %v10498_v35  ;;  %8138 = vmatprep.subr.bf16.mxu1 %v12897_v34  ;;  %v3234_v57 = vsub.f32 %v13001_v58, %v12785_v56 }
 0x363   : > { %4137 = vmatprep.mubr.f32.mxu0 %v10502_v29  ;;  %8470 = vmatpush1.bf16.msra.mxu0 %v10495_v6  ;;  %v10565_v55 = vpack.c.bf16 %v12977_v16, %v12975_v18  ;;  %v10588_v18 = vpack.c.bf16 %v12986_v37, %v12985_v4  ;;  %v10598_v16 = vpack.c.bf16 %v12989_v59, %v12988_v40  ;;  %v12993_v4 = vand.u32 4294901760, %v10386_v36 }
 0x364   : > { %8471 = vmatprep.subr.bf16.mxu0 %v12897_v34  ;;  %v10619_v40 = vsub.f32 %v10488_v3, %v10502_v29 }
 0x365   : > { %8140 = vmatpush1.bf16.msra.mxu1 %v12966_v23  ;;  %12978 = vst [vmem:[#allocation49_spill] sm:$0xff] %v10565_v55  ;;  %v12980_v23 = vld [vmem:[#allocation16_spill] sm:$0xff]  ;;  %v10610_v37 = vpack.c.bf16 %v12994_v20, %v12993_v4  ;;  %v12782_v4 = vand.u32 4294901760, %v12997_v26  ;;  %v12998_v20 = vld [vmem:[#allocation9_spill] sm:$0xff] }
 0x366   : > { %4139 = vmatmul.mubr.f32.gmra.mrb[12].mxu0 %v10525_v33  ;;  %8141 = vmatprep.subr.bf16.mxu1 %v12897_v34  ;;  %12996 = vst [vmem:[#allocation12_spill] sm:$0xff] %v10619_v40 }
 0x367   : > { %8473 = vmatpush1.bf16.msra.mxu0 %v10521_v11  ;;  %4348 = vmatprep.mubr.f32.mxu0 %v12768_v12  ;;  %v12783_v12 = vand.u32 4294901760, %v12998_v20  ;;  %v3213_v3 = vsub.f32 %v12997_v26, %v12782_v4 }
 0x368   : > { %8474 = vmatprep.subr.bf16.mxu0 %v12897_v34 }
 0x369   : > { %8143 = vmatpush1.bf16.msra.mxu1 %v12969_v30  ;;  %v10578_v30 = vpack.c.bf16 %v12983_v32, %v12982_v48  ;;  %v12992_v48 = vld [vmem:[#allocation6_spill] sm:$0xff]  ;;  %v3214_v4 = vand.u32 4294901760, %v3213_v3  ;;  %v13008_v3 = vld [vmem:[#allocation13_spill] sm:$0xff] }
 0x36a   : > { %8144 = vmatprep.subr.bf16.mxu1 %v12897_v34  ;;  %v12773_v32 = vand.u32 4294901760, %v12992_v48 }
 0x36b   : > { %8476 = vmatpush1.bf16.msra.mxu0 %v10540_v51 }
 0x36c   : > { %8477 = vmatprep.subr.bf16.mxu0 %v12897_v34  ;;  %2728 = vmatmul.mubr.f32.vlgmr.msra.gmra.mrb[10].mxu1 %v12972_v38  ;;  %v3206_v36 = vsub.f32 %v12992_v48, %v12773_v32  ;;  %v3220_v32 = vsub.f32 %v12998_v20, %v12783_v12 }
 0x36d   : > { %2734 = vmatprep.mubr.f32.mxu1 %v12973_v13  ;;  %8146 = vmatpush1.bf16.msra.mxu1 %v12974_v60 }
 0x36e   : > { %8147 = vmatprep.subr.bf16.mxu1 %v12897_v34  ;;  %v3207_v22 = vand.u32 4294901760, %v3206_v36  ;;  %v10645_v36 = vsub.f32 %v10505_v7, %v10525_v33  ;;  %v13006_v7 = vand.u32 4294901760, %v10619_v40 }
 0x36f   : > { %8479 = vmatpush1.bf16.msra.mxu0 %v10553_v24 }
 0x370   : > { %8480 = vmatprep.subr.bf16.mxu0 %v12897_v34  ;;  %2737 = vmatmul.mubr.f32.gmra.mrb[12].mxu1 %v12979_v31  ;;  %13002 = vst [vmem:[#allocation56_spill] sm:$0xff] %v10645_v36  ;;  %v12791_v56 = vand.u32 4294901760, %v10645_v36  ;;  %v13014_v36 = vld [vmem:[#allocation39_spill] sm:$0xff] }
 0x371   : > { %8149 = vmatpush1.bf16.msra.mxu1 %v12980_v23  ;;  %2827 = vmatprep.mubr.f32.mxu1 %v12981_v9  ;;  %v12774_v9 = vand.u32 4294901760, %v12991_v49 }
 0x372   : > { %8150 = vmatprep.subr.bf16.mxu1 %v12897_v34 }
 0x373   : > { %8482 = vmatpush1.bf16.msra.mxu0 %v10565_v55  ;;  %v3199_v59 = vsub.f32 %v12991_v49, %v12774_v9  ;;  %v13000_v9 = vld [vmem:[#allocation10_spill] sm:$0xff] }
 0x374   : > { %8483 = vmatprep.subr.bf16.mxu0 %v12897_v34  ;;  %v12784_v28 = vand.u32 4294901760, %v13000_v9 }
 0x375   : > { %8152 = vmatpush1.bf16.msra.mxu1 %v12984_v54  ;;  %v3200_v0 = vand.u32 4294901760, %v3199_v59  ;;  %v13005_v59 = vand.u32 4294901760, %v10614_v1 }
 0x376   : > { %8153 = vmatprep.subr.bf16.mxu1 %v12897_v34  ;;  %v3227_v12 = vsub.f32 %v13000_v9, %v12784_v28  ;;  %v12790_v28 = vand.u32 4294901760, %v13008_v3 }
 0x377   : > { %8485 = vmatpush1.bf16.msra.mxu0 %v10578_v30 }
 0x378   : > { %8486 = vmatprep.subr.bf16.mxu0 %v12897_v34 }
 0x379   : > { %8155 = vmatpush1.bf16.msra.mxu1 %v12987_v15  ;;  %v13004_v15 = vld [vmem:[#allocation37_spill] sm:$0xff] }
 0x37a   : > { %8156 = vmatprep.subr.bf16.mxu1 %v12897_v34 }
 0x37b   : > { %8488 = vmatpush1.bf16.msra.mxu0 %v10588_v18 }
 0x37c   : > { %8489 = vmatprep.subr.bf16.mxu0 %v12897_v34 }
 0x37d   : > { %8158 = vmatpush1.bf16.msra.mxu1 %v12990_v8  ;;  %v3221_v8 = vand.u32 4294901760, %v3220_v32  ;;  %v3235_v32 = vand.u32 4294901760, %v3234_v57 }
 0x37e   : > { %8159 = vmatprep.subr.bf16.mxu1 %v12897_v34 }
 0x37f   : > { %8491 = vmatpush1.bf16.msra.mxu0 %v10598_v16 }
 0x380   : > { %8492 = vmatprep.subr.bf16.mxu0 %v12897_v34 }
 0x381   : > { %8161 = vmatpush1.bf16.msra.mxu1 %v12999_v5  ;;  %v10647_v5 = vpack.c.bf16 %v3207_v22, %v3200_v0  ;;  %v10661_v22 = vpack.c.bf16 %v3221_v8, %v3214_v4  ;;  %v3228_v0 = vand.u32 4294901760, %v3227_v12  ;;  %v13011_v8 = vld [vmem:[#allocation38_spill] sm:$0xff]  ;;  %v13012_v4 = vld [vmem:[#allocation17_spill] sm:$0xff] }
 0x382   : > { %8162 = vmatprep.subr.bf16.mxu1 %v12897_v34 }
 0x383   : > { %8494 = vmatpush1.bf16.msra.mxu0 %v10610_v37  ;;  %13003 = vst [vmem:[#allocation51_spill] sm:$0xff] %v10647_v5  ;;  %13007 = vst [vmem:[#allocation16_spill] sm:$0xff] %v10661_v22  ;;  %v13009_v5 = vld [vmem:[#allocation15_spill] sm:$0xff] }
 0x384   : > { %8522 = vmatprep.subr.bf16.mxu0 %v12897_v34  ;;  %v12792_v1 = vand.u32 4294901760, %v13009_v5  ;;  %v13018_v22 = vld [vmem:[#allocation23_spill] sm:$0xff] }
 0x385   : > { %8164 = vmatpush1.bf16.msra.mxu1 %v13004_v15 }
 0x386   : > { %4352 = vmatmul.mubr.f32.vlgmr.msra.gmra.mrb[14].mxu0 %v13005_v59  ;;  %8165 = vmatprep.subr.bf16.mxu1 %v12897_v34  ;;  %v10668_v59 = vpack.c.bf16 %v3235_v32, %v3228_v0  ;;  %v3248_v57 = vsub.f32 %v13009_v5, %v12792_v1  ;;  %v12798_v0 = vand.u32 4294901760, %v13012_v4  ;;  %v13013_v32 = vld [vmem:[#allocation18_spill] sm:$0xff] }
 0x387   : > { %4359 = vmatprep.mubr.f32.mxu0 %v13006_v7  ;;  %8524 = vmatpush1.bf16.msra.mxu0 %v10495_v6  ;;  %v3241_v7 = vsub.f32 %v13008_v3, %v12790_v28  ;;  %v12799_v40 = vand.u32 4294901760, %v13013_v32 }
 0x388   : > { %8525 = vmatprep.subr.bf16.mxu0 %v12897_v34  ;;  %13010 = vst [vmem:[#allocation21_spill] sm:$0xff] %v10668_v59  ;;  %v3249_v28 = vand.u32 4294901760, %v3248_v57 }
 0x389   : > { %8167 = vmatpush1.bf16.msra.mxu1 %v13011_v8  ;;  %v3242_v12 = vand.u32 4294901760, %v3241_v7  ;;  %v3262_v1 = vsub.f32 %v13013_v32, %v12799_v40  ;;  %v13015_v7 = vand.u32 4294901760, %v9723_v42  ;;  %v12804_v42 = vand.u32 4294901760, %v13018_v22 }
 0x38a   : > { %4363 = vmatmul.mubr.f32.gmra.mrb[16].mxu0 %v12791_v56  ;;  %8168 = vmatprep.subr.bf16.mxu1 %v12897_v34  ;;  %v3255_v56 = vsub.f32 %v13012_v4, %v12798_v0  ;;  %v13017_v0 = vand.u32 4294901760, %v12972_v38 }
 0x38b   : > { %8527 = vmatpush1.bf16.msra.mxu0 %v10521_v11  ;;  %4584 = vmatprep.mubr.f32.mxu0 %v10356_v25  ;;  %v13016_v25 = vand.u32 4294901760, %v9725_v44  ;;  %v10696_v6 = vpack.c.bf16 %v3249_v28, %v3242_v12  ;;  %v3263_v59 = vand.u32 4294901760, %v3262_v1  ;;  %v13021_v28 = vand.u32 4294901760, %v9733_v62 }
 0x38c   : > { %8528 = vmatprep.subr.bf16.mxu0 %v12897_v34  ;;  %v3256_v57 = vand.u32 4294901760, %v3255_v56  ;;  %v13022_v56 = vand.u32 4294901760, %v9739_v53  ;;  %v3269_v38 = vsub.f32 %v13018_v22, %v12804_v42 }
 0x38d   : > { %8170 = vmatpush1.bf16.msra.mxu1 %v13014_v36  ;;  %v8172_v11 = vpack.c.bf16 %v13016_v25, %v13015_v7  ;;  %v13019_v36 = vld [vmem:[#allocation24_spill] sm:$0xff]  ;;  %v13020_v25 = vand.u32 4294901760, %v12973_v13  ;;  %v13024_v13 = vld [vmem:[#allocation27_spill] sm:$0xff] }
 0x38e   : > { %8171 = vmatprep.subr.bf16.mxu1 %v12897_v34  ;;  %v10703_v40 = vpack.c.bf16 %v3263_v59, %v3256_v57  ;;  %v12801_v44 = vand.u32 4294901760, %v13019_v36  ;;  %v8175_v1 = vpack.c.bf16 %v13022_v56, %v13021_v28  ;;  %v3270_v62 = vand.u32 4294901760, %v3269_v38  ;;  %v13026_v57 = vld [vmem:[#allocation48_spill] sm:$0xff] }
 0x38f   : > { %8530 = vmatpush1.bf16.msra.mxu0 %v10540_v51  ;;  %v12800_v12 = vand.u32 4294901760, %v13024_v13  ;;  %v13028_v28 = vand.u32 4294901760, %v9775_v27 }
 0x390   : > { %8531 = vmatprep.subr.bf16.mxu0 %v12897_v34  ;;  %2831 = vmatmul.mubr.f32.vlgmr.msra.gmra.mrb[14].mxu1 %v13017_v0  ;;  %v3276_v59 = vsub.f32 %v13019_v36, %v12801_v44  ;;  %v13025_v0 = vld [vmem:[#allocation28_spill] sm:$0xff] }
 0x391   : > { %2838 = vmatprep.mubr.f32.mxu1 %v13020_v25  ;;  %8173 = vmatpush1.bf16.msra.mxu1 %v8172_v11  ;;  %v13023_v11 = vand.u32 4294901760, %v12979_v31  ;;  %v12802_v7 = vand.u32 4294901760, %v13025_v0  ;;  %v13027_v25 = vand.u32 4294901760, %v9773_v41  ;;  %v3283_v38 = vsub.f32 %v13024_v13, %v12800_v12  ;;  %v13030_v41 = vld [vmem:[#allocation32_spill] sm:$0xff] }
 0x392   : > { %8174 = vmatprep.subr.bf16.mxu1 %v12897_v34  ;;  %v3277_v53 = vand.u32 4294901760, %v3276_v59  ;;  %v13029_v59 = vld [vmem:[#allocation31_spill] sm:$0xff]  ;;  %v12806_v27 = vand.u32 4294901760, %v13030_v41  ;;  %v13032_v12 = vand.u32 4294901760, %v9809_v46  ;;  %v13035_v46 = vand.u32 4294901760, %v9841_v63 }
 0x393   : > { %8533 = vmatpush1.bf16.msra.mxu0 %v10553_v24  ;;  %v8178_v56 = vpack.c.bf16 %v13028_v28, %v13027_v25  ;;  %v3284_v25 = vand.u32 4294901760, %v3283_v38 }
 0x394   : > { %8534 = vmatprep.subr.bf16.mxu0 %v12897_v34  ;;  %2842 = vmatmul.mubr.f32.gmra.mrb[16].mxu1 %v13023_v11  ;;  %v10733_v31 = vpack.c.bf16 %v3277_v53, %v3270_v62  ;;  %v12803_v11 = vand.u32 4294901760, %v13029_v59  ;;  %v13031_v53 = vand.u32 4294901760, %v9807_v43  ;;  %v13034_v43 = vld [vmem:[#allocation36_spill] sm:$0xff] }
 0x395   : > { %8176 = vmatpush1.bf16.msra.mxu1 %v8175_v1  ;;  %2966 = vmatprep.mubr.f32.mxu1 %v13026_v57  ;;  %v3290_v1 = vsub.f32 %v13025_v0, %v12802_v7  ;;  %v3304_v7 = vsub.f32 %v13030_v41, %v12806_v27 }
 0x396   : > { %8177 = vmatprep.subr.bf16.mxu1 %v12897_v34  ;;  %v3297_v62 = vsub.f32 %v13029_v59, %v12803_v11  ;;  %v8181_v44 = vpack.c.bf16 %v13032_v12, %v13031_v53  ;;  %v13036_v12 = vand.u32 4294901760, %v9843_v14  ;;  %v13037_v14 = vand.u32 4294901760, %v9867_v39 }
 0x397   : > { %8536 = vmatpush1.bf16.msra.mxu0 %v10565_v55  ;;  %v3291_v28 = vand.u32 4294901760, %v3290_v1  ;;  %v3305_v11 = vand.u32 4294901760, %v3304_v7  ;;  %v12807_v55 = vand.u32 4294901760, %v13034_v43  ;;  %v13039_v39 = vand.u32 4294901760, %v9881_v61 }
 0x398   : > { %8537 = vmatprep.subr.bf16.mxu0 %v12897_v34  ;;  %v3298_v1 = vand.u32 4294901760, %v3297_v62  ;;  %v8184_v53 = vpack.c.bf16 %v13036_v12, %v13035_v46  ;;  %v8280_v62 = vpack.c.bf16 %v12992_v48, %v12991_v49  ;;  %v8283_v46 = vpack.c.bf16 %v12998_v20, %v12997_v26 }
 0x399   : > { %8179 = vmatpush1.bf16.msra.mxu1 %v8178_v56  ;;  %v10756_v38 = vpack.c.bf16 %v3291_v28, %v3284_v25  ;;  %v13033_v56 = vld [vmem:[#allocation35_spill] sm:$0xff]  ;;  %v3318_v25 = vsub.f32 %v13034_v43, %v12807_v55 }
 0x39a   : > { %8180 = vmatprep.subr.bf16.mxu1 %v12897_v34  ;;  %v3310_v42 = vand.u32 4294901760, %v13033_v56  ;;  %v10765_v27 = vpack.c.bf16 %v3305_v11, %v3298_v1  ;;  %v13038_v11 = vand.u32 4294901760, %v9869_v50  ;;  %v13040_v50 = vand.u32 4294901760, %v9888_v17 }
 0x39b   : > { %8539 = vmatpush1.bf16.msra.mxu0 %v10578_v30  ;;  %v8289_v17 = vpack.c.bf16 %v13009_v5, %v13008_v3 }
 0x39c   : > { %8540 = vmatprep.subr.bf16.mxu0 %v12897_v34  ;;  %v3311_v7 = vsub.f32 %v13033_v56, %v3310_v42  ;;  %v8187_v28 = vpack.c.bf16 %v13038_v11, %v13037_v14  ;;  %v8190_v12 = vpack.c.bf16 %v13040_v50, %v13039_v39  ;;  %v13045_v11 = vld [vmem:[#allocation25_spill] sm:$0xff] }
 0x39d   : > { %8182 = vmatpush1.bf16.msra.mxu1 %v8181_v44  ;;  %v3319_v44 = vand.u32 4294901760, %v3318_v25  ;;  %v13042_v25 = vand.u32 4294901760, %v9906_v2  ;;  %v8295_v2 = vpack.c.bf16 %v13019_v36, %v13018_v22 }
 0x39e   : > { %8183 = vmatprep.subr.bf16.mxu1 %v12897_v34  ;;  %v3312_v63 = vand.u32 4294901760, %v3311_v7  ;;  %v13041_v7 = vand.u32 4294901760, %v9904_v19  ;;  %v8292_v19 = vpack.c.bf16 %v13013_v32, %v13012_v4 }
 0x39f   : > { %8542 = vmatpush1.bf16.msra.mxu0 %v10588_v18 }
 0x3a0   : > { %8543 = vmatprep.subr.bf16.mxu0 %v12897_v34  ;;  %v10784_v1 = vpack.c.bf16 %v3319_v44, %v3312_v63  ;;  %v8193_v61 = vpack.c.bf16 %v13042_v25, %v13041_v7  ;;  %v13043_v63 = vand.u32 4294901760, %v9920_v10  ;;  %v13044_v44 = vand.u32 4294901760, %v9922_v21  ;;  %v13053_v7 = vld [vmem:[#allocation14_spill] sm:$0xff]  ;;  %v13054_v25 = vld [vmem:[#allocation19_spill] sm:$0xff] }
 0x3a1   : > { %8185 = vmatpush1.bf16.msra.mxu1 %v8184_v53  ;;  %v8286_v53 = vpack.c.bf16 %v13001_v58, %v13000_v9  ;;  %v8298_v10 = vpack.c.bf16 %v13025_v0, %v13024_v13  ;;  %v8301_v21 = vpack.c.bf16 %v13030_v41, %v13029_v59 }
 0x3a2   : > { %8186 = vmatprep.subr.bf16.mxu1 %v12897_v34  ;;  %v8196_v14 = vpack.c.bf16 %v13044_v44, %v13043_v63  ;;  %v13057_v44 = vld [vmem:[#allocation26_spill] sm:$0xff] }
 0x3a3   : > { %8545 = vmatpush1.bf16.msra.mxu0 %v10598_v16 }
 0x3a4   : > { %8546 = vmatprep.subr.bf16.mxu0 %v12897_v34 }
 0x3a5   : > { %8188 = vmatpush1.bf16.msra.mxu1 %v8187_v28  ;;  %v13046_v28 = vld [vmem:[#allocation29_spill] sm:$0xff] }
 0x3a6   : > { %8189 = vmatprep.subr.bf16.mxu1 %v12897_v34 }
 0x3a7   : > { %8548 = vmatpush1.bf16.msra.mxu0 %v10610_v37 }
 0x3a8   : > { %8576 = vmatprep.subr.bf16.mxu0 %v12897_v34 }
 0x3a9   : > { %8191 = vmatpush1.bf16.msra.mxu1 %v8190_v12  ;;  %v13051_v12 = vld [vmem:[#allocation4_spill] sm:$0xff] }
 0x3aa   : > { %4586 = vmatmul.mubr.f32.vlgmr.msra.gmra.mrb[18].mxu0 %v10498_v35  ;;  %8192 = vmatprep.subr.bf16.mxu1 %v12897_v34 }
 0x3ab   : > { %4591 = vmatprep.mubr.f32.mxu0 %v10502_v29 }
 0x3ad   : > { %8194 = vmatpush1.bf16.msra.mxu1 %v8193_v61 }
 0x3ae   : > { %4593 = vmatmul.mubr.f32.gmra.mrb[20].mxu0 %v10525_v33  ;;  %8195 = vmatprep.subr.bf16.mxu1 %v12897_v34 }
 0x3b1   : > { %8197 = vmatpush1.bf16.msra.mxu1 %v8196_v14 }
 0x3b2   : > { %8198 = vmatprep.subr.bf16.mxu1 %v12897_v34 }
 0x3b4   : > { %2968 = vmatmul.mubr.f32.vlgmr.msra.gmra.mrb[18].mxu1 %v10082_v47 }
 0x3b5   : > { %2973 = vmatprep.mubr.f32.mxu1 %v10086_v52  ;;  %8200 = vmatpush1.bf16.msra.mxu1 %v12974_v60  ;;  %v8304_v60 = vpack.c.bf16 %v13034_v43, %v13033_v56 }
 0x3b6   : > { %8201 = vmatprep.subr.bf16.mxu1 %v12897_v34 }
 0x3b8   : > { %2975 = vmatmul.mubr.f32.gmra.mrb[20].mxu1 %v10097_v45 }
 0x3b9   : > { %8203 = vmatpush1.bf16.msra.mxu1 %v12980_v23  ;;  %3063 = vmatprep.mubr.f32.mxu1 %v13026_v57  ;;  %v13047_v23 = vld [vmem:[#allocation33_spill] sm:$0xff]  ;;  %v13049_v57 = vld [vmem:[#allocation43_spill] sm:$0xff] }
 0x3ba   : > { %8204 = vmatprep.subr.bf16.mxu1 %v12897_v34  ;;  %v13050_v39 = vand.u32 4294901760, %v13049_v57 }
 0x3bc   : > { %v3167_v50 = vsub.f32 %v13049_v57, %v13050_v39 }
 0x3bd   : > { %8206 = vmatpush1.bf16.msra.mxu1 %v12984_v54  ;;  %v13048_v54 = vld [vmem:[#allocation39_spill] sm:$0xff] }
 0x3be   : > { %8207 = vmatprep.subr.bf16.mxu1 %v12897_v34 }
 0x3c1   : > { %8209 = vmatpush1.bf16.msra.mxu1 %v13045_v11  ;;  %v13058_v11 = vld [vmem:[#allocation30_spill] sm:$0xff] }
 0x3c2   : > { %8210 = vmatprep.subr.bf16.mxu1 %v12897_v34 }
 0x3c5   : > { %8212 = vmatpush1.bf16.msra.mxu1 %v13046_v28  ;;  %v13059_v28 = vld [vmem:[#allocation42_spill] sm:$0xff] }
 0x3c6   : > { %8213 = vmatprep.subr.bf16.mxu1 %v12897_v34 }
 0x3c9   : > { %8215 = vmatpush1.bf16.msra.mxu1 %v13047_v23  ;;  %v13060_v23 = vand.u32 4294901760, %v13059_v28 }
 0x3ca   : > { %8216 = vmatprep.subr.bf16.mxu1 %v12897_v34 }
 0x3cd   : > { %8218 = vmatpush1.bf16.msra.mxu1 %v13004_v15  ;;  %v3168_v15 = vand.u32 4294901760, %v3167_v50  ;;  %v13061_v50 = vld [vmem:[#allocation47_spill] sm:$0xff] }
 0x3ce   : > { %8219 = vmatprep.subr.bf16.mxu1 %v12897_v34 }
 0x3d1   : > { %8221 = vmatpush1.bf16.msra.mxu1 %v13011_v8  ;;  %v13052_v8 = vld [vmem:[#allocation8_spill] sm:$0xff] }
 0x3d2   : > { %8222 = vmatprep.subr.bf16.mxu1 %v12897_v34 }
 0x3d5   : > { %8224 = vmatpush1.bf16.msra.mxu1 %v13048_v54  ;;  %v3173_v54 = vsub.f32 %v13059_v28, %v13060_v23  ;;  %v13066_v23 = vld [vmem:[#allocation51_spill] sm:$0xff] }
 0x3d6   : > { %8225 = vmatprep.subr.bf16.mxu1 %v12897_v34 }
 0x3d8   : > { %3065 = vmatmul.mubr.f32.vlgmr.msra.gmra.mrb[22].mxu1 %v10082_v47  ;;  %v13055_v47 = vld [vmem:[#allocation20_spill] sm:$0xff] }
 0x3d9   : > { %3070 = vmatprep.mubr.f32.mxu1 %v10086_v52  ;;  %8227 = vmatpush1.bf16.msra.mxu1 %v13051_v12  ;;  %v13062_v12 = vand.u32 4294901760, %v13061_v50 }
 0x3da   : > { %8228 = vmatprep.subr.bf16.mxu1 %v12897_v34 }
 0x3dc   : > { %3072 = vmatmul.mubr.f32.gmra.mrb[24].mxu1 %v10097_v45  ;;  %v13056_v45 = vld [vmem:[#allocation22_spill] sm:$0xff] }
 0x3dd   : > { %8230 = vmatpush1.bf16.msra.mxu1 %v13052_v8  ;;  %3169 = vmatprep.mubr.f32.mxu1 %v3168_v15  ;;  %v3182_v15 = vsub.f32 %v13061_v50, %v13062_v12  ;;  %v13067_v12 = vld [vmem:[#allocation16_spill] sm:$0xff] }
 0x3de   : > { %8231 = vmatprep.subr.bf16.mxu1 %v12897_v34 }
 0x3e1   : > { %8233 = vmatpush1.bf16.msra.mxu1 %v13053_v7  ;;  %v13063_v7 = vld [vmem:[#allocation34_spill] sm:$0xff] }
 0x3e2   : > { %8234 = vmatprep.subr.bf16.mxu1 %v12897_v34 }
 0x3e5   : > { %8236 = vmatpush1.bf16.msra.mxu1 %v13054_v25  ;;  %v3174_v25 = vand.u32 4294901760, %v3173_v54  ;;  %v13068_v54 = vld [vmem:[#allocation41_spill] sm:$0xff] }
 0x3e6   : > { %8237 = vmatprep.subr.bf16.mxu1 %v12897_v34 }
 0x3e9   : > { %8239 = vmatpush1.bf16.msra.mxu1 %v13055_v47  ;;  %v13064_v47 = vld [vmem:[#allocation46_spill] sm:$0xff] }
 0x3ea   : > { %8240 = vmatprep.subr.bf16.mxu1 %v12897_v34 }
 0x3ed   : > { %v10862_v52 = vpop.f32.mrb[2].mxu0  ;;  %8242 = vmatpush1.bf16.msra.mxu1 %v13056_v45  ;;  %v13065_v45 = vand.u32 4294901760, %v13064_v47 }
 0x3ee   : > { %v3575_v61 = vpop.f32.mrb[3].mxu0  ;;  %8243 = vmatprep.subr.bf16.mxu1 %v12897_v34 }
 0x3ef   : > { %v3188_v61 = vsub.f32 %v13064_v47, %v13065_v45 }
 0x3f1   : > { %v10866_v63 = vpop.f32.mrb[4].mxu0  ;;  %8245 = vmatpush1.bf16.msra.mxu1 %v13057_v44  ;;  %v3189_v55 = vand.u32 4294901760, %v3188_v61 }
 0x3f2   : > { %v3586_v14 = vpop.f32.mrb[5].mxu0  ;;  %8246 = vmatprep.subr.bf16.mxu1 %v12897_v34 }
 0x3f3   : > { %v3183_v14 = vand.u32 4294901760, %v3182_v15 }
 0x3f5   : > { %8248 = vmatpush1.bf16.msra.mxu1 %v13058_v11 }
 0x3f6   : > { %8249 = vmatprep.subr.bf16.mxu1 %v12897_v34 }
 0x3f7   : > { %v2435_v39 = vpop.f32.mrb[2].mxu1 }
 0x3f8   : > { %v2437_v8 = vpop.f32.mrb[3].mxu1 }
 0x3f9   : > { %8251 = vmatpush1.bf16.msra.mxu1 %v13063_v7  ;;  %v13069_v8 = vld [vmem:[#allocation21_spill] sm:$0xff] }
 0x3fa   : > { %8252 = vmatprep.subr.bf16.mxu1 %v12897_v34 }
 0x3fb   : > { %v2450_v44 = vpop.f32.mrb[4].mxu1 }
 0x3fc   : > { %3175 = vmatmul.mubr.f32.vlgmr.msra.gmra.mrb[26].mxu1 %v3174_v25  ;;  %v2452_v11 = vpop.f32.mrb[5].mxu1 }
 0x3fd   : > { %3184 = vmatprep.mubr.f32.mxu1 %v3183_v14  ;;  %8254 = vmatpush1.bf16.msra.mxu1 %v13066_v23  ;;  %v13070_v11 = vld [vmem:[#allocation40_spill] sm:$0xff] }
 0x3fe   : > { %8255 = vmatprep.subr.bf16.mxu1 %v12897_v34 }
 0x400   : > { %3190 = vmatmul.mubr.f32.gmra.mrb[28].mxu1 %v3189_v55 }
 0x401   : > { %8257 = vmatpush1.bf16.msra.mxu1 %v13067_v12  ;;  %3350 = vmatprep.mubr.f32.mxu1 %v13068_v54 }
 0x402   : > { %8258 = vmatprep.subr.bf16.mxu1 %v12897_v34 }
 0x405   : > { %8260 = vmatpush1.bf16.msra.mxu1 %v13069_v8  ;;  %v13076_v8 = vand.u32 4294901760, %v12998_v20  ;;  %v13080_v20 = vand.u32 4294901760, %v13009_v5 }
 0x406   : > { %8261 = vmatprep.subr.bf16.mxu1 %v12897_v34 }
 0x409   : > { %8263 = vmatpush1.bf16.msra.mxu1 %v10696_v6 }
 0x40a   : > { %8264 = vmatprep.subr.bf16.mxu1 %v12897_v34 }
 0x40d   : > { %8266 = vmatpush1.bf16.msra.mxu1 %v10703_v40 }
 0x40e   : > { %8267 = vmatprep.subr.bf16.mxu1 %v12897_v34 }
 0x411   : > { %v10894_v15 = vpop.f32.mrb[6].mxu0  ;;  %8269 = vmatpush1.bf16.msra.mxu1 %v10733_v31 }
 0x412   : > { %v3809_v55 = vpop.f32.mrb[7].mxu0  ;;  %8270 = vmatprep.subr.bf16.mxu1 %v12897_v34 }
 0x415   : > { %v10898_v7 = vpop.f32.mrb[8].mxu0  ;;  %8272 = vmatpush1.bf16.msra.mxu1 %v10756_v38  ;;  %v13071_v38 = vld [vmem:[#allocation45_spill] sm:$0xff] }
 0x416   : > { %v3816_v25 = vpop.f32.mrb[9].mxu0  ;;  %8273 = vmatprep.subr.bf16.mxu1 %v12897_v34 }
 0x419   : > { %8275 = vmatpush1.bf16.msra.mxu1 %v10765_v27  ;;  %v13072_v27 = vld [vmem:[#allocation44_spill] sm:$0xff] }
 0x41a   : > { %8276 = vmatprep.subr.bf16.mxu1 %v12897_v34 }
 0x41b   : > { %v2612_v6 = vpop.f32.mrb[6].mxu1 }
 0x41c   : > { %v2613_v40 = vadd.f32 %v2612_v6, %v2435_v39  ;;  %v2614_v45 = vpop.f32.mrb[7].mxu1  ;;  %v13085_v6 = vand.u32 4294901760, %v13024_v13  ;;  %v13089_v13 = vand.u32 4294901760, %v13034_v43  ;;  %v13093_v43 = vld [vmem:[#allocation74_spill] sm:$0xff] }
 0x41d   : > { %8278 = vmatpush1.bf16.msra.mxu1 %v10784_v1  ;;  %v13088_v45 = vand.u32 4294901760, %v13030_v41 }
 0x41e   : > { %8279 = vmatprep.subr.bf16.mxu1 %v12897_v34 }
 0x41f   : > { %v2619_v31 = vpop.f32.mrb[8].mxu1 }
 0x420   : > { %v2620_v61 = vadd.f32 %v2619_v31, %v2450_v44  ;;  %v2621_v14 = vpop.f32.mrb[9].mxu1  ;;  %3352 = vmatmul.mubr.f32.vlgmr.msra.gmra.mrb[30].mxu1 %v13070_v11 }
 0x421   : > { %3357 = vmatprep.mubr.f32.mxu1 %v13071_v38  ;;  %8281 = vmatpush1.bf16.msra.mxu1 %v8280_v62 }
 0x422   : > { %8282 = vmatprep.subr.bf16.mxu1 %v12897_v34 }
 0x424   : > { %3359 = vmatmul.mubr.f32.gmra.mrb[32].mxu1 %v13072_v27 }
 0x425   : > { %8284 = vmatpush1.bf16.msra.mxu1 %v8283_v46  ;;  %3466 = vmatprep.mubr.f32.mxu1 %v13049_v57  ;;  %v13073_v57 = vand.u32 4294901760, %v12991_v49  ;;  %v13077_v49 = vand.u32 4294901760, %v13000_v9  ;;  %v13084_v9 = vand.u32 4294901760, %v13019_v36  ;;  %v13087_v36 = vand.u32 4294901760, %v13029_v59 }
 0x426   : > { %8285 = vmatprep.subr.bf16.mxu1 %v12897_v34 }
 0x427   : > { %v8355_v31 = vpack.c.bf16 %v13088_v45, %v13087_v36  ;;  %v13109_v36 = vld [vmem:[#allocation61_spill] sm:$0xff]  ;;  %v13110_v45 = vld [vmem:[#allocation62_spill] sm:$0xff] }
 0x429   : > { %8287 = vmatpush1.bf16.msra.mxu1 %v8286_v53 }
 0x42a   : > { %8288 = vmatprep.subr.bf16.mxu1 %v12897_v34 }
 0x42d   : > { %8290 = vmatpush1.bf16.msra.mxu1 %v8289_v17 }
 0x42e   : > { %8291 = vmatprep.subr.bf16.mxu1 %v12897_v34 }
 0x431   : > { %8293 = vmatpush1.bf16.msra.mxu1 %v8292_v19 }
 0x432   : > { %8294 = vmatprep.subr.bf16.mxu1 %v12897_v34 }
 0x435   : > { %v10930_v62 = vpop.f32.mrb[10].mxu0  ;;  %8296 = vmatpush1.bf16.msra.mxu1 %v8295_v2 }
 0x436   : > { %v4135_v1 = vpop.f32.mrb[11].mxu0  ;;  %8297 = vmatprep.subr.bf16.mxu1 %v12897_v34 }
 0x439   : > { %v10936_v46 = vpop.f32.mrb[12].mxu0  ;;  %8299 = vmatpush1.bf16.msra.mxu1 %v8298_v10  ;;  %v13074_v10 = vand.u32 4294901760, %v12992_v48  ;;  %v13078_v48 = vand.u32 4294901760, %v13001_v58  ;;  %v13083_v58 = vand.u32 4294901760, %v13018_v22 }
 0x43a   : > { %v4142_v53 = vpop.f32.mrb[13].mxu0  ;;  %8300 = vmatprep.subr.bf16.mxu1 %v12897_v34 }
 0x43b   : > { %v8334_v39 = vpack.c.bf16 %v13074_v10, %v13073_v57  ;;  %v8349_v25 = vpack.c.bf16 %v13084_v9, %v13083_v58  ;;  %v13090_v53 = vld [vmem:[#allocation73_spill] sm:$0xff]  ;;  %v13104_v58 = vld [vmem:[#allocation55_spill] sm:$0xff] }
 0x43c   : > { %v13091_v41 = vand.u32 4294901760, %v13090_v53 }
 0x43d   : > { %8302 = vmatpush1.bf16.msra.mxu1 %v8301_v21  ;;  %v13075_v21 = vand.u32 4294901760, %v12997_v26  ;;  %v13079_v26 = vand.u32 4294901760, %v13008_v3 }
 0x43e   : > { %8303 = vmatprep.subr.bf16.mxu1 %v12897_v34 }
 0x43f   : > { %v2729_v17 = vpop.f32.mrb[10].mxu1 }
 0x440   : > { %v2730_v19 = vadd.f32 %v2729_v17, %v2613_v40  ;;  %v2731_v2 = vpop.f32.mrb[11].mxu1  ;;  %v3947_v17 = vsub.f32 %v13090_v53, %v13091_v41  ;;  %v13116_v41 = vld [vmem:[#allocation69_spill] sm:$0xff] }
 0x441   : > { %8305 = vmatpush1.bf16.msra.mxu1 %v8304_v60  ;;  %v8337_v60 = vpack.c.bf16 %v13076_v8, %v13075_v21 }
 0x442   : > { %8333 = vmatprep.subr.bf16.mxu1 %v12897_v34  ;;  %v3948_v56 = vand.u32 4294901760, %v3947_v17 }
 0x443   : > { %v2738_v44 = vpop.f32.mrb[12].mxu1 }
 0x444   : > { %v2739_v23 = vadd.f32 %v2738_v44, %v2620_v61  ;;  %v2740_v12 = vpop.f32.mrb[13].mxu1  ;;  %3469 = vmatmul.mubr.f32.vlgmr.msra.gmra.mrb[34].mxu1 %v13059_v28  ;;  %v8340_v28 = vpack.c.bf16 %v13078_v48, %v13077_v49 }
 0x445   : > { %3475 = vmatprep.mubr.f32.mxu1 %v13061_v50  ;;  %8335 = vmatpush1.bf16.msra.mxu1 %v8334_v39  ;;  %v8343_v50 = vpack.c.bf16 %v13080_v20, %v13079_v26 }
 0x446   : > { %8336 = vmatprep.subr.bf16.mxu1 %v12897_v34 }
 0x448   : > { %3478 = vmatmul.mubr.f32.gmra.mrb[36].mxu1 %v13064_v47  ;;  %v13081_v47 = vand.u32 4294901760, %v13012_v4  ;;  %v13086_v4 = vand.u32 4294901760, %v13025_v0  ;;  %v8358_v0 = vpack.c.bf16 %v13089_v13, %v3310_v42  ;;  %v13092_v42 = vld [vmem:[#allocation72_spill] sm:$0xff]  ;;  %v13111_v13 = vld [vmem:[#allocation63_spill] sm:$0xff] }
 0x449   : > { %8338 = vmatpush1.bf16.msra.mxu1 %v8337_v60  ;;  %3707 = vmatprep.mubr.f32.mxu1 %v13068_v54  ;;  %v13082_v54 = vand.u32 4294901760, %v13013_v32  ;;  %v13100_v60 = vld [vmem:[#allocation53_spill] sm:$0xff] }
 0x44a   : > { %8339 = vmatprep.subr.bf16.mxu1 %v12897_v34  ;;  %v8352_v32 = vpack.c.bf16 %v13086_v4, %v13085_v6  ;;  %v13107_v4 = vld [vmem:[#allocation59_spill] sm:$0xff] }
 0x44b   : > { %v8346_v55 = vpack.c.bf16 %v13082_v54, %v13081_v47 }
 0x44d   : > { %8341 = vmatpush1.bf16.msra.mxu1 %v8340_v28 }
 0x44e   : > { %8342 = vmatprep.subr.bf16.mxu1 %v12897_v34 }
 0x451   : > { %8344 = vmatpush1.bf16.msra.mxu1 %v8343_v50 }
 0x452   : > { %8345 = vmatprep.subr.bf16.mxu1 %v12897_v34 }
 0x455   : > { %8347 = vmatpush1.bf16.msra.mxu1 %v8346_v55  ;;  %v13103_v55 = vld [vmem:[#allocation54_spill] sm:$0xff] }
 0x456   : > { %8348 = vmatprep.subr.bf16.mxu1 %v12897_v34 }
 0x459   : > { %v10983_v5 = vpop.f32.mrb[14].mxu0  ;;  %8350 = vmatpush1.bf16.msra.mxu1 %v8349_v25  ;;  %v13105_v25 = vld [vmem:[#allocation57_spill] sm:$0xff] }
 0x45a   : > { %v4355_v3 = vpop.f32.mrb[15].mxu0  ;;  %8351 = vmatprep.subr.bf16.mxu1 %v12897_v34 }
 0x45b   : > { %v13106_v3 = vld [vmem:[#allocation58_spill] sm:$0xff] }
 0x45c   : > { %v8448_v6 = vpack.c.bf16 %v13106_v3, %v13105_v25 }
 0x45d   : > { %v10990_v40 = vpop.f32.mrb[16].mxu0  ;;  %8353 = vmatpush1.bf16.msra.mxu1 %v8352_v32  ;;  %v13108_v32 = vld [vmem:[#allocation60_spill] sm:$0xff] }
 0x45e   : > { %v4366_v22 = vpop.f32.mrb[17].mxu0  ;;  %8354 = vmatprep.subr.bf16.mxu1 %v12897_v34 }
 0x45f   : > { %v8451_v22 = vpack.c.bf16 %v13108_v32, %v13107_v4 }
 0x461   : > { %8356 = vmatpush1.bf16.msra.mxu1 %v8355_v31  ;;  %v8454_v31 = vpack.c.bf16 %v13110_v45, %v13109_v36 }
 0x462   : > { %8357 = vmatprep.subr.bf16.mxu1 %v12897_v34 }
 0x463   : > { %v2832_v61 = vpop.f32.mrb[14].mxu1 }
 0x464   : > { %v2833_v14 = vadd.f32 %v2832_v61, %v2730_v19  ;;  %v2834_v1 = vpop.f32.mrb[15].mxu1 }
 0x465   : > { %8359 = vmatpush1.bf16.msra.mxu1 %v8358_v0  ;;  %v13112_v0 = vld [vmem:[#allocation64_spill] sm:$0xff]  ;;  %v13114_v1 = vld [vmem:[#allocation67_spill] sm:$0xff] }
 0x466   : > { %8387 = vmatprep.subr.bf16.mxu1 %v12897_v34  ;;  %v8457_v61 = vpack.c.bf16 %v13112_v0, %v13111_v13 }
 0x467   : > { %v2843_v59 = vpop.f32.mrb[16].mxu1 }
 0x468   : > { %v2844_v2 = vadd.f32 %v2843_v59, %v2739_v23  ;;  %v2845_v57 = vpop.f32.mrb[17].mxu1  ;;  %3709 = vmatmul.mubr.f32.vlgmr.msra.gmra.mrb[38].mxu1 %v13070_v11  ;;  %v13094_v11 = vld [vmem:[#allocation49_spill] sm:$0xff] }
 0x469   : > { %3714 = vmatprep.mubr.f32.mxu1 %v13071_v38  ;;  %8389 = vmatpush1.bf16.msra.mxu1 %v13092_v42  ;;  %v13118_v57 = vld [vmem:[#allocation71_spill] sm:$0xff] }
 0x46a   : > { %8390 = vmatprep.subr.bf16.mxu1 %v12897_v34 }
 0x46c   : > { %3716 = vmatmul.mubr.f32.gmra.mrb[40].mxu1 %v13072_v27 }
 0x46d   : > { %8392 = vmatpush1.bf16.msra.mxu1 %v13093_v43  ;;  %3949 = vmatprep.mubr.f32.mxu1 %v3948_v56 }
 0x46e   : > { %8393 = vmatprep.subr.bf16.mxu1 %v12897_v34 }
 0x471   : > { %8395 = vmatpush1.bf16.msra.mxu1 %v10540_v51 }
 0x472   : > { %8396 = vmatprep.subr.bf16.mxu1 %v12897_v34 }
 0x475   : > { %8398 = vmatpush1.bf16.msra.mxu1 %v10553_v24  ;;  %v13095_v24 = vld [vmem:[#allocation50_spill] sm:$0xff] }
 0x476   : > { %8399 = vmatprep.subr.bf16.mxu1 %v12897_v34  ;;  %v13096_v10 = vand.u32 4294901760, %v13095_v24 }
 0x478   : > { %v3953_v39 = vsub.f32 %v13095_v24, %v13096_v10 }
 0x479   : > { %8401 = vmatpush1.bf16.msra.mxu1 %v13094_v11 }
 0x47a   : > { %8402 = vmatprep.subr.bf16.mxu1 %v12897_v34  ;;  %v3954_v48 = vand.u32 4294901760, %v3953_v39 }
 0x47d   : > { %v11019_v38 = vpop.f32.mrb[18].mxu0  ;;  %8404 = vmatpush1.bf16.msra.mxu1 %v10578_v30  ;;  %v13097_v30 = vld [vmem:[#allocation12_spill] sm:$0xff] }
 0x47e   : > { %v4589_v27 = vpop.f32.mrb[19].mxu0  ;;  %8405 = vmatprep.subr.bf16.mxu1 %v12897_v34  ;;  %v13098_v23 = vand.u32 4294901760, %v13097_v30 }
 0x480   : > { %v3962_v12 = vsub.f32 %v13097_v30, %v13098_v23 }
 0x481   : > { %v11023_v19 = vpop.f32.mrb[20].mxu0  ;;  %8407 = vmatpush1.bf16.msra.mxu1 %v10588_v18  ;;  %v13099_v18 = vld [vmem:[#allocation52_spill] sm:$0xff] }
 0x482   : > { %v4596_v51 = vpop.f32.mrb[21].mxu0  ;;  %8408 = vmatprep.subr.bf16.mxu1 %v12897_v34  ;;  %v8442_v49 = vpack.c.bf16 %v13100_v60, %v13099_v18  ;;  %v3963_v50 = vand.u32 4294901760, %v3962_v12  ;;  %v13119_v27 = vand.u32 4294901760, %v13099_v18  ;;  %v13121_v12 = vand.u32 4294901760, %v13103_v55  ;;  %v13123_v18 = vld [vmem:[#allocation65_spill] sm:$0xff] }
 0x483   : > { %v13120_v51 = vand.u32 4294901760, %v13100_v60  ;;  %v13124_v60 = vand.u32 4294901760, %v13105_v25  ;;  %v13135_v25 = vand.u32 4294901760, %v13116_v41 }
 0x485   : > { %8410 = vmatpush1.bf16.msra.mxu1 %v10598_v16  ;;  %v13101_v16 = vld [vmem:[#allocation56_spill] sm:$0xff]  ;;  %v8496_v10 = vpack.c.bf16 %v13120_v51, %v13119_v27  ;;  %v7157_v51 = vld [vmem:[%s12631_s5 + $0xa0] sm:$0xff] }
 0x486   : > { %8411 = vmatprep.subr.bf16.mxu1 %v12897_v34  ;;  %v13102_v28 = vand.u32 4294901760, %v13101_v16 }
 0x487   : > { %v2969_v44 = vpop.f32.mrb[18].mxu1 }
 0x488   : > { %v2970_v21 = vadd.f32 %v2969_v44, %v2833_v14  ;;  %v2971_v8 = vpop.f32.mrb[19].mxu1  ;;  %v3968_v26 = vsub.f32 %v13101_v16, %v13102_v28  ;;  %v13113_v14 = vld [vmem:[#allocation66_spill] sm:$0xff] }
 0x489   : > { %8413 = vmatpush1.bf16.msra.mxu1 %v10610_v37  ;;  %v8445_v37 = vpack.c.bf16 %v13104_v58, %v13103_v55  ;;  %v8460_v59 = vpack.c.bf16 %v13114_v1, %v13113_v14  ;;  %v13132_v55 = vand.u32 4294901760, %v13113_v14 }
 0x48a   : > { %8441 = vmatprep.subr.bf16.mxu1 %v12897_v34  ;;  %v3969_v9 = vand.u32 4294901760, %v3968_v26  ;;  %v13129_v26 = vand.u32 4294901760, %v13110_v45 }
 0x48b   : > { %v2976_v20 = vpop.f32.mrb[20].mxu1 }
 0x48c   : > { %v2977_v47 = vadd.f32 %v2976_v20, %v2844_v2  ;;  %v2978_v54 = vpop.f32.mrb[21].mxu1  ;;  %3955 = vmatmul.mubr.f32.vlgmr.msra.gmra.mrb[42].mxu1 %v3954_v48  ;;  %v13117_v2 = vld [vmem:[#allocation70_spill] sm:$0xff]  ;;  %v13127_v48 = vand.u32 4294901760, %v13108_v32 }
 0x48d   : > { %3964 = vmatprep.mubr.f32.mxu1 %v3963_v50  ;;  %8443 = vmatpush1.bf16.msra.mxu1 %v8442_v49  ;;  %v8466_v42 = vpack.c.bf16 %v13118_v57, %v13117_v2  ;;  %v13125_v49 = vand.u32 4294901760, %v13106_v3  ;;  %v13130_v50 = vand.u32 4294901760, %v13111_v13 }
 0x48e   : > { %8444 = vmatprep.subr.bf16.mxu1 %v12897_v34 }
 0x490   : > { %3970 = vmatmul.mubr.f32.gmra.mrb[44].mxu1 %v3969_v9 }
 0x491   : > { %8446 = vmatpush1.bf16.msra.mxu1 %v8445_v37  ;;  %4246 = vmatprep.mubr.f32.mxu1 %v13090_v53  ;;  %v13115_v53 = vld [vmem:[#allocation68_spill] sm:$0xff] }
 0x492   : > { %8447 = vmatprep.subr.bf16.mxu1 %v12897_v34  ;;  %v8463_v17 = vpack.c.bf16 %v13116_v41, %v13115_v53  ;;  %v13134_v9 = vand.u32 4294901760, %v13115_v53 }
 0x494   : > { %v8517_v3 = vpack.c.bf16 %v13135_v25, %v13134_v9 }
 0x495   : > { %8449 = vmatpush1.bf16.msra.mxu1 %v8448_v6  ;;  %v13136_v6 = vand.u32 4294901760, %v13117_v2 }
 0x496   : > { %8450 = vmatprep.subr.bf16.mxu1 %v12897_v34 }
 0x499   : > { %8452 = vmatpush1.bf16.msra.mxu1 %v8451_v22 }
 0x49a   : > { %8453 = vmatprep.subr.bf16.mxu1 %v12897_v34 }
 0x49d   : > { %8455 = vmatpush1.bf16.msra.mxu1 %v8454_v31 }
 0x49e   : > { %8456 = vmatprep.subr.bf16.mxu1 %v12897_v34 }
 0x4a1   : > { %8458 = vmatpush1.bf16.msra.mxu1 %v8457_v61 }
 0x4a2   : > { %8459 = vmatprep.subr.bf16.mxu1 %v12897_v34 }
 0x4a5   : > { %8461 = vmatpush1.bf16.msra.mxu1 %v8460_v59 }
 0x4a6   : > { %8462 = vmatprep.subr.bf16.mxu1 %v12897_v34 }
 0x4a9   : > { %8464 = vmatpush1.bf16.msra.mxu1 %v8463_v17 }
 0x4aa   : > { %8465 = vmatprep.subr.bf16.mxu1 %v12897_v34 }
 0x4ab   : > { %v3066_v56 = vpop.f32.mrb[22].mxu1 }
 0x4ac   : > { %v3067_v43 = vadd.f32 %v3066_v56, %v2970_v21  ;;  %v3068_v11 = vpop.f32.mrb[23].mxu1  ;;  %v13122_v21 = vand.u32 4294901760, %v13104_v58  ;;  %v13133_v58 = vand.u32 4294901760, %v13114_v1 }
 0x4ad   : > { %8467 = vmatpush1.bf16.msra.mxu1 %v8466_v42 }
 0x4ae   : > { %8495 = vmatprep.subr.bf16.mxu1 %v12897_v34  ;;  %v8499_v8 = vpack.c.bf16 %v13122_v21, %v13121_v12  ;;  %v8514_v37 = vpack.c.bf16 %v13133_v58, %v13132_v55  ;;  %v11137_v12 = vld [vmem:[%s12631_s5 + $0xb0] sm:$0xff]  ;;  %v11170_v58 = vld [vmem:[%s12631_s5 + $0xc0] sm:$0xff] }
 0x4af   : > { %v3073_v39 = vpop.f32.mrb[24].mxu1 }
 0x4b0   : > { %v3074_v44 = vadd.f32 %v3073_v39, %v2977_v47  ;;  %v3075_v23 = vpop.f32.mrb[25].mxu1  ;;  %4249 = vmatmul.mubr.f32.vlgmr.msra.gmra.mrb[46].mxu1 %v13095_v24  ;;  %v8502_v24 = vpack.c.bf16 %v13125_v49, %v13124_v60  ;;  %v13131_v47 = vand.u32 4294901760, %v13112_v0 }
 0x4b1   : > { %4255 = vmatprep.mubr.f32.mxu1 %v13097_v30  ;;  %8497 = vmatpush1.bf16.msra.mxu1 %v8496_v10  ;;  %v13126_v30 = vand.u32 4294901760, %v13107_v4  ;;  %v13137_v4 = vand.u32 4294901760, %v13118_v57  ;;  %v4707_v23 = vand.u32 4294901760, %v7157_v51 }
 0x4b2   : > { %8498 = vmatprep.subr.bf16.mxu1 %v12897_v34  ;;  %v8511_v54 = vpack.c.bf16 %v13131_v47, %v13130_v50 }
 0x4b3   : > { %v8505_v28 = vpack.c.bf16 %v13127_v48, %v13126_v30  ;;  %v8520_v32 = vpack.c.bf16 %v13137_v4, %v13136_v6  ;;  %v11152_v30 = vsub.f32 %v7157_v51, %v4707_v23  ;;  %v11185_v6 = vld [vmem:[%s12631_s5 + $0xc8] sm:$0xff] }
 0x4b4   : > { %4258 = vmatmul.mubr.f32.gmra.mrb[48].mxu1 %v13101_v16  ;;  %v13128_v16 = vand.u32 4294901760, %v13109_v36 }
 0x4b5   : > { %8500 = vmatpush1.bf16.msra.mxu1 %v8499_v8  ;;  %4487 = vmatprep.mubr.f32.mxu1 %v13123_v18  ;;  %v11142_v8 = vld [vmem:[%s12631_s5 + $0xb8] sm:$0xff]  ;;  %v4713_v18 = vand.u32 4294901760, %v11137_v12  ;;  %v4830_v55 = vand.u32 4294901760, %v11152_v30 }
 0x4b6   : > { %8501 = vmatprep.subr.bf16.mxu1 %v12897_v34  ;;  %v8508_v20 = vpack.c.bf16 %v13129_v26, %v13128_v16  ;;  %v4716_v26 = vand.u32 4294901760, %v11142_v8 }
 0x4b8   : > { %v11178_v25 = vsub.f32 %v11142_v8, %v4716_v26  ;;  %v7166_v8 = vld [vmem:[%s12631_s5 + $0xe8] sm:$0xff] }
 0x4b9   : > { %8503 = vmatpush1.bf16.msra.mxu1 %v8502_v24 }
 0x4ba   : > { %8504 = vmatprep.subr.bf16.mxu1 %v12897_v34 }
 0x4bd   : > { %8506 = vmatpush1.bf16.msra.mxu1 %v8505_v28 }
 0x4be   : > { %8507 = vmatprep.subr.bf16.mxu1 %v12897_v34 }
 0x4c1   : > { %8509 = vmatpush1.bf16.msra.mxu1 %v8508_v20  ;;  %v11162_v20 = vsub.f32 %v11137_v12, %v4713_v18  ;;  %v7165_v12 = vld [vmem:[%s12631_s5 + $0xe0] sm:$0xff] }
 0x4c2   : > { %8510 = vmatprep.subr.bf16.mxu1 %v12897_v34 }
 0x4c3   : > { %v4844_v9 = vand.u32 4294901760, %v11162_v20 }
 0x4c5   : > { %8512 = vmatpush1.bf16.msra.mxu1 %v8511_v54 }
 0x4c6   : > { %8513 = vmatprep.subr.bf16.mxu1 %v12897_v34 }
 0x4c9   : > { %8515 = vmatpush1.bf16.msra.mxu1 %v8514_v37 }
 0x4ca   : > { %8516 = vmatprep.subr.bf16.mxu1 %v12897_v34 }
 0x4cd   : > { %8518 = vmatpush1.bf16.msra.mxu1 %v8517_v3 }
 0x4ce   : > { %8519 = vmatprep.subr.bf16.mxu1 %v12897_v34 }
 0x4cf   : > { %v3176_v22 = vpop.f32.mrb[26].mxu1 }
 0x4d0   : > { %v3177_v36 = vadd.f32 %v3176_v22, %v3067_v43  ;;  %v3178_v45 = vpop.f32.mrb[27].mxu1 }
 0x4d1   : > { %8521 = vmatpush1.bf16.msra.mxu1 %v8520_v32 }
 0x4d2   : > { %8549 = vmatprep.subr.bf16.mxu1 %v12897_v34 }
 0x4d3   : > { %v3191_v31 = vpop.f32.mrb[28].mxu1 }
 0x4d4   : > { %v3192_v13 = vadd.f32 %v3191_v31, %v3074_v44  ;;  %v3193_v0 = vpop.f32.mrb[29].mxu1  ;;  %4489 = vmatmul.mubr.f32.vlgmr.msra.gmra.mrb[50].mxu1 %v10498_v35  ;;  %v4851_v31 = vand.u32 4294901760, %v11178_v25 }
 0x4d5   : > { %4494 = vmatprep.mubr.f32.mxu1 %v10502_v29  ;;  %v7155_v29 = vld [vmem:[%s12631_s5 + $0x90] sm:$0xff] }
 0x4d6   : > { %v4701_v39 = vand.u32 4294901760, %v7155_v29 }
 0x4d8   : > { %4496 = vmatmul.mubr.f32.gmra.mrb[52].mxu1 %v10525_v33  ;;  %v7156_v33 = vld [vmem:[%s12631_s5 + $0x98] sm:$0xff]  ;;  %v11148_v49 = vsub.f32 %v7155_v29, %v4701_v39 }
 0x4d9   : > { %v4704_v44 = vand.u32 4294901760, %v7156_v33 }
 0x4da   : > { %v4816_v47 = vand.u32 4294901760, %v11148_v49 }
 0x4db   : > { %v11150_v24 = vsub.f32 %v7156_v33, %v4704_v44  ;;  %v11156_v16 = vpack.c.bf16 %v4704_v44, %v4701_v39 }
 0x4dc   : > { %v4817_v32 = vsub.f32 %v11148_v49, %v4816_v47 }
 0x4dd   : > { %v4823_v54 = vand.u32 4294901760, %v11150_v24  ;;  %8551 = vmatpush1.bf16.msra.mxu1 %v11156_v16 }
 0x4de   : > { %8552 = vmatprep.subr.bf16.mxu1 %v12897_v34  ;;  %v4818_v0 = vand.u32 4294901760, %v4817_v32 }
 0x4df   : > { %v4824_v22 = vsub.f32 %v11150_v24, %v4823_v54 }
 0x4f3   : > { %v3353_v61 = vpop.f32.mrb[30].mxu1 }
 0x4f4   : > { %v3354_v14 = vadd.f32 %v3353_v61, %v3177_v36  ;;  %v3355_v1 = vpop.f32.mrb[31].mxu1  ;;  %v4831_v36 = vsub.f32 %v11152_v30, %v4830_v55  ;;  %v4825_v61 = vand.u32 4294901760, %v4824_v22 }
 0x4f5   : > { %v4722_v1 = vand.u32 4294901760, %v11185_v6 }
 0x4f7   : > { %v3360_v59 = vpop.f32.mrb[32].mxu1 }
 0x4f8   : > { %v3361_v53 = vadd.f32 %v3360_v59, %v3192_v13  ;;  %v3362_v41 = vpop.f32.mrb[33].mxu1  ;;  %v4719_v13 = vand.u32 4294901760, %v11170_v58 }
 0x4fa   : > { %v11216_v41 = vsub.f32 %v11170_v58, %v4719_v13  ;;  %v7167_v58 = vld [vmem:[%s12631_s5 + $0xf0] sm:$0xff] }
 0x517   : > { %v3470_v17 = vpop.f32.mrb[34].mxu1 }
 0x518   : > { %v3471_v2 = vadd.f32 %v3470_v17, %v3354_v14  ;;  %v3472_v57 = vpop.f32.mrb[35].mxu1  ;;  %v4832_v14 = vand.u32 4294901760, %v4831_v36  ;;  %v8577_v17 = vpack.c.bf16 %v4825_v61, %v4818_v0 }
 0x519   : > { %v4858_v57 = vand.u32 4294901760, %v11216_v41 }
 0x51a   : > { %v3574_v42 = vadd.f32 %v10862_v52, %v3471_v2  ;;  %v11221_v2 = vsub.f32 %v11185_v6, %v4722_v1  ;;  %8578 = vmatpush1.bf16.msra.mxu0 %v8577_v17  ;;  %v7168_v6 = vld [vmem:[%s12631_s5 + $0xf8] sm:$0xff] }
 0x51b   : > { %v3479_v56 = vpop.f32.mrb[36].mxu1  ;;  %8579 = vmatprep.subr.bf16.mxu0 %v12897_v34 }
 0x51c   : > { %v3480_v43 = vadd.f32 %v3479_v56, %v3361_v53  ;;  %v3481_v11 = vpop.f32.mrb[37].mxu1  ;;  %v4852_v53 = vsub.f32 %v11178_v25, %v4851_v31 }
 0x51d   : > { %v4865_v11 = vand.u32 4294901760, %v11221_v2 }
 0x51e   : > { %v3585_v35 = vadd.f32 %v10866_v63, %v3480_v43  ;;  %v7158_v63 = vld [vmem:[%s12631_s5 + $0xa8] sm:$0xff]  ;;  %v4853_v43 = vand.u32 4294901760, %v4852_v53 }
 0x51f   : > { %v4710_v21 = vand.u32 4294901760, %v7158_v63 }
 0x521   : > { %v11154_v28 = vsub.f32 %v7158_v63, %v4710_v21  ;;  %v11180_v3 = vpack.c.bf16 %v4710_v21, %v4707_v23 }
 0x523   : > { %v4837_v37 = vand.u32 4294901760, %v11154_v28  ;;  %8554 = vmatpush1.bf16.msra.mxu1 %v11180_v3 }
 0x524   : > { %8555 = vmatprep.subr.bf16.mxu1 %v12897_v34 }
 0x525   : > { %v4838_v45 = vsub.f32 %v11154_v28, %v4837_v37 }
 0x527   : > { %v4839_v59 = vand.u32 4294901760, %v4838_v45 }
 0x53b   : > { %v3710_v27 = vpop.f32.mrb[38].mxu1 }
 0x53c   : > { %v3711_v10 = vadd.f32 %v3710_v27, %v3574_v42  ;;  %v3712_v52 = vpop.f32.mrb[39].mxu1  ;;  %v8580_v42 = vpack.c.bf16 %v4839_v59, %v4832_v14  ;;  %v4866_v27 = vsub.f32 %v11221_v2, %v4865_v11 }
 0x53e   : > { %v11146_v60 = vadd.f32 %v10894_v15, %v3711_v10  ;;  %8581 = vmatpush1.bf16.msra.mxu0 %v8580_v42  ;;  %v4867_v51 = vand.u32 4294901760, %v4866_v27 }
 0x53f   : > { %v3717_v48 = vpop.f32.mrb[40].mxu1  ;;  %8582 = vmatprep.subr.bf16.mxu0 %v12897_v34 }
 0x540   : > { %v3718_v15 = vadd.f32 %v3717_v48, %v3585_v35  ;;  %v3719_v50 = vpop.f32.mrb[41].mxu1  ;;  %v4859_v35 = vsub.f32 %v11216_v41, %v4858_v57 }
 0x542   : > { %v11188_v4 = vadd.f32 %v10898_v7, %v3718_v15  ;;  %v4845_v7 = vsub.f32 %v11162_v20, %v4844_v9  ;;  %v4860_v33 = vand.u32 4294901760, %v4859_v35 }
 0x544   : > { %v4846_v56 = vand.u32 4294901760, %v4845_v7  ;;  %v8586_v10 = vpack.c.bf16 %v4867_v51, %v4860_v33  ;;  %v4731_v33 = vand.u32 4294901760, %v7165_v12  ;;  %v4734_v51 = vand.u32 4294901760, %v7166_v8 }
 0x546   : > { %v8583_v29 = vpack.c.bf16 %v4853_v43, %v4846_v56  ;;  %v7154_v43 = vld [vmem:[%s12630_s4] ss:$0 sm:$0xff] }
 0x548   : > { %8584 = vmatpush1.bf16.msra.mxu0 %v8583_v29  ;;  %v11275_v29 = vpack.c.bf16 %v4722_v1, %v4719_v13  ;;  %v11293_v13 = vsub.f32 %v7166_v8, %v4734_v51 }
 0x549   : > { %8585 = vmatprep.subr.bf16.mxu0 %v12897_v34 }
 0x54c   : > { %8587 = vmatpush1.bf16.msra.mxu0 %v8586_v10 }
 0x54d   : > { %8588 = vmatprep.subr.bf16.mxu0 %v12897_v34 }
 0x55f   : > { %v3956_v52 = vpop.f32.mrb[42].mxu1 }
 0x560   : > { %v4134_v39 = vadd.f32 %v10930_v62, %v3956_v52  ;;  %v3958_v44 = vpop.f32.mrb[43].mxu1  ;;  %v7163_v62 = vld [vmem:[%s12631_s5 + $0xd0] sm:$0xff] }
 0x561   : > { %v4725_v59 = vand.u32 4294901760, %v7163_v62  ;;  %v4737_v44 = vand.u32 4294901760, %v7167_v58 }
 0x563   : > { %v3971_v63 = vpop.f32.mrb[44].mxu1  ;;  %v11253_v17 = vsub.f32 %v7163_v62, %v4725_v59  ;;  %v11309_v62 = vpack.c.bf16 %v4734_v51, %v4731_v33 }
 0x564   : > { %v4141_v23 = vadd.f32 %v10936_v46, %v3971_v63  ;;  %v3973_v21 = vpop.f32.mrb[45].mxu1  ;;  %v7164_v46 = vld [vmem:[%s12631_s5 + $0xd8] sm:$0xff] }
 0x565   : > { %v4728_v53 = vand.u32 4294901760, %v7164_v46  ;;  %v12817_v35 = vand.u32 4294901760, %v11253_v17 }
 0x567   : > { %v11255_v42 = vsub.f32 %v7164_v46, %v4728_v53  ;;  %v11295_v1 = vpack.c.bf16 %v4728_v53, %v4725_v59 }
 0x569   : > { %v12816_v27 = vand.u32 4294901760, %v11255_v42 }
 0x583   : > { %v4250_v48 = vpop.f32.mrb[46].mxu1 }
 0x584   : > { %v4251_v15 = vadd.f32 %v4250_v48, %v4134_v39  ;;  %v4252_v50 = vpop.f32.mrb[47].mxu1  ;;  %v4880_v39 = vsub.f32 %v11255_v42, %v12816_v27 }
 0x585   : > { %v12814_v50 = vand.u32 4294901760, %v11293_v13 }
 0x586   : > { %v4354_v32 = vadd.f32 %v10983_v5, %v4251_v15  ;;  %v11250_v5 = vpack.c.bf16 %v4716_v26, %v4713_v18  ;;  %v4881_v48 = vand.u32 4294901760, %v4880_v39 }
 0x587   : > { %v4259_v22 = vpop.f32.mrb[48].mxu1 }
 0x588   : > { %v4260_v36 = vadd.f32 %v4259_v22, %v4141_v23  ;;  %v4261_v45 = vpop.f32.mrb[49].mxu1  ;;  %8557 = vmatpush1.bf16.msra.mxu1 %v11250_v5  ;;  %v11301_v22 = vsub.f32 %v7167_v58, %v4737_v44 }
 0x589   : > { %8558 = vmatprep.subr.bf16.mxu1 %v12897_v34 }
 0x58a   : > { %v4365_v7 = vadd.f32 %v10990_v40, %v4260_v36  ;;  %v7169_v36 = vld [vmem:[%s12631_s5 + $0x100] sm:$0xff] }
 0x58c   : > { %8560 = vmatpush1.bf16.msra.mxu1 %v11275_v29 }
 0x58d   : > { %8561 = vmatprep.subr.bf16.mxu1 %v12897_v34 }
 0x590   : > { %8563 = vmatpush1.bf16.msra.mxu1 %v11295_v1 }
 0x591   : > { %8564 = vmatprep.subr.bf16.mxu1 %v12897_v34 }
 0x594   : > { %8566 = vmatpush1.bf16.msra.mxu1 %v11309_v62 }
 0x595   : > { %8567 = vmatprep.subr.bf16.mxu1 %v12897_v34 }
 0x5a7   : > { %v4490_v0 = vpop.f32.mrb[50].mxu1 }
 0x5a8   : > { %v4491_v61 = vadd.f32 %v4490_v0, %v4354_v32  ;;  %v4492_v14 = vpop.f32.mrb[51].mxu1  ;;  %v4740_v32 = vand.u32 4294901760, %v7168_v6 }
 0x5a9   : > { %v12813_v14 = vand.u32 4294901760, %v11301_v22 }
 0x5aa   : > { %v4588_v40 = vadd.f32 %v11019_v38, %v4491_v61  ;;  %v4894_v61 = vsub.f32 %v11293_v13, %v12814_v50  ;;  %v11319_v59 = vsub.f32 %v7168_v6, %v4740_v32 }
 0x5ab   : > { %v4497_v56 = vpop.f32.mrb[52].mxu1 }
 0x5ac   : > { %v4598_v38 = vadd.f32 %v4588_v40, %v11146_v60  ;;  %v4498_v18 = vadd.f32 %v4497_v56, %v4365_v7  ;;  %v4499_v26 = vpop.f32.mrb[53].mxu1  ;;  %v4873_v60 = vsub.f32 %v11253_v17, %v12817_v35  ;;  %v4743_v56 = vand.u32 4294901760, %v7169_v36 }
 0x5ad   : > { %v12812_v26 = vand.u32 4294901760, %v11319_v59  ;;  %v8607_v35 = vpack.c.bf16 %v11154_v28, %v11152_v30  ;;  %v8664_v30 = vpack.c.bf16 %v4851_v31, %v4844_v9  ;;  %v11559_v31 = vld [vmem:[%s12631_s5 + $0x20] sm:$0xff] }
 0x5ae   : > { %v4595_v10 = vadd.f32 %v11023_v19, %v4498_v18  ;;  %v4607_v52 = vadd.f32 %v7154_v43, %v4598_v38  ;;  %v11291_v19 = vsub.f32 %v7165_v12, %v4731_v33  ;;  %v4874_v21 = vand.u32 4294901760, %v4873_v60  ;;  %v7171_v12 = vld [vmem:[%s12631_s5 + $0x110] sm:$0xff]  ;;  %v7172_v33 = vld [vmem:[%s12631_s5 + $0x118] sm:$0xff] }
 0x5af   : > { %v4895_v38 = vand.u32 4294901760, %v4894_v61  ;;  %v4901_v18 = vsub.f32 %v11301_v22, %v12813_v14  ;;  %v11338_v60 = vpack.c.bf16 %v4740_v32, %v4737_v44  ;;  %v4908_v6 = vsub.f32 %v11319_v59, %v12812_v26 }
 0x5b0   : > { %v4599_v63 = vadd.f32 %v4595_v10, %v11188_v4  ;;  %v4609_v23 = vmul.f32 0.01, %v4607_v52  ;;  %v12815_v15 = vand.u32 4294901760, %v11291_v19  ;;  %v7170_v4 = vld [vmem:[%s12631_s5 + $0x108] sm:$0xff]  ;;  %v8589_v0 = vpack.c.bf16 %v4881_v48, %v4874_v21 }
 0x5b1   : > { %v11334_v10 = vsub.f32 %v7169_v36, %v4743_v56  ;;  %v4902_v58 = vand.u32 4294901760, %v4901_v18  ;;  %v4752_v36 = vand.u32 4294901760, %v7172_v33  ;;  %v4909_v44 = vand.u32 4294901760, %v4908_v6  ;;  %8569 = vmatpush1.bf16.msra.mxu1 %v11338_v60 }
 0x5b2   : > { %v4611_v45 = vmax.f32 %v4607_v52, %v4609_v23  ;;  %v4608_v7 = vadd.f32 %v7154_v43, %v4599_v63  ;;  %v4887_v46 = vsub.f32 %v11291_v19, %v12815_v15  ;;  %8590 = vmatpush1.bf16.msra.mxu0 %v8589_v0  ;;  %v4746_v43 = vand.u32 4294901760, %v7170_v4  ;;  %8570 = vmatprep.subr.bf16.mxu1 %v12897_v34 }
 0x5b3   : > { %8591 = vmatprep.subr.bf16.mxu0 %v12897_v34  ;;  %v4749_v63 = vand.u32 4294901760, %v7171_v12  ;;  %v12811_v21 = vand.u32 4294901760, %v11334_v10  ;;  %v8595_v0 = vpack.c.bf16 %v4909_v44, %v4902_v58  ;;  %v11361_v61 = vsub.f32 %v7172_v33, %v4752_v36 }
 0x5b4   : > { %v4615_v53 = vrot.slane %v4611_v45, 7  ;;  %v4610_v40 = vmul.f32 0.01, %v4608_v7  ;;  %v4888_v8 = vand.u32 4294901760, %v4887_v46  ;;  %v11336_v52 = vsub.f32 %v7170_v4, %v4746_v43 }
 0x5b5   : > { %v11347_v32 = vsub.f32 %v7171_v12, %v4749_v63  ;;  %v4915_v45 = vsub.f32 %v11334_v10, %v12811_v21  ;;  %v11364_v12 = vpack.c.bf16 %v4746_v43, %v4743_v56  ;;  %v8616_v58 = vpack.c.bf16 %v11255_v42, %v11253_v17 }
 0x5b6   : > { %4618 = vrot.lane.b32.xlu1 %v4615_v53, %s9094_s20  ;;  %v4612_v51 = vmax.f32 %v4608_v7, %v4610_v40  ;;  %v8592_v39 = vpack.c.bf16 %v4895_v38, %v4888_v8  ;;  %v12810_v48 = vand.u32 4294901760, %v11336_v52  ;;  %v12808_v38 = vand.u32 4294901760, %v11361_v61 }
 0x5b7   : > { %v12809_v46 = vand.u32 4294901760, %v11347_v32  ;;  %8572 = vmatpush1.bf16.msra.mxu1 %v11364_v12  ;;  %v8619_v6 = vpack.c.bf16 %v11293_v13, %v11291_v19  ;;  %v8604_v14 = vpack.c.bf16 %v11150_v24, %v11148_v49  ;;  %v11508_v49 = vld [vmem:[%s12631_s5] sm:$0xff]  ;;  %v11513_v24 = vld [vmem:[%s12631_s5 + $0x8] sm:$0xff] }
 0x5b8   : > { %v4616_v23 = vrot.slane %v4612_v51, 7  ;;  %8593 = vmatpush1.bf16.msra.mxu0 %v8592_v39  ;;  %v4922_v7 = vsub.f32 %v11336_v52, %v12810_v48  ;;  %v4936_v33 = vsub.f32 %v11361_v61, %v12808_v38  ;;  %v11375_v39 = vpack.c.bf16 %v4752_v36, %v4749_v63  ;;  %8573 = vmatprep.subr.bf16.mxu1 %v12897_v34 }
 0x5b9   : > { %8594 = vmatprep.subr.bf16.mxu0 %v12897_v34  ;;  %v4929_v8 = vsub.f32 %v11347_v32, %v12809_v46  ;;  %v8622_v63 = vpack.c.bf16 %v11319_v59, %v11301_v22  ;;  %v8628_v36 = vpack.c.bf16 %v11361_v61, %v11347_v32  ;;  %v5442_v28 = vand.u32 4294901760, %v11508_v49 }
 0x5ba   : > { %4622 = vrot.lane.b32.xlu1 %v4616_v23, %s9094_s20  ;;  %v4617_v4 = vsel %vm2248_vm6, %v4615_v53, %v4616_v23  ;;  %v4916_v53 = vand.u32 4294901760, %v4915_v45  ;;  %v4923_v40 = vand.u32 4294901760, %v4922_v7  ;;  %v4937_v56 = vand.u32 4294901760, %v4936_v33 }
 0x5bb   : > { %4620 = vrot.lane.b32.xlu0 %v4617_v4, %s9094_s20  ;;  %v4930_v51 = vand.u32 4294901760, %v4929_v8  ;;  %8575 = vmatpush1.bf16.msra.mxu1 %v11375_v39  ;;  %v8625_v23 = vpack.c.bf16 %v11336_v52, %v11334_v10 }
 0x5bc   : > { %8596 = vmatpush1.bf16.msra.mxu0 %v8595_v0  ;;  %v8598_v18 = vpack.c.bf16 %v4923_v40, %v4916_v53  ;;  %8603 = vmatprep.subr.bf16.mxu1 %v12897_v34 }
 0x5bd   : > { %8597 = vmatprep.subr.bf16.mxu0 %v12897_v34  ;;  %v8601_v43 = vpack.c.bf16 %v4937_v56, %v4930_v51 }
 0x5c0   : > { %8599 = vmatpush1.bf16.msra.mxu0 %v8598_v18 }
 0x5c1   : > { %8600 = vmatprep.subr.bf16.mxu0 %v12897_v34 }
 0x5c4   : > { %8602 = vmatpush1.bf16.msra.mxu0 %v8601_v43 }
 0x5c5   : > { %8630 = vmatprep.subr.bf16.mxu0 %v12897_v34 }
 0x628   : > { %v4619_v44 = vpop.permute.xlu1 %4618 }
 0x629   : > { %4627 = vst.msk [vmem:[#allocation3] sm:$0xfe] %vm2261_vm9, %v4619_v44 }
 0x62a   : > { %4628 = vst.msk [vmem:[#allocation3 + $0x8] sm:$0xfe] %vm2263_vm10, %v4619_v44 }
 0x62c   : > { %v4623_v4 = vpop.permute.xlu1 %4622 }
 0x62d   : > { %4631 = vst.msk [vmem:[#allocation3 + $0x20] sm:$0x1] %vm2269_vm7, %v4623_v4  ;;  %v4621_v45 = vpop.permute.xlu0 %4620 }
 0x62e   : > { %4632 = vst.msk [vmem:[#allocation3 + $0x28] sm:$0x1] %vm2271_vm8, %v4623_v4 }
 0x62f   : > { %4629 = vst.msk [vmem:[#allocation3 + $0x10] sm:$0xff] %vm2265_vm11, %v4621_v45 }
 0x630   : > { %4630 = vst.msk [vmem:[#allocation3 + $0x18] sm:$0xff] %vm2267_vm12, %v4621_v45  ;;  %v4655_v0 = vld [vmem:[#allocation3] sm:$0xfe] }
 0x631   : > { %v4656_v7 = vld [vmem:[#allocation3 + $0x8] sm:$0xfe]  ;;  %v4684_v44 = vrot.slane %v4655_v0, 1 }
 0x632   : > { %v4687_v56 = vrot.slane %v4656_v7, 1 }
 0x634   : > { %v4657_v40 = vld [vmem:[#allocation3 + $0x20] sm:$0x1] }
 0x635   : > { %v4658_v53 = vld [vmem:[#allocation3 + $0x28] sm:$0x1]  ;;  %v4690_v33 = vrot.slane %v4657_v40, 1 }
 0x636   : > { %v11400_v18 = vld [vmem:[#allocation3 + $0x10] sm:$0xff]  ;;  %v4692_v51 = vrot.slane %v4658_v53, 1 }
 0x637   : > { %v11398_v8 = vld [vmem:[#allocation3 + $0x18] sm:$0xff]  ;;  %v4685_v4 = vrot.slane %v11400_v18, 1 }
 0x638   : > { %v4688_v43 = vrot.slane %v11398_v8, 1 }
 0x639   : > { %v4686_v45 = vsel %vm2324_vm13, %v4684_v44, %v4685_v4  ;;  %v4691_v48 = vsel %vm2324_vm13, %v4685_v4, %v4690_v33 }
 0x63a   : > { %v4689_v38 = vsel %vm2324_vm13, %v4687_v56, %v4688_v43  ;;  %v4693_v46 = vsel %vm2324_vm13, %v4688_v43, %v4692_v51  ;;  %v11409_v26 = vand.u32 4294901760, %v4686_v45  ;;  %v11412_v7 = vand.u32 4294901760, %v4691_v48 }
 0x63b   : > { %v4696_v21 = vsel %vm2239_vm5, %v4689_v38, 0  ;;  %v4698_v53 = vsel %vm2239_vm5, %v4693_v46, 0 }
 0x63c   : > { %v11414_v40 = vand.u32 4294901760, %v4696_v21  ;;  %v11416_v0 = vand.u32 4294901760, %v4698_v53  ;;  %v11419_v56 = vsub.f32 %v4686_v45, %v11409_v26  ;;  %v11422_v44 = vsub.f32 %v4691_v48, %v11412_v7 }
 0x63e   : > { %4968 = vmatprep.mubr.f32.mxu0 %v11414_v40  ;;  %v4783_v38 = vsub.f32 %v4696_v21, %v11414_v40  ;;  %v11427_v51 = vsub.f32 %v4698_v53, %v11416_v0  ;;  %v4790_v46 = vand.u32 4294901760, %v11419_v56  ;;  %v4805_v21 = vand.u32 4294901760, %v11422_v44 }
 0x63f   : > { %4970 = vmatmul.mubr.f32.vlgmr.msra.gmra.mrb[22].mxu0 %v11409_v26 }
 0x640   : > { %8632 = vmatpush1.bf16.msra.mxu0 %v11156_v16  ;;  %4975 = vmatprep.mubr.f32.mxu0 %v11416_v0  ;;  %v4784_v33 = vand.u32 4294901760, %v4783_v38  ;;  %v4799_v43 = vand.u32 4294901760, %v11427_v51  ;;  %v4791_v48 = vsub.f32 %v11419_v56, %v4790_v46  ;;  %v4806_v15 = vsub.f32 %v11422_v44, %v4805_v21 }
 0x641   : > { %8633 = vmatprep.subr.bf16.mxu0 %v12897_v34 }
 0x642   : > { %v4785_v4 = vsub.f32 %v4783_v38, %v4784_v33  ;;  %v4800_v45 = vsub.f32 %v11427_v51, %v4799_v43  ;;  %v4792_v50 = vand.u32 4294901760, %v4791_v48 }
 0x643   : > { %4977 = vmatmul.mubr.f32.gmra.mrb[24].mxu0 %v11412_v7 }
 0x644   : > { %8635 = vmatpush1.bf16.msra.mxu0 %v11180_v3  ;;  %5186 = vmatprep.mubr.f32.mxu0 %v4784_v33  ;;  %v4786_v53 = vand.u32 4294901760, %v4785_v4  ;;  %v4801_v27 = vand.u32 4294901760, %v4800_v45  ;;  %v4807_v33 = vand.u32 4294901760, %v4806_v15  ;;  %v11580_v15 = vld [vmem:[%s12631_s5 + $0x38] sm:$0xff] }
 0x645   : > { %8636 = vmatprep.subr.bf16.mxu0 %v12897_v34 }
 0x646   : > { %4787 = vmatprep.mubr.f32.mxu1 %v4786_v53  ;;  %v13142_v53 = vand.u32 4294901760, %v11301_v22 }
 0x647   : > { %4793 = vmatmul.mubr.f32.vlgmr.msra.gmra.mrb[54].mxu1 %v4792_v50  ;;  %v8610_v50 = vpack.c.bf16 %v11178_v25, %v11162_v20  ;;  %v11535_v20 = vld [vmem:[%s12631_s5 + $0x18] sm:$0xff] }
 0x648   : > { %8605 = vmatpush1.bf16.msra.mxu1 %v8604_v14  ;;  %8638 = vmatpush1.bf16.msra.mxu0 %v11250_v5  ;;  %v5454_v14 = vand.u32 4294901760, %v11559_v31 }
 0x649   : > { %4802 = vmatprep.mubr.f32.mxu1 %v4801_v27  ;;  %8606 = vmatprep.subr.bf16.mxu1 %v12897_v34  ;;  %v8613_v27 = vpack.c.bf16 %v11221_v2, %v11216_v41  ;;  %v11564_v41 = vld [vmem:[%s12631_s5 + $0x28] sm:$0xff]  ;;  %v11569_v2 = vld [vmem:[%s12631_s5 + $0x30] sm:$0xff] }
 0x64a   : > { %8639 = vmatprep.subr.bf16.mxu0 %v12897_v34 }
 0x64b   : > { %4808 = vmatmul.mubr.f32.gmra.mrb[56].mxu1 %v4807_v33  ;;  %v13143_v33 = vand.u32 4294901760, %v11319_v59  ;;  %v11664_v59 = vld [vmem:[%s12631_s5 + $0x50] sm:$0xff] }
 0x64c   : > { %8608 = vmatpush1.bf16.msra.mxu1 %v8607_v35  ;;  %8641 = vmatpush1.bf16.msra.mxu0 %v11275_v29  ;;  %v8658_v35 = vpack.c.bf16 %v4823_v54, %v4816_v47  ;;  %v5445_v47 = vand.u32 4294901760, %v11513_v24  ;;  %v11530_v54 = vld [vmem:[%s12631_s5 + $0x10] sm:$0xff] }
 0x64d   : > { %5084 = vmatprep.mubr.f32.mxu1 %v4783_v38  ;;  %8609 = vmatprep.subr.bf16.mxu1 %v12897_v34  ;;  %v5448_v25 = vand.u32 4294901760, %v11530_v54  ;;  %v11612_v38 = vld [vmem:[%s12631_s5 + $0x40] sm:$0xff] }
 0x64e   : > { %8642 = vmatprep.subr.bf16.mxu0 %v12897_v34  ;;  %v11549_v9 = vsub.f32 %v11513_v24, %v5445_v47  ;;  %v5466_v4 = vand.u32 4294901760, %v11612_v38 }
 0x650   : > { %8611 = vmatpush1.bf16.msra.mxu1 %v8610_v50  ;;  %8644 = vmatpush1.bf16.msra.mxu0 %v11295_v1  ;;  %v8676_v50 = vpack.c.bf16 %v13143_v33, %v13142_v53  ;;  %v5472_v53 = vand.u32 4294901760, %v11664_v59 }
 0x651   : > { %8612 = vmatprep.subr.bf16.mxu1 %v12897_v34  ;;  %8645 = vmatprep.subr.bf16.mxu0 %v12897_v34 }
 0x654   : > { %8614 = vmatpush1.bf16.msra.mxu1 %v8613_v27  ;;  %8647 = vmatpush1.bf16.msra.mxu0 %v11309_v62 }
 0x655   : > { %8615 = vmatprep.subr.bf16.mxu1 %v12897_v34  ;;  %8648 = vmatprep.subr.bf16.mxu0 %v12897_v34 }
 0x658   : > { %8617 = vmatpush1.bf16.msra.mxu1 %v8616_v58  ;;  %8650 = vmatpush1.bf16.msra.mxu0 %v11338_v60  ;;  %v5457_v58 = vand.u32 4294901760, %v11564_v41 }
 0x659   : > { %8618 = vmatprep.subr.bf16.mxu1 %v12897_v34  ;;  %8651 = vmatprep.subr.bf16.mxu0 %v12897_v34 }
 0x65c   : > { %8620 = vmatpush1.bf16.msra.mxu1 %v8619_v6  ;;  %8653 = vmatpush1.bf16.msra.mxu0 %v11364_v12  ;;  %v5463_v6 = vand.u32 4294901760, %v11580_v15 }
 0x65d   : > { %8621 = vmatprep.subr.bf16.mxu1 %v12897_v34  ;;  %8654 = vmatprep.subr.bf16.mxu0 %v12897_v34 }
 0x660   : > { %8623 = vmatpush1.bf16.msra.mxu1 %v8622_v63  ;;  %8656 = vmatpush1.bf16.msra.mxu0 %v11375_v39  ;;  %v13140_v63 = vand.u32 4294901760, %v11291_v19  ;;  %v11617_v19 = vld [vmem:[%s12631_s5 + $0x48] sm:$0xff] }
 0x661   : > { %8624 = vmatprep.subr.bf16.mxu1 %v12897_v34  ;;  %8684 = vmatprep.subr.bf16.mxu0 %v12897_v34  ;;  %v5469_v45 = vand.u32 4294901760, %v11617_v19 }
 0x663   : > { %5190 = vmatmul.mubr.f32.vlgmr.msra.gmra.mrb[26].mxu0 %v4790_v46  ;;  %v11626_v46 = vsub.f32 %v11559_v31, %v5454_v14 }
 0x664   : > { %8626 = vmatpush1.bf16.msra.mxu1 %v8625_v23  ;;  %5197 = vmatprep.mubr.f32.mxu0 %v4799_v43  ;;  %v13141_v23 = vand.u32 4294901760, %v11293_v13  ;;  %v11631_v43 = vsub.f32 %v11564_v41, %v5457_v58 }
 0x665   : > { %8686 = vmatpush1.bf16.msra.mxu0 %v11156_v16  ;;  %8627 = vmatprep.subr.bf16.mxu1 %v12897_v34  ;;  %v8661_v16 = vpack.c.bf16 %v4837_v37, %v4830_v55  ;;  %v8667_v55 = vpack.c.bf16 %v4865_v11, %v4858_v57  ;;  %v11544_v37 = vsub.f32 %v11508_v49, %v5442_v28  ;;  %v13138_v57 = vand.u32 4294901760, %v11253_v17 }
 0x666   : > { %8687 = vmatprep.subr.bf16.mxu0 %v12897_v34  ;;  %v13139_v11 = vand.u32 4294901760, %v11255_v42  ;;  %v11587_v17 = vsub.f32 %v11530_v54, %v5448_v25  ;;  %v12820_v22 = vand.u32 4294901760, %v11631_v43 }
 0x667   : > { %5201 = vmatmul.mubr.f32.gmra.mrb[28].mxu0 %v4805_v21  ;;  %v11643_v21 = vsub.f32 %v11580_v15, %v5463_v6 }
 0x668   : > { %8629 = vmatpush1.bf16.msra.mxu1 %v8628_v36  ;;  %5422 = vmatprep.mubr.f32.mxu0 %v11414_v40  ;;  %v8673_v36 = vpack.c.bf16 %v13141_v23, %v13140_v63  ;;  %v12819_v13 = vand.u32 4294901760, %v11587_v17  ;;  %v11679_v63 = vsub.f32 %v11612_v38, %v5466_v4  ;;  %v11684_v23 = vsub.f32 %v11617_v19, %v5469_v45  ;;  %v4633_v38 = vld [vmem:[#allocation3] sm:$0xff] }
 0x669   : > { %8689 = vmatpush1.bf16.msra.mxu0 %v11180_v3  ;;  %8657 = vmatprep.subr.bf16.mxu1 %v12897_v34  ;;  %v5451_v3 = vand.u32 4294901760, %v11535_v20  ;;  %v5439_v19 = vsel %vm2239_vm5, %v11398_v8, 0 }
 0x66a   : > { %8690 = vmatprep.subr.bf16.mxu0 %v12897_v34 }
 0x66b   : > { %5087 = vmatmul.mubr.f32.vlgmr.msra.gmra.mrb[58].mxu1 %v11419_v56  ;;  %v11592_v42 = vsub.f32 %v11535_v20, %v5451_v3 }
 0x66c   : > { %5093 = vmatprep.mubr.f32.mxu1 %v11427_v51  ;;  %8659 = vmatpush1.bf16.msra.mxu1 %v8658_v35 }
 0x66d   : > { %8692 = vmatpush1.bf16.msra.mxu0 %v11250_v5  ;;  %8660 = vmatprep.subr.bf16.mxu1 %v12897_v34  ;;  %v8670_v5 = vpack.c.bf16 %v13139_v11, %v13138_v57  ;;  %v12818_v51 = vand.u32 4294901760, %v11592_v42 }
 0x66e   : > { %8693 = vmatprep.subr.bf16.mxu0 %v12897_v34 }
 0x66f   : > { %5096 = vmatmul.mubr.f32.gmra.mrb[60].mxu1 %v11422_v44  ;;  %v4634_v44 = vld [vmem:[#allocation3 + $0x8] sm:$0xff] }
 0x670   : > { %8662 = vmatpush1.bf16.msra.mxu1 %v8661_v16  ;;  %5325 = vmatprep.mubr.f32.mxu1 %v11414_v40  ;;  %v5437_v48 = vsel %vm2239_vm5, %v4634_v44, 0  ;;  %v5572_v16 = vsub.f32 %v11587_v17, %v12819_v13 }
 0x671   : > { %8695 = vmatpush1.bf16.msra.mxu0 %v11275_v29  ;;  %8663 = vmatprep.subr.bf16.mxu1 %v12897_v34  ;;  %v12825_v29 = vand.u32 4294901760, %v11544_v37  ;;  %v11672_v57 = vand.u32 4294901760, %v5437_v48 }
 0x672   : > { %8696 = vmatprep.subr.bf16.mxu0 %v12897_v34 }
 0x673   : > { %v5558_v40 = vsub.f32 %v11544_v37, %v12825_v29  ;;  %v11752_v29 = vld [vmem:[%s12631_s5 + $0x70] sm:$0xff] }
 0x674   : > { %8665 = vmatpush1.bf16.msra.mxu1 %v8664_v30  ;;  %v5579_v30 = vsub.f32 %v11592_v42, %v12818_v51  ;;  %v5573_v51 = vand.u32 4294901760, %v5572_v16 }
 0x675   : > { %8698 = vmatpush1.bf16.msra.mxu0 %v11295_v1  ;;  %8666 = vmatprep.subr.bf16.mxu1 %v12897_v34  ;;  %v12824_v1 = vand.u32 4294901760, %v11549_v9  ;;  %v5559_v27 = vand.u32 4294901760, %v5558_v40  ;;  %v13145_v40 = vand.u32 4294901760, %v11336_v52  ;;  %v11703_v52 = vld [vmem:[%s12631_s5 + $0x60] sm:$0xff] }
 0x676   : > { %8699 = vmatprep.subr.bf16.mxu0 %v12897_v34  ;;  %v5580_v13 = vand.u32 4294901760, %v5579_v30  ;;  %v11716_v30 = vsub.f32 %v5437_v48, %v11672_v57  ;;  %v12830_v48 = vand.u32 4294901760, %v11703_v52 }
 0x677   : > { %v5565_v56 = vsub.f32 %v11549_v9, %v12824_v1 }
 0x678   : > { %8668 = vmatpush1.bf16.msra.mxu1 %v8667_v55  ;;  %v12821_v55 = vand.u32 4294901760, %v11626_v46  ;;  %v12828_v1 = vand.u32 4294901760, %v11716_v30 }
 0x679   : > { %8701 = vmatpush1.bf16.msra.mxu0 %v11309_v62  ;;  %8669 = vmatprep.subr.bf16.mxu1 %v12897_v34  ;;  %v5460_v62 = vand.u32 4294901760, %v11569_v2  ;;  %v5566_v35 = vand.u32 4294901760, %v5565_v56 }
 0x67a   : > { %8702 = vmatprep.subr.bf16.mxu0 %v12897_v34 }
 0x67b   : > { %v8739_v44 = vpack.c.bf16 %v5566_v35, %v5559_v27  ;;  %v13146_v27 = vand.u32 4294901760, %v11347_v32  ;;  %v13147_v35 = vand.u32 4294901760, %v11361_v61  ;;  %v11730_v32 = vsub.f32 %v11664_v59, %v5472_v53 }
 0x67c   : > { %8671 = vmatpush1.bf16.msra.mxu1 %v8670_v5  ;;  %v12822_v5 = vand.u32 4294901760, %v11643_v21  ;;  %v13148_v59 = vand.u32 4294901760, %v11703_v52 }
 0x67d   : > { %8704 = vmatpush1.bf16.msra.mxu0 %v11338_v60  ;;  %8672 = vmatprep.subr.bf16.mxu1 %v12897_v34  ;;  %v11637_v60 = vsub.f32 %v11569_v2, %v5460_v62  ;;  %v8682_v16 = vpack.c.bf16 %v13147_v35, %v13146_v27  ;;  %v8742_v35 = vpack.c.bf16 %v5580_v13, %v5573_v51  ;;  %v11757_v13 = vld [vmem:[%s12631_s5 + $0x78] sm:$0xff] }
 0x67e   : > { %8705 = vmatprep.subr.bf16.mxu0 %v12897_v34 }
 0x67f   : > { %v12823_v11 = vand.u32 4294901760, %v11637_v60 }
 0x680   : > { %8674 = vmatpush1.bf16.msra.mxu1 %v8673_v36  ;;  %v13144_v36 = vand.u32 4294901760, %v11334_v10  ;;  %v5593_v10 = vsub.f32 %v11631_v43, %v12820_v22  ;;  %v12827_v22 = vand.u32 4294901760, %v11679_v63 }
 0x681   : > { %8707 = vmatpush1.bf16.msra.mxu0 %v11364_v12  ;;  %8675 = vmatprep.subr.bf16.mxu1 %v12897_v34  ;;  %v11669_v12 = vld [vmem:[%s12631_s5 + $0x58] sm:$0xff] }
 0x682   : > { %8708 = vmatprep.subr.bf16.mxu0 %v12897_v34  ;;  %v8679_v56 = vpack.c.bf16 %v13145_v40, %v13144_v36  ;;  %v5475_v33 = vand.u32 4294901760, %v11669_v12  ;;  %v5600_v36 = vsub.f32 %v11637_v60, %v12823_v11  ;;  %v5607_v40 = vsub.f32 %v11643_v21, %v12822_v5 }
 0x683   : > { %v11746_v11 = vpack.c.bf16 %v5445_v47, %v5442_v28  ;;  %v5614_v49 = vsub.f32 %v11679_v63, %v12827_v22  ;;  %v12832_v28 = vand.u32 4294901760, %v11730_v32  ;;  %v11789_v22 = vld [vmem:[%s12631_s5 + $0x80] sm:$0xff] }
 0x684   : > { %8677 = vmatpush1.bf16.msra.mxu1 %v8676_v50  ;;  %v5586_v50 = vsub.f32 %v11626_v46, %v12821_v55  ;;  %v12826_v55 = vand.u32 4294901760, %v11684_v23  ;;  %v11735_v61 = vsub.f32 %v11669_v12, %v5475_v33  ;;  %v5601_v51 = vand.u32 4294901760, %v5600_v36 }
 0x685   : > { %8710 = vmatpush1.bf16.msra.mxu0 %v11375_v39  ;;  %8678 = vmatprep.subr.bf16.mxu1 %v12897_v34  ;;  %v11708_v39 = vld [vmem:[%s12631_s5 + $0x68] sm:$0xff] }
 0x686   : > { %8738 = vmatprep.subr.bf16.mxu0 %v12897_v34  ;;  %v12829_v27 = vand.u32 4294901760, %v11708_v39  ;;  %v5587_v5 = vand.u32 4294901760, %v5586_v50  ;;  %v5621_v24 = vsub.f32 %v11684_v23, %v12826_v55  ;;  %v12831_v47 = vand.u32 4294901760, %v11735_v61 }
 0x687   : > { %v11771_v50 = vsub.f32 %v11703_v52, %v12830_v48  ;;  %v5526_v55 = vsub.f32 %v11716_v30, %v12828_v1  ;;  %v5615_v1 = vand.u32 4294901760, %v5614_v49  ;;  %v5628_v48 = vsub.f32 %v11730_v32, %v12832_v28 }
 0x688   : > { %5424 = vmatmul.mubr.f32.vlgmr.msra.gmra.mrb[30].mxu0 %v11409_v26  ;;  %8680 = vmatpush1.bf16.msra.mxu1 %v8679_v56  ;;  %v5594_v56 = vand.u32 4294901760, %v5593_v10  ;;  %v11776_v10 = vsub.f32 %v11708_v39, %v12829_v27  ;;  %v5622_v27 = vand.u32 4294901760, %v5621_v24  ;;  %v11832_v49 = vpack.c.bf16 %v5457_v58, %v5454_v14 }
 0x689   : > { %5429 = vmatprep.mubr.f32.mxu0 %v11416_v0  ;;  %8740 = vmatpush1.bf16.msra.mxu0 %v8739_v44  ;;  %v5608_v44 = vand.u32 4294901760, %v5607_v40  ;;  %v5487_v40 = vand.u32 4294901760, %v11757_v13  ;;  %v5641_v54 = vand.u32 4294901760, %v11771_v50  ;;  %v11860_v58 = vpack.c.bf16 %v5463_v6, %v5460_v62 }
 0x68a   : > { %8681 = vmatprep.subr.bf16.mxu1 %v12897_v34  ;;  %8741 = vmatprep.subr.bf16.mxu0 %v12897_v34  ;;  %v8745_v36 = vpack.c.bf16 %v5594_v56, %v5587_v5  ;;  %v11794_v5 = vld [vmem:[%s12631_s5 + $0x88] sm:$0xff]  ;;  %v5648_v20 = vand.u32 4294901760, %v11776_v10  ;;  %v8751_v24 = vpack.c.bf16 %v5622_v27, %v5615_v1  ;;  %v11877_v62 = vpack.c.bf16 %v5469_v45, %v5466_v4 }
 0x68b   : > { %v8748_v56 = vpack.c.bf16 %v5608_v44, %v5601_v51  ;;  %v5493_v51 = vand.u32 4294901760, %v11794_v5  ;;  %v5527_v44 = vand.u32 4294901760, %v5526_v55  ;;  %v5642_v28 = vsub.f32 %v11771_v50, %v5641_v54 }
 0x68c   : > { %5431 = vmatmul.mubr.f32.gmra.mrb[32].mxu0 %v11412_v7  ;;  %8683 = vmatpush1.bf16.msra.mxu1 %v8682_v16  ;;  %v5484_v16 = vand.u32 4294901760, %v11752_v29  ;;  %v11894_v4 = vpack.c.bf16 %v5475_v33, %v5472_v53  ;;  %v13149_v12 = vand.u32 4294901760, %v11708_v39 }
 0x68d   : > { %8743 = vmatpush1.bf16.msra.mxu0 %v8742_v35  ;;  %5709 = vmatprep.mubr.f32.mxu0 %v11672_v57  ;;  %v11801_v35 = vpack.c.bf16 %v5451_v3, %v5448_v25  ;;  %v11822_v25 = vsub.f32 %v11757_v13, %v5487_v40  ;;  %v5490_v3 = vand.u32 4294901760, %v11789_v22  ;;  %v11852_v14 = vsub.f32 %v11794_v5, %v5493_v51 }
 0x68e   : > { %8711 = vmatprep.subr.bf16.mxu1 %v12897_v34  ;;  %8744 = vmatprep.subr.bf16.mxu0 %v12897_v34  ;;  %v11907_v53 = vpack.c.bf16 %v13149_v12, %v13148_v59  ;;  %v11925_v52 = vpack.c.bf16 %v5487_v40, %v5484_v16  ;;  %v13150_v40 = vand.u32 4294901760, %v11716_v30  ;;  %v13151_v59 = vand.u32 4294901760, %v11544_v37 }
 0x68f   : > { %5327 = vmatmul.mubr.f32.vlgmr.msra.gmra.mrb[62].mxu1 %v11409_v26  ;;  %v5635_v26 = vsub.f32 %v11735_v61, %v12831_v47  ;;  %v5662_v41 = vand.u32 4294901760, %v11822_v25  ;;  %v11847_v1 = vsub.f32 %v11789_v22, %v5490_v3  ;;  %v5676_v15 = vand.u32 4294901760, %v11852_v14 }
 0x690   : > { %5332 = vmatprep.mubr.f32.mxu1 %v11416_v0  ;;  %8713 = vmatpush1.bf16.msra.mxu1 %v11746_v11  ;;  %v11817_v0 = vsub.f32 %v11752_v29, %v5484_v16  ;;  %v11941_v29 = vpack.c.bf16 %v5493_v51, %v5490_v3  ;;  %v8766_v16 = vpack.c.bf16 %v11549_v9, %v11544_v37  ;;  %v13152_v12 = vand.u32 4294901760, %v11549_v9  ;;  %v12028_v9 = vld [vmem:[%s12631_s5 + $0x120] sm:$0xff] }
 0x691   : > { %8746 = vmatpush1.bf16.msra.mxu0 %v8745_v36  ;;  %8714 = vmatprep.subr.bf16.mxu1 %v12897_v34  ;;  %v5629_v36 = vand.u32 4294901760, %v5628_v48  ;;  %v5636_v47 = vand.u32 4294901760, %v5635_v26  ;;  %v5643_v48 = vand.u32 4294901760, %v5642_v28  ;;  %v5663_v26 = vsub.f32 %v11822_v25, %v5662_v41 }
 0x692   : > { %8747 = vmatprep.subr.bf16.mxu0 %v12897_v34  ;;  %v5655_v31 = vand.u32 4294901760, %v11817_v0  ;;  %v5669_v2 = vand.u32 4294901760, %v11847_v1  ;;  %v13154_v37 = vand.u32 4294901760, %v11592_v42 }
 0x693   : > { %5334 = vmatmul.mubr.f32.gmra.mrb[64].mxu1 %v11412_v7  ;;  %v5649_v7 = vsub.f32 %v11776_v10, %v5648_v20  ;;  %v8754_v55 = vpack.c.bf16 %v5636_v47, %v5629_v36  ;;  %v5664_v47 = vand.u32 4294901760, %v5663_v26 }
 0x694   : > { %8716 = vmatpush1.bf16.msra.mxu1 %v11801_v35  ;;  %5528 = vmatprep.mubr.f32.mxu1 %v5527_v44  ;;  %v5670_v44 = vsub.f32 %v11847_v1, %v5669_v2 }
 0x695   : > { %8749 = vmatpush1.bf16.msra.mxu0 %v8748_v56  ;;  %8717 = vmatprep.subr.bf16.mxu1 %v12897_v34  ;;  %v5650_v27 = vand.u32 4294901760, %v5649_v7  ;;  %v5656_v56 = vsub.f32 %v11817_v0, %v5655_v31 }
 0x696   : > { %8750 = vmatprep.subr.bf16.mxu0 %v12897_v34  ;;  %v5671_v36 = vand.u32 4294901760, %v5670_v44 }
 0x697   : > { %v8757_v6 = vpack.c.bf16 %v5650_v27, %v5643_v48  ;;  %v5657_v28 = vand.u32 4294901760, %v5656_v56  ;;  %v11900_v48 = vand.u32 4294901760, %v5439_v19  ;;  %v11914_v56 = vand.u32 4294901760, %v11400_v18 }
 0x698   : > { %8719 = vmatpush1.bf16.msra.mxu1 %v11832_v49 }
 0x699   : > { %8752 = vmatpush1.bf16.msra.mxu0 %v8751_v24  ;;  %8720 = vmatprep.subr.bf16.mxu1 %v12897_v34  ;;  %v5677_v24 = vsub.f32 %v11852_v14, %v5676_v15  ;;  %v8760_v45 = vpack.c.bf16 %v5664_v47, %v5657_v28  ;;  %v11918_v26 = vsub.f32 %v5439_v19, %v11900_v48 }
 0x69a   : > { %8753 = vmatprep.subr.bf16.mxu0 %v12897_v34  ;;  %v8769_v47 = vpack.c.bf16 %v11592_v42, %v11587_v17  ;;  %v8781_v19 = vpack.c.bf16 %v11735_v61, %v11730_v32  ;;  %v13156_v42 = vand.u32 4294901760, %v11631_v43 }
 0x69b   : > { %v5678_v7 = vand.u32 4294901760, %v5677_v24  ;;  %v5540_v28 = vand.u32 4294901760, %v11918_v26  ;;  %v8772_v24 = vpack.c.bf16 %v11631_v43, %v11626_v46  ;;  %v13157_v43 = vand.u32 4294901760, %v11637_v60 }
 0x69c   : > { %8722 = vmatpush1.bf16.msra.mxu1 %v11860_v58 }
 0x69d   : > { %8755 = vmatpush1.bf16.msra.mxu0 %v8754_v55  ;;  %8723 = vmatprep.subr.bf16.mxu1 %v12897_v34  ;;  %v11897_v55 = vand.u32 4294901760, %v4633_v38  ;;  %v8763_v33 = vpack.c.bf16 %v5678_v7, %v5671_v36  ;;  %v5541_v22 = vsub.f32 %v11918_v26, %v5540_v28  ;;  %v8787_v36 = vpack.c.bf16 %v11822_v25, %v11817_v0  ;;  %v12227_v25 = vld [vmem:[%s12631_s5 + $0x180] sm:$0xff] }
 0x69e   : > { %8756 = vmatprep.subr.bf16.mxu0 %v12897_v34  ;;  %v8790_v7 = vpack.c.bf16 %v11852_v14, %v11847_v1 }
 0x69f   : > { %v11911_v27 = vsub.f32 %v4633_v38, %v11897_v55  ;;  %v5542_v51 = vand.u32 4294901760, %v5541_v22  ;;  %v8775_v38 = vpack.c.bf16 %v11643_v21, %v11637_v60  ;;  %v12079_v22 = vld [vmem:[%s12631_s5 + $0x140] sm:$0xff] }
 0x6a0   : > { %8725 = vmatpush1.bf16.msra.mxu1 %v11877_v62 }
 0x6a1   : > { %8758 = vmatpush1.bf16.msra.mxu0 %v8757_v6  ;;  %8726 = vmatprep.subr.bf16.mxu1 %v12897_v34  ;;  %v5531_v39 = vand.u32 4294901760, %v11911_v27  ;;  %v11931_v6 = vsub.f32 %v11400_v18, %v11914_v56 }
 0x6a2   : > { %8759 = vmatprep.subr.bf16.mxu0 %v12897_v34 }
 0x6a3   : > { %v5532_v18 = vsub.f32 %v11911_v27, %v5531_v39  ;;  %v5546_v13 = vand.u32 4294901760, %v11931_v6 }
 0x6a4   : > { %8728 = vmatpush1.bf16.msra.mxu1 %v11894_v4 }
 0x6a5   : > { %8761 = vmatpush1.bf16.msra.mxu0 %v8760_v45  ;;  %8729 = vmatprep.subr.bf16.mxu1 %v12897_v34  ;;  %v5533_v5 = vand.u32 4294901760, %v5532_v18  ;;  %v5547_v3 = vsub.f32 %v11931_v6, %v5546_v13  ;;  %v8784_v45 = vpack.c.bf16 %v11776_v10, %v11771_v50  ;;  %v12188_v10 = vld [vmem:[%s12631_s5 + $0x170] sm:$0xff] }
 0x6a6   : > { %8762 = vmatprep.subr.bf16.mxu0 %v12897_v34 }
 0x6a7   : > { %v5548_v44 = vand.u32 4294901760, %v5547_v3 }
 0x6a8   : > { %8731 = vmatpush1.bf16.msra.mxu1 %v11907_v53 }
 0x6a9   : > { %8764 = vmatpush1.bf16.msra.mxu0 %v8763_v33  ;;  %8732 = vmatprep.subr.bf16.mxu1 %v12897_v34  ;;  %v8820_v33 = vpack.c.bf16 %v13152_v12, %v13151_v59  ;;  %v13162_v59 = vand.u32 4294901760, %v11735_v61 }
 0x6aa   : > { %8792 = vmatprep.subr.bf16.mxu0 %v12897_v34 }
 0x6ac   : > { %5711 = vmatmul.mubr.f32.vlgmr.msra.gmra.mrb[34].mxu0 %v11897_v55  ;;  %8734 = vmatpush1.bf16.msra.mxu1 %v11925_v52 }
 0x6ad   : > { %5716 = vmatprep.mubr.f32.mxu0 %v11900_v48  ;;  %8794 = vmatpush1.bf16.msra.mxu0 %v11746_v11 }
 0x6ae   : > { %8735 = vmatprep.subr.bf16.mxu1 %v12897_v34  ;;  %8795 = vmatprep.subr.bf16.mxu0 %v12897_v34 }
 0x6b0   : > { %5718 = vmatmul.mubr.f32.gmra.mrb[36].mxu0 %v11914_v56  ;;  %8737 = vmatpush1.bf16.msra.mxu1 %v11941_v29 }
 0x6b1   : > { %8797 = vmatpush1.bf16.msra.mxu0 %v11801_v35  ;;  %5927 = vmatprep.mubr.f32.mxu0 %v13150_v40  ;;  %v13159_v40 = vand.u32 4294901760, %v11679_v63 }
 0x6b2   : > { %8765 = vmatprep.subr.bf16.mxu1 %v12897_v34  ;;  %8798 = vmatprep.subr.bf16.mxu0 %v12897_v34 }
 0x6b3   : > { %5534 = vmatmul.mubr.f32.vlgmr.msra.gmra.mrb[66].mxu1 %v5533_v5  ;;  %v13160_v5 = vand.u32 4294901760, %v11684_v23 }
 0x6b4   : > { %5543 = vmatprep.mubr.f32.mxu1 %v5542_v51  ;;  %8767 = vmatpush1.bf16.msra.mxu1 %v8766_v16  ;;  %v12084_v16 = vld [vmem:[%s12631_s5 + $0x148] sm:$0xff] }
 0x6b5   : > { %8800 = vmatpush1.bf16.msra.mxu0 %v11832_v49  ;;  %8768 = vmatprep.subr.bf16.mxu1 %v12897_v34  ;;  %v8832_v3 = vpack.c.bf16 %v13160_v5, %v13159_v40 }
 0x6b6   : > { %8801 = vmatprep.subr.bf16.mxu0 %v12897_v34 }
 0x6b7   : > { %5549 = vmatmul.mubr.f32.gmra.mrb[68].mxu1 %v5548_v44 }
 0x6b8   : > { %8770 = vmatpush1.bf16.msra.mxu1 %v8769_v47  ;;  %5825 = vmatprep.mubr.f32.mxu1 %v11716_v30  ;;  %v8778_v30 = vpack.c.bf16 %v11684_v23, %v11679_v63 }
 0x6b9   : > { %8803 = vmatpush1.bf16.msra.mxu0 %v11860_v58  ;;  %8771 = vmatprep.subr.bf16.mxu1 %v12897_v34 }
 0x6ba   : > { %8804 = vmatprep.subr.bf16.mxu0 %v12897_v34 }
 0x6bc   : > { %8773 = vmatpush1.bf16.msra.mxu1 %v8772_v24  ;;  %v12096_v24 = vld [vmem:[%s12631_s5 + $0x150] sm:$0xff] }
 0x6bd   : > { %8806 = vmatpush1.bf16.msra.mxu0 %v11877_v62  ;;  %8774 = vmatprep.subr.bf16.mxu1 %v12897_v34 }
 0x6be   : > { %8807 = vmatprep.subr.bf16.mxu0 %v12897_v34 }
 0x6c0   : > { %8776 = vmatpush1.bf16.msra.mxu1 %v8775_v38  ;;  %v12101_v38 = vld [vmem:[%s12631_s5 + $0x158] sm:$0xff] }
 0x6c1   : > { %8809 = vmatpush1.bf16.msra.mxu0 %v11894_v4  ;;  %8777 = vmatprep.subr.bf16.mxu1 %v12897_v34 }
 0x6c2   : > { %8810 = vmatprep.subr.bf16.mxu0 %v12897_v34 }
 0x6c4   : > { %8779 = vmatpush1.bf16.msra.mxu1 %v8778_v30  ;;  %v6233_v30 = vand.u32 4294901760, %v12079_v22 }
 0x6c5   : > { %8812 = vmatpush1.bf16.msra.mxu0 %v11907_v53  ;;  %8780 = vmatprep.subr.bf16.mxu1 %v12897_v34 }
 0x6c6   : > { %8813 = vmatprep.subr.bf16.mxu0 %v12897_v34 }
 0x6c8   : > { %8782 = vmatpush1.bf16.msra.mxu1 %v8781_v19  ;;  %v6236_v19 = vand.u32 4294901760, %v12084_v16 }
 0x6c9   : > { %8815 = vmatpush1.bf16.msra.mxu0 %v11925_v52  ;;  %8783 = vmatprep.subr.bf16.mxu1 %v12897_v34 }
 0x6ca   : > { %8816 = vmatprep.subr.bf16.mxu0 %v12897_v34 }
 0x6cc   : > { %8785 = vmatpush1.bf16.msra.mxu1 %v8784_v45  ;;  %v6239_v45 = vand.u32 4294901760, %v12096_v24 }
 0x6cd   : > { %8818 = vmatpush1.bf16.msra.mxu0 %v11941_v29  ;;  %8786 = vmatprep.subr.bf16.mxu1 %v12897_v34 }
 0x6ce   : > { %8846 = vmatprep.subr.bf16.mxu0 %v12897_v34 }
 0x6d0   : > { %5931 = vmatmul.mubr.f32.vlgmr.msra.gmra.mrb[38].mxu0 %v5531_v39  ;;  %8788 = vmatpush1.bf16.msra.mxu1 %v8787_v36  ;;  %v6242_v36 = vand.u32 4294901760, %v12101_v38 }
 0x6d1   : > { %5938 = vmatprep.mubr.f32.mxu0 %v5540_v28  ;;  %8848 = vmatpush1.bf16.msra.mxu0 %v11746_v11  ;;  %v13153_v11 = vand.u32 4294901760, %v11587_v17  ;;  %v13155_v17 = vand.u32 4294901760, %v11626_v46  ;;  %v12055_v46 = vld [vmem:[%s12631_s5 + $0x138] sm:$0xff] }
 0x6d2   : > { %8789 = vmatprep.subr.bf16.mxu1 %v12897_v34  ;;  %8849 = vmatprep.subr.bf16.mxu0 %v12897_v34  ;;  %v6230_v60 = vand.u32 4294901760, %v12055_v46 }
 0x6d3   : > { %v8823_v39 = vpack.c.bf16 %v13154_v37, %v13153_v11  ;;  %v12136_v37 = vld [vmem:[%s12631_s5 + $0x160] sm:$0xff] }
 0x6d4   : > { %5942 = vmatmul.mubr.f32.gmra.mrb[40].mxu0 %v5546_v13  ;;  %8791 = vmatpush1.bf16.msra.mxu1 %v8790_v7  ;;  %v12113_v23 = vsub.f32 %v12055_v46, %v6230_v60  ;;  %v13161_v7 = vand.u32 4294901760, %v11730_v32  ;;  %v12141_v32 = vld [vmem:[%s12631_s5 + $0x168] sm:$0xff] }
 0x6d5   : > { %8851 = vmatpush1.bf16.msra.mxu0 %v11801_v35  ;;  %6163 = vmatprep.mubr.f32.mxu0 %v11672_v57  ;;  %v12033_v35 = vld [vmem:[%s12631_s5 + $0x128] sm:$0xff] }
 0x6d6   : > { %8819 = vmatprep.subr.bf16.mxu1 %v12897_v34  ;;  %8852 = vmatprep.subr.bf16.mxu0 %v12897_v34  ;;  %v8835_v12 = vpack.c.bf16 %v13162_v59, %v13161_v7 }
 0x6d7   : > { %5828 = vmatmul.mubr.f32.vlgmr.msra.gmra.mrb[70].mxu1 %v11911_v27  ;;  %v6221_v27 = vand.u32 4294901760, %v12028_v9 }
 0x6d8   : > { %5834 = vmatprep.mubr.f32.mxu1 %v11918_v26  ;;  %8821 = vmatpush1.bf16.msra.mxu1 %v8820_v33  ;;  %v6224_v26 = vand.u32 4294901760, %v12033_v35 }
 0x6d9   : > { %8854 = vmatpush1.bf16.msra.mxu0 %v11832_v49  ;;  %8822 = vmatprep.subr.bf16.mxu1 %v12897_v34  ;;  %v8826_v49 = vpack.c.bf16 %v13156_v42, %v13155_v17  ;;  %v12064_v28 = vsub.f32 %v12028_v9, %v6221_v27  ;;  %v12150_v17 = vsub.f32 %v12079_v22, %v6233_v30 }
 0x6da   : > { %8855 = vmatprep.subr.bf16.mxu0 %v12897_v34  ;;  %v12069_v18 = vsub.f32 %v12033_v35, %v6224_v26  ;;  %v12155_v42 = vsub.f32 %v12084_v16, %v6236_v19 }
 0x6db   : > { %5837 = vmatmul.mubr.f32.gmra.mrb[72].mxu1 %v11931_v6  ;;  %v12050_v6 = vld [vmem:[%s12631_s5 + $0x130] sm:$0xff]  ;;  %v12836_v51 = vand.u32 4294901760, %v12064_v28 }
 0x6dc   : > { %8824 = vmatpush1.bf16.msra.mxu1 %v8823_v39  ;;  %6066 = vmatprep.mubr.f32.mxu1 %v11672_v57  ;;  %v13158_v57 = vand.u32 4294901760, %v11643_v21  ;;  %v6227_v13 = vand.u32 4294901760, %v12050_v6  ;;  %v6178_v21 = vld [vmem:[#allocation3 + $0x8] sm:$0xfc]  ;;  %v12835_v47 = vand.u32 4294901760, %v12069_v18  ;;  %v12833_v39 = vand.u32 4294901760, %v12113_v23 }
 0x6dd   : > { %8857 = vmatpush1.bf16.msra.mxu0 %v11860_v58  ;;  %8825 = vmatprep.subr.bf16.mxu1 %v12897_v34  ;;  %v6207_v44 = vrot.slane %v6178_v21, 2  ;;  %v6337_v33 = vsub.f32 %v12064_v28, %v12836_v51  ;;  %v8838_v21 = vpack.c.bf16 %v5648_v20, %v5641_v54  ;;  %v12839_v50 = vand.u32 4294901760, %v12155_v42  ;;  %v12193_v54 = vld [vmem:[%s12631_s5 + $0x178] sm:$0xff] }
 0x6de   : > { %8858 = vmatprep.subr.bf16.mxu0 %v12897_v34  ;;  %v8829_v58 = vpack.c.bf16 %v13158_v57, %v13157_v43  ;;  %v12108_v63 = vsub.f32 %v12050_v6, %v6227_v13  ;;  %v6344_v11 = vsub.f32 %v12069_v18, %v12835_v47  ;;  %v12167_v43 = vsub.f32 %v12101_v38, %v6242_v36 }
 0x6df   : > { %v6245_v57 = vand.u32 4294901760, %v12136_v37  ;;  %v6338_v40 = vand.u32 4294901760, %v6337_v33  ;;  %v8841_v33 = vpack.c.bf16 %v5662_v41, %v5655_v31  ;;  %v6372_v0 = vsub.f32 %v12155_v42, %v12839_v50  ;;  %v12232_v31 = vld [vmem:[%s12631_s5 + $0x188] sm:$0xff] }
 0x6e0   : > { %8827 = vmatpush1.bf16.msra.mxu1 %v8826_v49  ;;  %v12834_v61 = vand.u32 4294901760, %v12108_v63  ;;  %v12162_v49 = vsub.f32 %v12096_v24, %v6239_v45  ;;  %v6345_v5 = vand.u32 4294901760, %v6344_v11  ;;  %v12837_v7 = vand.u32 4294901760, %v12167_v43 }
 0x6e1   : > { %8860 = vmatpush1.bf16.msra.mxu0 %v11877_v62  ;;  %8828 = vmatprep.subr.bf16.mxu1 %v12897_v34  ;;  %v6208_v62 = vrot.slane %v11398_v8, 2  ;;  %v12203_v59 = vsub.f32 %v12136_v37, %v6245_v57  ;;  %v8844_v41 = vpack.c.bf16 %v5676_v15, %v5669_v2  ;;  %v12845_v2 = vand.u32 4294901760, %v12227_v25 }
 0x6e2   : > { %8861 = vmatprep.subr.bf16.mxu0 %v12897_v34  ;;  %v8901_v11 = vpack.c.bf16 %v6345_v5, %v6338_v40  ;;  %v6386_v5 = vsub.f32 %v12167_v43, %v12837_v7  ;;  %v12844_v15 = vand.u32 4294901760, %v12232_v31 }
 0x6e4   : > { %8830 = vmatpush1.bf16.msra.mxu1 %v8829_v58  ;;  %v6248_v58 = vand.u32 4294901760, %v12141_v32 }
 0x6e5   : > { %8863 = vmatpush1.bf16.msra.mxu0 %v11894_v4  ;;  %8831 = vmatprep.subr.bf16.mxu1 %v12897_v34  ;;  %v6209_v4 = vsel %vm3845_vm14, %v6207_v44, %v6208_v62  ;;  %v6358_v44 = vsub.f32 %v12113_v23, %v12833_v39  ;;  %v6251_v39 = vand.u32 4294901760, %v12188_v10 }
 0x6e6   : > { %8864 = vmatprep.subr.bf16.mxu0 %v12897_v34 }
 0x6e7   : > { %v6359_v51 = vand.u32 4294901760, %v6358_v44  ;;  %v12254_v1 = vsub.f32 %v12188_v10, %v6251_v39  ;;  %v13163_v10 = vand.u32 4294901760, %v12227_v25 }
 0x6e8   : > { %8833 = vmatpush1.bf16.msra.mxu1 %v8832_v3  ;;  %v6351_v3 = vsub.f32 %v12108_v63, %v12834_v61  ;;  %v6254_v61 = vand.u32 4294901760, %v12193_v54 }
 0x6e9   : > { %8866 = vmatpush1.bf16.msra.mxu0 %v11907_v53  ;;  %8834 = vmatprep.subr.bf16.mxu1 %v12897_v34  ;;  %v6216_v53 = vsel %vm2239_vm5, %v6209_v4, 0  ;;  %v12840_v4 = vand.u32 4294901760, %v12150_v17 }
 0x6ea   : > { %8867 = vmatprep.subr.bf16.mxu0 %v12897_v34  ;;  %v12196_v20 = vand.u32 4294901760, %v6216_v53  ;;  %v6352_v47 = vand.u32 4294901760, %v6351_v3  ;;  %v12842_v3 = vand.u32 4294901760, %v12203_v59  ;;  %v12259_v14 = vsub.f32 %v12193_v54, %v6254_v61 }
 0x6ec   : > { %8836 = vmatpush1.bf16.msra.mxu1 %v8835_v12  ;;  %v12208_v12 = vsub.f32 %v12141_v32, %v6248_v58  ;;  %v6393_v9 = vsub.f32 %v12203_v59, %v12842_v3  ;;  %v12313_v3 = vld [vmem:[%s12631_s5 + $0x1a0] sm:$0xff] }
 0x6ed   : > { %8869 = vmatpush1.bf16.msra.mxu0 %v11925_v52  ;;  %8837 = vmatprep.subr.bf16.mxu1 %v12897_v34  ;;  %v12838_v52 = vand.u32 4294901760, %v12162_v49 }
 0x6ee   : > { %8870 = vmatprep.subr.bf16.mxu0 %v12897_v34  ;;  %v12841_v44 = vand.u32 4294901760, %v12208_v12 }
 0x6ef   : > { %v6379_v40 = vsub.f32 %v12162_v49, %v12838_v52  ;;  %v12270_v52 = vpack.c.bf16 %v6224_v26, %v6221_v27  ;;  %v12847_v27 = vand.u32 4294901760, %v12254_v1  ;;  %v12846_v26 = vand.u32 4294901760, %v12259_v14 }
 0x6f0   : > { %8839 = vmatpush1.bf16.msra.mxu1 %v8838_v21  ;;  %v6365_v21 = vsub.f32 %v12150_v17, %v12840_v4  ;;  %v12276_v4 = vld [vmem:[%s12631_s5 + $0x190] sm:$0xff]  ;;  %v6400_v35 = vsub.f32 %v12208_v12, %v12841_v44 }
 0x6f1   : > { %8872 = vmatpush1.bf16.msra.mxu0 %v11941_v29  ;;  %8840 = vmatprep.subr.bf16.mxu1 %v12897_v34  ;;  %v12240_v29 = vsub.f32 %v6216_v53, %v12196_v20  ;;  %v8904_v53 = vpack.c.bf16 %v6359_v51, %v6352_v47  ;;  %v12281_v51 = vld [vmem:[%s12631_s5 + $0x198] sm:$0xff]  ;;  %v6380_v47 = vand.u32 4294901760, %v6379_v40 }
 0x6f2   : > { %8900 = vmatprep.subr.bf16.mxu0 %v12897_v34  ;;  %v6366_v7 = vand.u32 4294901760, %v6365_v21  ;;  %v12295_v21 = vsub.f32 %v12227_v25, %v12845_v2  ;;  %v6407_v2 = vsub.f32 %v12254_v1, %v12847_v27 }
 0x6f3   : > { %v12843_v50 = vand.u32 4294901760, %v12240_v29 }
 0x6f4   : > { %6165 = vmatmul.mubr.f32.vlgmr.msra.gmra.mrb[42].mxu0 %v11897_v55  ;;  %8842 = vmatpush1.bf16.msra.mxu1 %v8841_v33  ;;  %v6373_v33 = vand.u32 4294901760, %v6372_v0  ;;  %v12300_v0 = vsub.f32 %v12232_v31, %v12844_v15  ;;  %v6401_v15 = vand.u32 4294901760, %v6400_v35  ;;  %v6420_v6 = vand.u32 4294901760, %v12295_v21 }
 0x6f5   : > { %6170 = vmatprep.mubr.f32.mxu0 %v11900_v48  ;;  %8902 = vmatpush1.bf16.msra.mxu0 %v8901_v11  ;;  %v6387_v11 = vand.u32 4294901760, %v6386_v5  ;;  %v6266_v5 = vand.u32 4294901760, %v12281_v51  ;;  %v6305_v44 = vsub.f32 %v12240_v29, %v12843_v50  ;;  %v6394_v50 = vand.u32 4294901760, %v6393_v9 }
 0x6f6   : > { %8843 = vmatprep.subr.bf16.mxu1 %v12897_v34  ;;  %8903 = vmatprep.subr.bf16.mxu0 %v12897_v34  ;;  %v8907_v40 = vpack.c.bf16 %v6373_v33, %v6366_v7  ;;  %v12318_v7 = vld [vmem:[%s12631_s5 + $0x1a8] sm:$0xff]  ;;  %v12850_v46 = vand.u32 4294901760, %v12300_v0  ;;  %v12356_v9 = vpack.c.bf16 %v6236_v19, %v6233_v30  ;;  %v6421_v27 = vsub.f32 %v12295_v21, %v6420_v6 }
 0x6f7   : > { %v8910_v33 = vpack.c.bf16 %v6387_v11, %v6380_v47  ;;  %v6272_v47 = vand.u32 4294901760, %v12318_v7  ;;  %v6306_v11 = vand.u32 4294901760, %v6305_v44  ;;  %v8913_v35 = vpack.c.bf16 %v6401_v15, %v6394_v50  ;;  %v6180_v44 = vld [vmem:[#allocation3 + $0x28] sm:$0x3] }
 0x6f8   : > { %6172 = vmatmul.mubr.f32.gmra.mrb[44].mxu0 %v11914_v56  ;;  %8845 = vmatpush1.bf16.msra.mxu1 %v8844_v41  ;;  %v6263_v41 = vand.u32 4294901760, %v12276_v4  ;;  %v6212_v50 = vrot.slane %v6180_v44, 2 }
 0x6f9   : > { %8905 = vmatpush1.bf16.msra.mxu0 %v8904_v53  ;;  %6488 = vmatprep.mubr.f32.mxu0 %v12196_v20  ;;  %v12325_v53 = vpack.c.bf16 %v6230_v60, %v6227_v13  ;;  %v12346_v13 = vsub.f32 %v12281_v51, %v6266_v5  ;;  %v6269_v60 = vand.u32 4294901760, %v12313_v3  ;;  %v12376_v19 = vsub.f32 %v12318_v7, %v6272_v47 }
 0x6fa   : > { %8873 = vmatprep.subr.bf16.mxu1 %v12897_v34  ;;  %8906 = vmatprep.subr.bf16.mxu0 %v12897_v34 }
 0x6fb   : > { %6068 = vmatmul.mubr.f32.vlgmr.msra.gmra.mrb[74].mxu1 %v11897_v55  ;;  %v6414_v55 = vsub.f32 %v12259_v14, %v12846_v26  ;;  %v12848_v16 = vand.u32 4294901760, %v12346_v13  ;;  %v12371_v30 = vsub.f32 %v12313_v3, %v6269_v60  ;;  %v6455_v38 = vand.u32 4294901760, %v12376_v19 }
 0x6fc   : > { %6073 = vmatprep.mubr.f32.mxu1 %v11900_v48  ;;  %8875 = vmatpush1.bf16.msra.mxu1 %v12270_v52  ;;  %v12341_v48 = vsub.f32 %v12276_v4, %v6263_v41  ;;  %v12467_v4 = vpack.c.bf16 %v6272_v47, %v6269_v60  ;;  %v8928_v47 = vpack.c.bf16 %v12069_v18, %v12064_v28 }
 0x6fd   : > { %8908 = vmatpush1.bf16.msra.mxu0 %v8907_v40  ;;  %8876 = vmatprep.subr.bf16.mxu1 %v12897_v34  ;;  %v6408_v40 = vand.u32 4294901760, %v6407_v2  ;;  %v6415_v26 = vand.u32 4294901760, %v6414_v55  ;;  %v12384_v2 = vpack.c.bf16 %v6242_v36, %v6239_v45  ;;  %v6442_v44 = vsub.f32 %v12346_v13, %v12848_v16  ;;  %v6177_v45 = vld [vmem:[#allocation3] sm:$0xfc]  ;;  %v9082_v36 = vld [vmem:[#allocation3 + $0x10] sm:$0xff] }
 0x6fe   : > { %8909 = vmatprep.subr.bf16.mxu0 %v12897_v34  ;;  %v12849_v22 = vand.u32 4294901760, %v12341_v48  ;;  %v6448_v24 = vand.u32 4294901760, %v12371_v30  ;;  %v6213_v16 = vsel %vm3845_vm14, %v6208_v62, %v6212_v50  ;;  %v6456_v37 = vsub.f32 %v12376_v19, %v6455_v38 }
 0x6ff   : > { %6075 = vmatmul.mubr.f32.gmra.mrb[76].mxu1 %v11914_v56  ;;  %v6428_v56 = vsub.f32 %v12300_v0, %v12850_v46  ;;  %v8916_v15 = vpack.c.bf16 %v6415_v26, %v6408_v40  ;;  %v6179_v26 = vld [vmem:[#allocation3 + $0x20] sm:$0x3]  ;;  %v6218_v62 = vsel %vm2239_vm5, %v6213_v16, 0 }
 0x700   : > { %8878 = vmatpush1.bf16.msra.mxu1 %v12325_v53  ;;  %6307 = vmatprep.mubr.f32.mxu1 %v6306_v11  ;;  %v6435_v11 = vsub.f32 %v12341_v48, %v12849_v22  ;;  %v6449_v46 = vsub.f32 %v12371_v30, %v6448_v24  ;;  %v6210_v8 = vrot.slane %v6179_v26, 2 }
 0x701   : > { %8911 = vmatpush1.bf16.msra.mxu0 %v8910_v33  ;;  %8879 = vmatprep.subr.bf16.mxu1 %v12897_v34  ;;  %v6422_v33 = vand.u32 4294901760, %v6421_v27  ;;  %v6429_v55 = vand.u32 4294901760, %v6428_v56  ;;  %v6205_v27 = vrot.slane %v9082_v36, 2  ;;  %v6204_v56 = vrot.slane %v6177_v45, 2 }
 0x702   : > { %8912 = vmatprep.subr.bf16.mxu0 %v12897_v34  ;;  %v6436_v22 = vand.u32 4294901760, %v6435_v11  ;;  %v6443_v36 = vand.u32 4294901760, %v6442_v44  ;;  %v6450_v50 = vand.u32 4294901760, %v6449_v46 }
 0x703   : > { %v8919_v40 = vpack.c.bf16 %v6429_v55, %v6422_v33  ;;  %v6206_v32 = vsel %vm3845_vm14, %v6204_v56, %v6205_v27  ;;  %v12427_v55 = vand.u32 4294901760, %v6218_v62  ;;  %v6211_v16 = vsel %vm3845_vm14, %v6205_v27, %v6210_v8 }
 0x704   : > { %8881 = vmatpush1.bf16.msra.mxu1 %v12356_v9  ;;  %v12424_v33 = vand.u32 4294901760, %v6206_v32 }
 0x705   : > { %8914 = vmatpush1.bf16.msra.mxu0 %v8913_v35  ;;  %8882 = vmatprep.subr.bf16.mxu1 %v12897_v34  ;;  %v12401_v35 = vpack.c.bf16 %v6248_v58, %v6245_v57  ;;  %v12421_v57 = vpack.c.bf16 %v6254_v61, %v6251_v39  ;;  %v8922_v58 = vpack.c.bf16 %v6443_v36, %v6436_v22  ;;  %v13164_v61 = vand.u32 4294901760, %v12232_v31 }
 0x706   : > { %8915 = vmatprep.subr.bf16.mxu0 %v12897_v34  ;;  %v12439_v46 = vsub.f32 %v6206_v32, %v12424_v33  ;;  %v12441_v22 = vand.u32 4294901760, %v6211_v16  ;;  %v12445_v44 = vsub.f32 %v6218_v62, %v12427_v55  ;;  %v12452_v31 = vpack.c.bf16 %v6266_v5, %v6263_v41 }
 0x707   : > { %v12435_v39 = vpack.c.bf16 %v13164_v61, %v13163_v10  ;;  %v13165_v36 = vand.u32 4294901760, %v12240_v29  ;;  %v8934_v10 = vpack.c.bf16 %v12155_v42, %v12150_v17  ;;  %v8937_v61 = vpack.c.bf16 %v12167_v43, %v12162_v49 }
 0x708   : > { %8884 = vmatpush1.bf16.msra.mxu1 %v12384_v2  ;;  %v6310_v45 = vand.u32 4294901760, %v12439_v46  ;;  %v12457_v27 = vsub.f32 %v6211_v16, %v12441_v22 }
 0x709   : > { %8917 = vmatpush1.bf16.msra.mxu0 %v8916_v15  ;;  %8885 = vmatprep.subr.bf16.mxu1 %v12897_v34  ;;  %v6457_v15 = vand.u32 4294901760, %v6456_v37 }
 0x70a   : > { %8918 = vmatprep.subr.bf16.mxu0 %v12897_v34  ;;  %v6311_v51 = vsub.f32 %v12439_v46, %v6310_v45  ;;  %v6325_v41 = vand.u32 4294901760, %v12457_v27 }
 0x70b   : > { %v8925_v54 = vpack.c.bf16 %v6457_v15, %v6450_v50  ;;  %v8931_v15 = vpack.c.bf16 %v12113_v23, %v12108_v63 }
 0x70c   : > { %8887 = vmatpush1.bf16.msra.mxu1 %v12401_v35  ;;  %v6312_v37 = vand.u32 4294901760, %v6311_v51  ;;  %v6326_v32 = vsub.f32 %v12457_v27, %v6325_v41 }
 0x70d   : > { %8920 = vmatpush1.bf16.msra.mxu0 %v8919_v40  ;;  %8888 = vmatprep.subr.bf16.mxu1 %v12897_v34  ;;  %v6319_v40 = vand.u32 4294901760, %v12445_v44 }
 0x70e   : > { %8921 = vmatprep.subr.bf16.mxu0 %v12897_v34  ;;  %v6327_v16 = vand.u32 4294901760, %v6326_v32 }
 0x70f   : > { %v6320_v3 = vsub.f32 %v12445_v44, %v6319_v40 }
 0x710   : > { %8890 = vmatpush1.bf16.msra.mxu1 %v12421_v57 }
 0x711   : > { %8923 = vmatpush1.bf16.msra.mxu0 %v8922_v58  ;;  %8891 = vmatprep.subr.bf16.mxu1 %v12897_v34  ;;  %v6321_v62 = vand.u32 4294901760, %v6320_v3  ;;  %v8952_v3 = vpack.c.bf16 %v12376_v19, %v12371_v30 }
 0x712   : > { %v4971_v11 = vpop.f32.mrb[22].mxu0  ;;  %8924 = vmatprep.subr.bf16.mxu0 %v12897_v34 }
 0x713   : > { %v4973_v25 = vpop.f32.mrb[23].mxu0 }
 0x714   : > { %8893 = vmatpush1.bf16.msra.mxu1 %v12435_v39 }
 0x715   : > { %8926 = vmatpush1.bf16.msra.mxu0 %v8925_v54  ;;  %8894 = vmatprep.subr.bf16.mxu1 %v12897_v34  ;;  %v8943_v54 = vpack.c.bf16 %v12259_v14, %v12254_v1 }
 0x716   : > { %v4978_v26 = vpop.f32.mrb[24].mxu0  ;;  %8954 = vmatprep.subr.bf16.mxu0 %v12897_v34 }
 0x717   : > { %v4980_v56 = vpop.f32.mrb[25].mxu0 }
 0x718   : > { %6490 = vmatmul.mubr.f32.vlgmr.msra.gmra.mrb[46].mxu0 %v12424_v33  ;;  %8896 = vmatpush1.bf16.msra.mxu1 %v12452_v31  ;;  %v8949_v56 = vpack.c.bf16 %v12346_v13, %v12341_v48 }
 0x719   : > { %6495 = vmatprep.mubr.f32.mxu0 %v12427_v55  ;;  %8956 = vmatpush1.bf16.msra.mxu0 %v12270_v52 }
 0x71a   : > { %v4794_v5 = vpop.f32.mrb[54].mxu1  ;;  %8897 = vmatprep.subr.bf16.mxu1 %v12897_v34  ;;  %8957 = vmatprep.subr.bf16.mxu0 %v12897_v34 }
 0x71b   : > { %v12480_v7 = vadd.f32 %v4971_v11, %v4794_v5  ;;  %v4796_v60 = vpop.f32.mrb[55].mxu1  ;;  %v8946_v11 = vpack.c.bf16 %v12300_v0, %v12295_v21 }
 0x71c   : > { %6497 = vmatmul.mubr.f32.gmra.mrb[48].mxu0 %v12441_v22  ;;  %8899 = vmatpush1.bf16.msra.mxu1 %v12467_v4 }
 0x71d   : > { %8959 = vmatpush1.bf16.msra.mxu0 %v12325_v53  ;;  %6706 = vmatprep.mubr.f32.mxu0 %v13165_v36 }
 0x71e   : > { %v4809_v8 = vpop.f32.mrb[56].mxu1  ;;  %8927 = vmatprep.subr.bf16.mxu1 %v12897_v34  ;;  %8960 = vmatprep.subr.bf16.mxu0 %v12897_v34 }
 0x71f   : > { %v12494_v58 = vadd.f32 %v4978_v26, %v4809_v8  ;;  %6313 = vmatmul.mubr.f32.vlgmr.msra.gmra.mrb[78].mxu1 %v6312_v37  ;;  %v4811_v50 = vpop.f32.mrb[57].mxu1  ;;  %v13167_v37 = vand.u32 4294901760, %v12069_v18  ;;  %v13169_v18 = vand.u32 4294901760, %v12113_v23  ;;  %v13172_v23 = vand.u32 4294901760, %v12162_v49 }
 0x720   : > { %6322 = vmatprep.mubr.f32.mxu1 %v6321_v62  ;;  %8929 = vmatpush1.bf16.msra.mxu1 %v8928_v47  ;;  %v13176_v49 = vand.u32 4294901760, %v12254_v1 }
 0x721   : > { %8962 = vmatpush1.bf16.msra.mxu0 %v12356_v9  ;;  %8930 = vmatprep.subr.bf16.mxu1 %v12897_v34 }
 0x722   : > { %8963 = vmatprep.subr.bf16.mxu0 %v12897_v34 }
 0x723   : > { %6328 = vmatmul.mubr.f32.gmra.mrb[80].mxu1 %v6327_v16 }
 0x724   : > { %8932 = vmatpush1.bf16.msra.mxu1 %v8931_v15  ;;  %6604 = vmatprep.mubr.f32.mxu1 %v12240_v29  ;;  %v8940_v29 = vpack.c.bf16 %v12208_v12, %v12203_v59 }
 0x725   : > { %8965 = vmatpush1.bf16.msra.mxu0 %v12384_v2  ;;  %8933 = vmatprep.subr.bf16.mxu1 %v12897_v34 }
 0x726   : > { %8966 = vmatprep.subr.bf16.mxu0 %v12897_v34 }
 0x728   : > { %8935 = vmatpush1.bf16.msra.mxu1 %v8934_v10 }
 0x729   : > { %8968 = vmatpush1.bf16.msra.mxu0 %v12401_v35  ;;  %8936 = vmatprep.subr.bf16.mxu1 %v12897_v34 }
 0x72a   : > { %8969 = vmatprep.subr.bf16.mxu0 %v12897_v34 }
 0x72c   : > { %8938 = vmatpush1.bf16.msra.mxu1 %v8937_v61 }
 0x72d   : > { %8971 = vmatpush1.bf16.msra.mxu0 %v12421_v57  ;;  %8939 = vmatprep.subr.bf16.mxu1 %v12897_v34 }
 0x72e   : > { %8972 = vmatprep.subr.bf16.mxu0 %v12897_v34 }
 0x730   : > { %8941 = vmatpush1.bf16.msra.mxu1 %v8940_v29 }
 0x731   : > { %8974 = vmatpush1.bf16.msra.mxu0 %v12435_v39  ;;  %8942 = vmatprep.subr.bf16.mxu1 %v12897_v34 }
 0x732   : > { %8975 = vmatprep.subr.bf16.mxu0 %v12897_v34 }
 0x734   : > { %8944 = vmatpush1.bf16.msra.mxu1 %v8943_v54 }
 0x735   : > { %8977 = vmatpush1.bf16.msra.mxu0 %v12452_v31  ;;  %8945 = vmatprep.subr.bf16.mxu1 %v12897_v34 }
 0x736   : > { %v5191_v25 = vpop.f32.mrb[26].mxu0  ;;  %8978 = vmatprep.subr.bf16.mxu0 %v12897_v34 }
 0x737   : > { %v5193_v26 = vpop.f32.mrb[27].mxu0 }
 0x738   : > { %8947 = vmatpush1.bf16.msra.mxu1 %v8946_v11 }
 0x739   : > { %8980 = vmatpush1.bf16.msra.mxu0 %v12467_v4  ;;  %8948 = vmatprep.subr.bf16.mxu1 %v12897_v34 }
 0x73a   : > { %v5202_v51 = vpop.f32.mrb[28].mxu0  ;;  %9008 = vmatprep.subr.bf16.mxu0 %v12897_v34 }
 0x73b   : > { %v5204_v5 = vpop.f32.mrb[29].mxu0 }
 0x73c   : > { %6710 = vmatmul.mubr.f32.vlgmr.msra.gmra.mrb[50].mxu0 %v6310_v45  ;;  %8950 = vmatpush1.bf16.msra.mxu1 %v8949_v56  ;;  %v13166_v45 = vand.u32 4294901760, %v12064_v28  ;;  %v13168_v28 = vand.u32 4294901760, %v12108_v63 }
 0x73d   : > { %6717 = vmatprep.mubr.f32.mxu0 %v6319_v40  ;;  %9010 = vmatpush1.bf16.msra.mxu0 %v12270_v52 }
 0x73e   : > { %v5088_v60 = vpop.f32.mrb[58].mxu1  ;;  %8951 = vmatprep.subr.bf16.mxu1 %v12897_v34  ;;  %9011 = vmatprep.subr.bf16.mxu0 %v12897_v34  ;;  %v8982_v32 = vpack.c.bf16 %v13167_v37, %v13166_v45 }
 0x73f   : > { %v5089_v47 = vadd.f32 %v5088_v60, %v12480_v7  ;;  %v5090_v36 = vpop.f32.mrb[59].mxu1 }
 0x740   : > { %6721 = vmatmul.mubr.f32.gmra.mrb[52].mxu0 %v6325_v41  ;;  %8953 = vmatpush1.bf16.msra.mxu1 %v8952_v3 }
 0x741   : > { %9013 = vmatpush1.bf16.msra.mxu0 %v12325_v53  ;;  %6942 = vmatprep.mubr.f32.mxu0 %v12196_v20  ;;  %v5192_v52 = vadd.f32 %v5191_v25, %v5089_v47  ;;  %v8985_v53 = vpack.c.bf16 %v13169_v18, %v13168_v28 }
 0x742   : > { %v5097_v40 = vpop.f32.mrb[60].mxu1  ;;  %8981 = vmatprep.subr.bf16.mxu1 %v12897_v34  ;;  %9014 = vmatprep.subr.bf16.mxu0 %v12897_v34 }
 0x743   : > { %v5098_v7 = vadd.f32 %v5097_v40, %v12494_v58  ;;  %v5099_v8 = vpop.f32.mrb[61].mxu1  ;;  %6607 = vmatmul.mubr.f32.vlgmr.msra.gmra.mrb[82].mxu1 %v12439_v46  ;;  %v13170_v46 = vand.u32 4294901760, %v12150_v17  ;;  %v13174_v17 = vand.u32 4294901760, %v12203_v59  ;;  %v13178_v59 = vand.u32 4294901760, %v12300_v0 }
 0x744   : > { %6613 = vmatprep.mubr.f32.mxu1 %v12445_v44  ;;  %8983 = vmatpush1.bf16.msra.mxu1 %v8982_v32  ;;  %v13171_v44 = vand.u32 4294901760, %v12155_v42  ;;  %v13175_v42 = vand.u32 4294901760, %v12208_v12 }
 0x745   : > { %9016 = vmatpush1.bf16.msra.mxu0 %v12356_v9  ;;  %8984 = vmatprep.subr.bf16.mxu1 %v12897_v34  ;;  %v5203_v41 = vadd.f32 %v5202_v51, %v5098_v7  ;;  %v13173_v9 = vand.u32 4294901760, %v12167_v43  ;;  %v13177_v43 = vand.u32 4294901760, %v12259_v14  ;;  %v9000_v12 = vpack.c.bf16 %v13178_v59, %v6420_v6 }
 0x746   : > { %9017 = vmatprep.subr.bf16.mxu0 %v12897_v34  ;;  %v8988_v63 = vpack.c.bf16 %v13171_v44, %v13170_v46  ;;  %v9006_v6 = vpack.c.bf16 %v6455_v38, %v6448_v24 }
 0x747   : > { %6616 = vmatmul.mubr.f32.gmra.mrb[84].mxu1 %v12457_v27  ;;  %v8991_v27 = vpack.c.bf16 %v13173_v9, %v13172_v23 }
 0x748   : > { %8986 = vmatpush1.bf16.msra.mxu1 %v8985_v53  ;;  %6845 = vmatprep.mubr.f32.mxu1 %v12196_v20  ;;  %v8994_v20 = vpack.c.bf16 %v13175_v42, %v13174_v17 }
 0x749   : > { %9019 = vmatpush1.bf16.msra.mxu0 %v12384_v2  ;;  %8987 = vmatprep.subr.bf16.mxu1 %v12897_v34  ;;  %v8997_v2 = vpack.c.bf16 %v13177_v43, %v13176_v49 }
 0x74a   : > { %9020 = vmatprep.subr.bf16.mxu0 %v12897_v34 }
 0x74c   : > { %8989 = vmatpush1.bf16.msra.mxu1 %v8988_v63 }
 0x74d   : > { %9022 = vmatpush1.bf16.msra.mxu0 %v12401_v35  ;;  %8990 = vmatprep.subr.bf16.mxu1 %v12897_v34  ;;  %v13179_v35 = vand.u32 4294901760, %v12341_v48 }
 0x74e   : > { %9023 = vmatprep.subr.bf16.mxu0 %v12897_v34 }
 0x750   : > { %8992 = vmatpush1.bf16.msra.mxu1 %v8991_v27 }
 0x751   : > { %9025 = vmatpush1.bf16.msra.mxu0 %v12421_v57  ;;  %8993 = vmatprep.subr.bf16.mxu1 %v12897_v34  ;;  %v13180_v57 = vand.u32 4294901760, %v12346_v13 }
 0x752   : > { %9026 = vmatprep.subr.bf16.mxu0 %v12897_v34 }
 0x754   : > { %8995 = vmatpush1.bf16.msra.mxu1 %v8994_v20 }
 0x755   : > { %9028 = vmatpush1.bf16.msra.mxu0 %v12435_v39  ;;  %8996 = vmatprep.subr.bf16.mxu1 %v12897_v34  ;;  %v9003_v39 = vpack.c.bf16 %v13180_v57, %v13179_v35 }
 0x756   : > { %9029 = vmatprep.subr.bf16.mxu0 %v12897_v34 }
 0x758   : > { %8998 = vmatpush1.bf16.msra.mxu1 %v8997_v2 }
 0x759   : > { %9031 = vmatpush1.bf16.msra.mxu0 %v12452_v31  ;;  %8999 = vmatprep.subr.bf16.mxu1 %v12897_v34 }
 0x75a   : > { %9032 = vmatprep.subr.bf16.mxu0 %v12897_v34 }
 0x75b   : > { %v5425_v1 = vpop.f32.mrb[30].mxu0 }
 0x75c   : > { %v5427_v14 = vpop.f32.mrb[31].mxu0  ;;  %9001 = vmatpush1.bf16.msra.mxu1 %v9000_v12 }
 0x75d   : > { %9034 = vmatpush1.bf16.msra.mxu0 %v12467_v4  ;;  %9002 = vmatprep.subr.bf16.mxu1 %v12897_v34 }
 0x75f   : > { %v5432_v21 = vpop.f32.mrb[32].mxu0 }
 0x760   : > { %v5434_v0 = vpop.f32.mrb[33].mxu0  ;;  %6944 = vmatmul.mubr.f32.vlgmr.msra.gmra.mrb[54].mxu0 %v12424_v33  ;;  %9004 = vmatpush1.bf16.msra.mxu1 %v9003_v39 }
 0x761   : > { %6949 = vmatprep.mubr.f32.mxu0 %v12427_v55  ;;  %9005 = vmatprep.subr.bf16.mxu1 %v12897_v34 }
 0x762   : > { %v5328_v48 = vpop.f32.mrb[62].mxu1 }
 0x763   : > { %v5329_v13 = vadd.f32 %v5328_v48, %v5192_v52  ;;  %v5330_v31 = vpop.f32.mrb[63].mxu1 }
 0x764   : > { %6951 = vmatmul.mubr.f32.gmra.mrb[56].mxu0 %v12441_v22  ;;  %9007 = vmatpush1.bf16.msra.mxu1 %v9006_v6 }
 0x765   : > { %v5426_v4 = vadd.f32 %v5425_v1, %v5329_v13 }
 0x766   : > { %v5335_v62 = vpop.f32.mrb[64].mxu1 }
 0x767   : > { %v5336_v58 = vadd.f32 %v5335_v62, %v5203_v41  ;;  %v5337_v50 = vpop.f32.mrb[65].mxu1  ;;  %6847 = vmatmul.mubr.f32.vlgmr.msra.gmra.mrb[86].mxu1 %v12424_v33 }
 0x768   : > { %6852 = vmatprep.mubr.f32.mxu1 %v12427_v55 }
 0x769   : > { %v5433_v30 = vadd.f32 %v5432_v21, %v5336_v58 }
 0x76b   : > { %6854 = vmatmul.mubr.f32.gmra.mrb[88].mxu1 %v12441_v22 }
 0x77f   : > { %v5712_v19 = vpop.f32.mrb[34].mxu0 }
 0x780   : > { %v5714_v24 = vpop.f32.mrb[35].mxu0 }
 0x783   : > { %v5719_v34 = vpop.f32.mrb[36].mxu0 }
 0x784   : > { %v5721_v38 = vpop.f32.mrb[37].mxu0 }
 0x786   : > { %v5535_v15 = vpop.f32.mrb[66].mxu1 }
 0x787   : > { %v5536_v16 = vadd.f32 %v5535_v15, %v5426_v4  ;;  %v5537_v10 = vpop.f32.mrb[67].mxu1 }
 0x789   : > { %v5713_v61 = vadd.f32 %v5712_v19, %v5536_v16 }
 0x78a   : > { %v5550_v29 = vpop.f32.mrb[68].mxu1 }
 0x78b   : > { %v5551_v54 = vadd.f32 %v5550_v29, %v5433_v30  ;;  %v5552_v11 = vpop.f32.mrb[69].mxu1 }
 0x78d   : > { %v5720_v25 = vadd.f32 %v5719_v34, %v5551_v54  ;;  %v7191_v34 = vld [vmem:[%s12632_s6] ss:$0 sm:$0xff] }
 0x7a3   : > { %v5932_v26 = vpop.f32.mrb[38].mxu0 }
 0x7a4   : > { %v5934_v56 = vpop.f32.mrb[39].mxu0 }
 0x7a7   : > { %v5943_v33 = vpop.f32.mrb[40].mxu0 }
 0x7a8   : > { %v5945_v51 = vpop.f32.mrb[41].mxu0 }
 0x7aa   : > { %v5829_v55 = vpop.f32.mrb[70].mxu1 }
 0x7ab   : > { %v5830_v5 = vadd.f32 %v5829_v55, %v5713_v61  ;;  %v5831_v3 = vpop.f32.mrb[71].mxu1 }
 0x7ad   : > { %v5933_v22 = vadd.f32 %v5932_v26, %v5830_v5 }
 0x7ae   : > { %v5838_v60 = vpop.f32.mrb[72].mxu1 }
 0x7af   : > { %v5839_v47 = vadd.f32 %v5838_v60, %v5720_v25  ;;  %v5840_v36 = vpop.f32.mrb[73].mxu1 }
 0x7b1   : > { %v5944_v45 = vadd.f32 %v5943_v33, %v5839_v47 }
 0x7c7   : > { %v6166_v37 = vpop.f32.mrb[42].mxu0 }
 0x7c8   : > { %v6168_v32 = vpop.f32.mrb[43].mxu0 }
 0x7cb   : > { %v6173_v52 = vpop.f32.mrb[44].mxu0 }
 0x7cc   : > { %v6175_v40 = vpop.f32.mrb[45].mxu0 }
 0x7ce   : > { %v6069_v7 = vpop.f32.mrb[74].mxu1 }
 0x7cf   : > { %v6070_v8 = vadd.f32 %v6069_v7, %v5933_v22  ;;  %v6071_v28 = vpop.f32.mrb[75].mxu1 }
 0x7d1   : > { %v6167_v18 = vadd.f32 %v6166_v37, %v6070_v8 }
 0x7d2   : > { %v6076_v53 = vpop.f32.mrb[76].mxu1 }
 0x7d3   : > { %v6077_v41 = vadd.f32 %v6076_v53, %v5944_v45  ;;  %v6078_v46 = vpop.f32.mrb[77].mxu1 }
 0x7d5   : > { %v6174_v44 = vadd.f32 %v6173_v52, %v6077_v41 }
 0x7eb   : > { %v6491_v63 = vpop.f32.mrb[46].mxu0 }
 0x7ec   : > { %v6493_v23 = vpop.f32.mrb[47].mxu0 }
 0x7ef   : > { %v6498_v9 = vpop.f32.mrb[48].mxu0 }
 0x7f0   : > { %v6500_v27 = vpop.f32.mrb[49].mxu0 }
 0x7f2   : > { %v6314_v17 = vpop.f32.mrb[78].mxu1 }
 0x7f3   : > { %v6492_v42 = vadd.f32 %v6491_v63, %v6314_v17  ;;  %v6316_v20 = vpop.f32.mrb[79].mxu1 }
 0x7f6   : > { %v6329_v49 = vpop.f32.mrb[80].mxu1 }
 0x7f7   : > { %v6499_v43 = vadd.f32 %v6498_v9, %v6329_v49  ;;  %v6331_v2 = vpop.f32.mrb[81].mxu1 }
 0x80f   : > { %v6711_v59 = vpop.f32.mrb[50].mxu0 }
 0x810   : > { %v6713_v12 = vpop.f32.mrb[51].mxu0 }
 0x813   : > { %v6722_v1 = vpop.f32.mrb[52].mxu0 }
 0x814   : > { %v6724_v14 = vpop.f32.mrb[53].mxu0 }
 0x816   : > { %v6608_v35 = vpop.f32.mrb[82].mxu1 }
 0x817   : > { %v6609_v57 = vadd.f32 %v6608_v35, %v6492_v42  ;;  %v6610_v39 = vpop.f32.mrb[83].mxu1 }
 0x819   : > { %v6712_v21 = vadd.f32 %v6711_v59, %v6609_v57 }
 0x81a   : > { %v6617_v0 = vpop.f32.mrb[84].mxu1 }
 0x81b   : > { %v6618_v6 = vadd.f32 %v6617_v0, %v6499_v43  ;;  %v6619_v48 = vpop.f32.mrb[85].mxu1 }
 0x81d   : > { %v6723_v13 = vadd.f32 %v6722_v1, %v6618_v6 }
 0x833   : > { %v6945_v31 = vpop.f32.mrb[54].mxu0 }
 0x834   : > { %v6947_v4 = vpop.f32.mrb[55].mxu0 }
 0x837   : > { %v6952_v62 = vpop.f32.mrb[56].mxu0 }
 0x838   : > { %v6954_v58 = vpop.f32.mrb[57].mxu0 }
 0x83a   : > { %v6848_v50 = vpop.f32.mrb[86].mxu1 }
 0x83b   : > { %v6849_v30 = vadd.f32 %v6848_v50, %v6712_v21  ;;  %v6850_v19 = vpop.f32.mrb[87].mxu1 }
 0x83d   : > { %v6946_v24 = vadd.f32 %v6945_v31, %v6849_v30 }
 0x83e   : > { %v6855_v38 = vpop.f32.mrb[88].mxu1 }
 0x83f   : > { %v6956_v15 = vadd.f32 %v6946_v24, %v6167_v18  ;;  %v6856_v16 = vadd.f32 %v6855_v38, %v6723_v13  ;;  %v6857_v10 = vpop.f32.mrb[89].mxu1 }
 0x841   : > { %v6965_v61 = vadd.f32 %v7191_v34, %v6956_v15  ;;  %v6953_v29 = vadd.f32 %v6952_v62, %v6856_v16 }
 0x843   : > { %v6967_v54 = vmul.f32 0.01, %v6965_v61  ;;  %v6957_v11 = vadd.f32 %v6953_v29, %v6174_v44 }
 0x845   : > { %v6969_v25 = vmax.f32 %v6965_v61, %v6967_v54  ;;  %v6966_v26 = vadd.f32 %v7191_v34, %v6957_v11 }
 0x847   : > { %6971 = vst [vmem:[%s372_s21] sm:$0xff] %v6969_v25  ;;  %v6968_v56 = vmul.f32 0.01, %v6966_v26 }
 0x849   : > { %v6970_v33 = vmax.f32 %v6966_v26, %v6968_v56 }
 0x84b   : > { %6972 = vst [vmem:[%s372_s21 + $0x8] sm:$0xff] %v6970_v33 }
 0x84c PF: > { %s21_s13 = sadd.s32 1, %s9089_s13  }
 0x84d   : > { %p18_p4 = scmp.ge.s32.totalorder %s21_s13, 4  }
 0x84f   :  { %20 = sbr.rel (!%p18_p4) target bundleno = 1 (0x1), region = 104 }

</bundles_post_ra>
